<compile_context>
chip_gen: v5e
topology: v5e:2x2
jax: 0.10.0
libtpu: 0.0.40
codegen_flags: <defaults>
</compile_context>

<pallas_src>
import functools

import jax
import jax.numpy as jnp
from jax import lax
from jax.experimental import pallas as pl
from jax.experimental.pallas import tpu as pltpu


# ----------------------------------------------------------------------------
# Hardware-aware knobs
# ----------------------------------------------------------------------------
def _vmem_capacity_bytes():
    try:
        return int(pltpu.get_tpu_info().vmem_capacity_bytes)
    except Exception:
        return 128 * 1024 * 1024          # v5e / v6e physical


def _scoped_vmem_limit():
    # 3/4 of physical, capped at 64 MiB: ~48 MiB on v7x (64 MiB VMEM), 64 MiB on v5e/v6e.
    return int(min(_vmem_capacity_bytes() * 3 // 4, 64 * 1024 * 1024))


def _mining_dtype():
    # bf16 compares halve HBM traffic and double per-vreg compare width on bf16-capable
    # VPUs (v6e / v7x). v5e has no bf16 VPU path, keep f32 there.
    try:
        kind = jax.devices()[0].device_kind.lower()
    except Exception:
        return jnp.float32
    return jnp.bfloat16 if ("v6" in kind or "v7" in kind) else jnp.float32


def _pick_tile(P, cap):
    """Largest multiple-of-128 divisor of P that is <= cap (full P if P not 128-aligned)."""
    if P % 128 != 0:
        return P
    for cand in (4096, 2048, 1024, 512, 256, 128):
        if cand <= cap and P % cand == 0:
            return cand
    return 128


def _loss_tile(P, B):
    # v7x (64 MiB VMEM): cap the loss tile at 1024; v5e/v6e can go to 2048.
    cap = 1024 if _vmem_capacity_bytes() <= 64 * 1024 * 1024 else 2048
    t = _pick_tile(P, cap)
    budget = _scoped_vmem_limit() // 2

    def footprint(tt):
        # double-buffered inputs: 3 lane-padded native (B, tt, <=128) slabs + ~50 dense rows
        return 2 * B * tt * (3 * 128 + 50) * 4

    while t > 128 and footprint(t) > budget and P % (t // 2) == 0:
        t //= 2
    return t


# ----------------------------------------------------------------------------
# Kernel 1: prior <-> ground-truth matching + box / landmark encoding
#   grid = (batch,), one image per step; batch axis "parallel" (2 TCs on v7x).
# TODO(synk): tile this kernel over P (two-pass forced-match) for production prior counts
#             (P >= ~16k) to keep the per-step footprint small on v7x's 64 MiB VMEM.
# ----------------------------------------------------------------------------
def _match_kernel(tgt_t_ref, pri_ref, loc_ref, landm_ref, conf_ref, cls_ref,
                  *, threshold, v0, v1):
    tgt_t = tgt_t_ref[0]            # (41, O)  rows: x1, y1, x2, y2, 36 landmark coords, label
    pri = pri_ref[...]              # (9, P)   rows: cx, cy, w, h, x1, y1, x2, y2, area (hoisted)
    P = pri.shape[1]
    O = tgt_t.shape[1]

    pcx, pcy, pw, ph = pri[0:1], pri[1:2], pri[2:3], pri[3:4]
    px1, py1, px2, py2 = pri[4:5], pri[5:6], pri[6:7], pri[7:8]
    area_p = pri[8:9]

    iota_p = lax.broadcasted_iota(jnp.int32, (1, P), 1)

    # Only (bto, bti) are carried through the O loop (2 rows of live state); the 41-row
    # matched slab is reconstructed afterwards with one select pass.
    bto = jnp.full((1, P), -1.0, jnp.float32)       # running best-truth overlap
    bti = jnp.zeros((1, P), jnp.int32)              # running best-truth index

    # TODO(synk): feed the per-truth box scalars (tx1..ty2) from an SMEM copy of the boxes
    #             instead of (1,1) lane broadcasts; minor VPU/XLU saving.
    for j in range(O):                              # static unroll over GT boxes
        col = tgt_t[:, j:j + 1]                     # (41, 1)
        tx1, ty1, tx2, ty2 = col[0:1], col[1:2], col[2:3], col[3:4]

        # IoU of truth j with every prior -> (1, P); guard degenerate unions against NaN.
        iw = jnp.maximum(jnp.minimum(px2, tx2) - jnp.maximum(px1, tx1), 0.0)
        ih = jnp.maximum(jnp.minimum(py2, ty2) - jnp.maximum(py1, ty1), 0.0)
        inter = iw * ih
        area_t = (tx2 - tx1) * (ty2 - ty1)
        union = area_t + area_p - inter
        ov = jnp.where(union > 0.0, inter / union, 0.0)

        valid_j = area_t > 0.0                      # padded / zero-area GT must not force-match

        # regular "best truth per prior" running argmax (first occurrence wins on ties)
        upd = ov > bto

        # forced matching: the best prior of (valid) truth j gets overlap 2 and truth j
        bpo_j = jnp.max(ov, axis=1, keepdims=True)
        bpi_j = jnp.min(jnp.where(ov == bpo_j, iota_p, P), axis=1, keepdims=True)
        force = jnp.logical_and(iota_p == bpi_j, valid_j)

        take = jnp.logical_or(upd, force)
        bto = jnp.where(force, 2.0, jnp.where(upd, ov, bto))
        bti = jnp.where(take, j, bti)

    low = bto < threshold                           # (1, P) background priors
    conf = jnp.where(low, 0.0, 1.0)

    # reconstruct matched GT row per prior (single O-unrolled select pass)
    matched = jnp.zeros((41, P), jnp.float32)
    for j in range(O):
        matched = jnp.where(bti == j, tgt_t[:, j:j + 1], matched)

    clazz = jnp.where(low, 0.0, matched[40:41, :])

    mx1, my1, mx2, my2 = matched[0:1, :], matched[1:2, :], matched[2:3, :], matched[3:4, :]

    # encode(matched, priors, variances); zeroed for background priors so degenerate GT
    # cannot leak -inf/NaN into the (mask-multiplied) loss downstream.
    gcx = ((mx1 + mx2) * 0.5 - pcx) / (v0 * pw)
    gcy = ((my1 + my2) * 0.5 - pcy) / (v0 * ph)
    gw = jnp.log((mx2 - mx1) / pw) / v1
    gh = jnp.log((my2 - my1) / ph) / v1
    loc = jnp.concatenate([gcx, gcy, gw, gh], axis=0)     # (4, P)
    loc = jnp.where(low, 0.0, loc)

    # encode_landm: rows of the 36-wide landmark slab alternate x, y
    lrow = lax.broadcasted_iota(jnp.int32, (36, P), 0)
    is_x = (lrow % 2) == 0
    center = jnp.where(is_x, pcx, pcy)
    scale = jnp.where(is_x, v0 * pw, v0 * ph)
    g_landm = (matched[4:40, :] - center) / scale          # (36, P)

    loc_ref[0] = loc
    landm_ref[0] = g_landm
    conf_ref[0] = conf
    cls_ref[0] = clazz.astype(jnp.int32)


def match_pallas(targets_t, prior_slab, threshold, variance):
    num, _, O = targets_t.shape
    P = prior_slab.shape[1]
    kern = functools.partial(_match_kernel, threshold=float(threshold),
                             v0=float(variance[0]), v1=float(variance[1]))
    return pl.pallas_call(
        kern,
        out_shape=(
            jax.ShapeDtypeStruct((num, 4, P), jnp.float32),    # loc_t   (lane-dense)
            jax.ShapeDtypeStruct((num, 36, P), jnp.float32),   # landm_t (lane-dense)
            jax.ShapeDtypeStruct((num, 1, P), jnp.float32),    # conf_t
            jax.ShapeDtypeStruct((num, 1, P), jnp.int32),      # class_t
        ),
        grid=(num,),
        in_specs=[
            pl.BlockSpec((1, 41, O), lambda b: (b, 0, 0)),     # transposed targets (tiny)
            pl.BlockSpec((9, P), lambda b: (0, 0)),            # grid-invariant prior slab
        ],
        out_specs=(
            pl.BlockSpec((1, 4, P), lambda b: (b, 0, 0)),
            pl.BlockSpec((1, 36, P), lambda b: (b, 0, 0)),
            pl.BlockSpec((1, 1, P), lambda b: (b, 0, 0)),
            pl.BlockSpec((1, 1, P), lambda b: (b, 0, 0)),
        ),
        compiler_params=pltpu.CompilerParams(
            dimension_semantics=("parallel",),
            vmem_limit_bytes=_scoped_vmem_limit()),
    )(targets_t, prior_slab)


# ----------------------------------------------------------------------------
# Kernel 2: descending-sort rank via blocked comparison counting
#   rank[b, p] = #{ j : loss[b, j] > loss[b, p] }
# Batch is folded into the block; the p tile is large & lane-dense (unmasked vst);
# the j chunk is loaded lane-dense and moved to the sublane axis with one relayout.
# TODO(synk): at production prior counts (P >= ~16k) replace this O(P^2/TJ) count with an
#             O(P * iters) top-k threshold (bisection / histogram select).
# ----------------------------------------------------------------------------
def _rank_kernel(row_ref, col_ref, cnt_ref, *, lane_dense_col):
    @pl.when(pl.program_id(1) == 0)
    def _():
        cnt_ref[...] = jnp.zeros_like(cnt_ref)

    row = row_ref[...]                              # (B, 1, TP) lane-dense
    if lane_dense_col:
        col = col_ref[...]                          # (B, 1, TJ) lane-dense (aliases row input)
        colT = jnp.transpose(col, (0, 2, 1))        # (B, TJ, 1): one XLU relayout per step
    else:
        colT = col_ref[...]                         # (B, TJ, 1) fallback: lane-sparse block
    gt = (colT > row).astype(jnp.float32)           # (B, TJ, TP) broadcasted compare (VPU)
    cnt_ref[...] += jnp.sum(gt, axis=1, keepdims=True)


def rank_count_pallas(loss_neg, *, lane_dense_col=True):
    B, _, P = loss_neg.shape                        # (B, 1, P)
    TP = _pick_tile(P, 2048)                        # output / lane tile
    TJ = _pick_tile(P, 256)                         # compare chunk
    np_, nj = P // TP, P // TJ

    if lane_dense_col:
        col_in = loss_neg
        col_spec = pl.BlockSpec((B, 1, TJ), lambda p, j: (0, 0, j))
    else:
        col_in = loss_neg.reshape(B, P, 1)          # free reshape
        col_spec = pl.BlockSpec((B, TJ, 1), lambda p, j: (0, j, 0))

    kern = functools.partial(_rank_kernel, lane_dense_col=lane_dense_col)
    return pl.pallas_call(
        kern,
        out_shape=jax.ShapeDtypeStruct((B, 1, P), jnp.float32),
        grid=(np_, nj),
        in_specs=[pl.BlockSpec((B, 1, TP), lambda p, j: (0, 0, p)), col_spec],
        out_specs=pl.BlockSpec((B, 1, TP), lambda p, j: (0, 0, p)),
        compiler_params=pltpu.CompilerParams(
            dimension_semantics=("parallel", "arbitrary"),
            vmem_limit_bytes=_scoped_vmem_limit()),
    )(loss_neg, col_in)


# ----------------------------------------------------------------------------
# Kernel 3: masked loss reductions, tiled over P with lane-dense VMEM accumulators
# ----------------------------------------------------------------------------
def _smooth_l1(d):
    ad = jnp.abs(d)
    return jnp.where(ad < 1.0, 0.5 * d * d, ad - 0.5)


def _reduce_bc(x):
    # (B, C, T) -> (1, T): sublane + batch adds only; cross-lane reduce deferred to the end.
    x = jnp.sum(x, axis=1, keepdims=True)
    x = jnp.sum(x, axis=0, keepdims=True)
    return x[0]


def _loss_kernel(loc_p_ref, lm_p_ref, cls_p_ref, conf_p_ref,
                 loc_t_ref, lm_t_ref, conf_t_ref, cls_t_ref,
                 rank_ref, nneg_ref,
                 loss_l_ref, loss_conf_ref, loss_landm_ref, loss_c_ref,
                 acc_l, acc_cf, acc_lm, acc_c,
                 *, num_classes, native_layout):
    step = pl.program_id(0)

    @pl.when(step == 0)
    def _():
        acc_l[...] = jnp.zeros_like(acc_l)
        acc_cf[...] = jnp.zeros_like(acc_cf)
        acc_lm[...] = jnp.zeros_like(acc_lm)
        acc_c[...] = jnp.zeros_like(acc_c)

    # masks built in-kernel from conf_t / rank / num_neg (no pre-built mask arrays in HBM)
    conf_t = conf_t_ref[...]                              # (B, 1, T)
    pos_b = conf_t > 0.0
    sel_b = jnp.logical_or(pos_b, rank_ref[...] < nneg_ref[...])
    pos = pos_b.astype(jnp.float32)
    sel = sel_b.astype(jnp.float32)

    if native_layout:
        # Predictions arrive in their native (B, T, C) layout; one in-kernel XLU transpose
        # each replaces a wrapper-side XLA transpose (a full extra HBM read+write per array).
        loc_p = jnp.transpose(loc_p_ref[...], (0, 2, 1))   # (B, 4, T)
        lm_p = jnp.transpose(lm_p_ref[...], (0, 2, 1))     # (B, 36, T)
        logits = jnp.transpose(cls_p_ref[...], (0, 2, 1))  # (B, C, T)
    else:
        loc_p = loc_p_ref[...]
        lm_p = lm_p_ref[...]
        logits = cls_p_ref[...]
    conf_p = conf_p_ref[...]                               # (B, 1, T) (free wrapper reshape)

    acc_l[...] += _reduce_bc(_smooth_l1(loc_p - loc_t_ref[...]) * pos)
    acc_lm[...] += _reduce_bc(_smooth_l1(lm_p - lm_t_ref[...]) * pos)
    acc_cf[...] += _reduce_bc(_smooth_l1(conf_p - conf_t) * sel)

    # cross entropy over num_classes logits; class axis statically unrolled so every slice
    # stays a lane-dense (B, 1, T) slab (no tiny-lane axis=-1 reductions).
    tgt = cls_t_ref[...]                                   # (B, 1, T) int32
    m = logits[:, 0:1, :]
    for c in range(1, num_classes):
        m = jnp.maximum(m, logits[:, c:c + 1, :])
    sumexp = jnp.zeros_like(m)
    picked = jnp.zeros_like(m)
    for c in range(num_classes):
        lc = logits[:, c:c + 1, :]
        sumexp = sumexp + jnp.exp(lc - m)
        picked = picked + jnp.where(tgt == c, lc, 0.0)
    acc_c[...] += _reduce_bc((jnp.log(sumexp) + m - picked) * sel)

    @pl.when(step == pl.num_programs(0) - 1)
    def _():
        # single cross-lane reduction + (1,1) store per term, once per kernel
        loss_l_ref[...] = jnp.sum(acc_l[...], axis=1, keepdims=True)
        loss_conf_ref[...] = jnp.sum(acc_cf[...], axis=1, keepdims=True)
        loss_landm_ref[...] = jnp.sum(acc_lm[...], axis=1, keepdims=True)
        loss_c_ref[...] = jnp.sum(acc_c[...], axis=1, keepdims=True)


def loss_pallas(loc_data, landm_data, class_data, conf_p,
                loc_t, landm_t, conf_t, cls_t, rank, num_neg, num_classes,
                *, native_layout=True):
    B, P, _ = loc_data.shape
    T = _loss_tile(P, B)
    nt = P // T

    if native_layout:
        preds = (loc_data, landm_data, class_data)
        pred_specs = [pl.BlockSpec((B, T, c), lambda i: (0, i, 0))
                      for c in (4, 36, num_classes)]
    else:
        preds = (jnp.transpose(loc_data, (0, 2, 1)),
                 jnp.transpose(landm_data, (0, 2, 1)),
                 jnp.transpose(class_data, (0, 2, 1)))
        pred_specs = [pl.BlockSpec((B, c, T), lambda i: (0, 0, i))
                      for c in (4, 36, num_classes)]

    def cpt(c):   # channel-major (B, c, P) operands
        return pl.BlockSpec((B, c, T), lambda i: (0, 0, i))

    kern = functools.partial(_loss_kernel, num_classes=num_classes,
                             native_layout=native_layout)
    outs = pl.pallas_call(
        kern,
        out_shape=tuple(jax.ShapeDtypeStruct((1, 1), jnp.float32) for _ in range(4)),
        grid=(nt,),
        in_specs=pred_specs + [cpt(1),                      # conf predictions (B,1,P)
                               cpt(4), cpt(36), cpt(1), cpt(1),
                               cpt(1),                      # rank
                               pl.BlockSpec((B, 1, 1), lambda i: (0, 0, 0))],  # num_neg
        out_specs=tuple(pl.BlockSpec((1, 1), lambda i: (0, 0)) for _ in range(4)),
        scratch_shapes=[pltpu.VMEM((1, T), jnp.float32) for _ in range(4)],
        compiler_params=pltpu.CompilerParams(
            dimension_semantics=("arbitrary",),
            vmem_limit_bytes=_scoped_vmem_limit()),
    )(*preds, conf_p, loc_t, landm_t, conf_t, cls_t, rank, num_neg)
    return tuple(o[0, 0] for o in outs)


# ----------------------------------------------------------------------------
# MultiBoxLoss forward
# ----------------------------------------------------------------------------
class MultiBoxLoss:
    def __init__(self, num_classes, overlap_thresh, neg_pos, variance, mining_dtype=None):
        self.num_classes = num_classes
        self.threshold = overlap_thresh
        self.negpos_ratio = neg_pos
        self.variance = variance
        self.mining_dtype = mining_dtype if mining_dtype is not None else _mining_dtype()

    def __call__(self, predictions, priors, targets):
        loc_data, conf_data, landm_data, class_data = predictions
        num, P, _ = loc_data.shape

        # --- kernel 1: matching + encoding (P on the lane axis) ---
        targets_t = jnp.transpose(targets, (0, 2, 1))          # (B, 41, O) tiny
        pri = priors.astype(jnp.float32)
        pcx, pcy, pw, ph = pri[:, 0], pri[:, 1], pri[:, 2], pri[:, 3]
        prior_slab = jnp.stack(                                 # grid-invariant (9, P) slab
            [pcx, pcy, pw, ph,
             pcx - 0.5 * pw, pcy - 0.5 * ph,
             pcx + 0.5 * pw, pcy + 0.5 * ph,
             pw * ph], axis=0)
        loc_t, landm_t, conf_t3, cls_t3 = match_pallas(
            targets_t, prior_slab, self.threshold, self.variance)

        # --- hard negative mining: reference mines on the signed residual conf_pred - conf_t
        #     with positives zeroed; ranking done by comparison counting (ties share ranks). ---
        conf_p = conf_data.reshape(num, 1, P)                   # free reshape (C == 1)
        pos3 = conf_t3 > 0.0
        mining = jnp.where(pos3, 0.0, conf_p - conf_t3).astype(self.mining_dtype)
        try:
            rank = rank_count_pallas(mining, lane_dense_col=True)
        except Exception:   # fallback if this Mosaic build rejects the in-kernel relayout
            rank = rank_count_pallas(mining, lane_dense_col=False)

        num_pos = jnp.sum(pos3.astype(jnp.int32), axis=(1, 2))              # (B,)
        num_neg = jnp.minimum(self.negpos_ratio * num_pos, P - 1)
        num_neg_f = num_neg.astype(jnp.float32).reshape(num, 1, 1)

        # --- kernel 3: masked loss reductions (predictions read in native layout) ---
        try:
            losses = loss_pallas(loc_data, landm_data, class_data, conf_p,
                                 loc_t, landm_t, conf_t3, cls_t3, rank, num_neg_f,
                                 self.num_classes, native_layout=True)
        except Exception:   # fallback: XLA transposes predictions (extra HBM pass)
            losses = loss_pallas(loc_data, landm_data, class_data, conf_p,
                                 loc_t, landm_t, conf_t3, cls_t3, rank, num_neg_f,
                                 self.num_classes, native_layout=False)
        loss_l, loss_conf, loss_landm, loss_c = losses

        N = jnp.maximum(jnp.sum(num_pos).astype(jnp.float32), 1.0)
        return loss_l / N, loss_conf / N, loss_landm / N, loss_c / N


# ----------------------------------------------------------------------------
# Main
# ----------------------------------------------------------------------------
if __name__ == "__main__":
    num = 2        # batch
    P = 256        # number of priors (multiple of 128 -> lane-dense tiles)
    O = 8          # ground-truth boxes per image (fixed, in place of the torch list)
    num_classes = 3
    threshold = 0.35
    negpos_ratio = 7
    variance = (0.1, 0.2)

    key = jax.random.PRNGKey(0)
    ks = jax.random.split(key, 10)

    loc_data = jax.random.normal(ks[0], (num, P, 4), jnp.float32)
    conf_data = jax.random.normal(ks[1], (num, P, 1), jnp.float32)
    landm_data = jax.random.normal(ks[2], (num, P, 36), jnp.float32)
    class_data = jax.random.normal(ks[3], (num, P, 3), jnp.float32)

    # priors: center form (cx, cy, w, h)
    cxcy = jax.random.uniform(ks[4], (P, 2), minval=0.05, maxval=0.95)
    pwh = jax.random.uniform(ks[5], (P, 2), minval=0.05, maxval=0.30)
    priors = jnp.concatenate([cxcy, pwh], axis=1).astype(jnp.float32)

    # targets: [x1, y1, x2, y2, 36 landmark coords, label]
    xy1 = jax.random.uniform(ks[6], (num, O, 2), minval=0.0, maxval=0.6)
    bwh = jax.random.uniform(ks[7], (num, O, 2), minval=0.05, maxval=0.35)
    boxes = jnp.concatenate([xy1, xy1 + bwh], axis=-1)
    lms = jax.random.uniform(ks[8], (num, O, 36), minval=0.0, maxval=1.0)
    labels = jax.random.randint(ks[9], (num, O), 1, num_classes).astype(jnp.float32)[..., None]
    targets = jnp.concatenate([boxes, lms, labels], axis=-1).astype(jnp.float32)

    criterion = MultiBoxLoss(num_classes, threshold, negpos_ratio, variance)
    losses = criterion((loc_data, conf_data, landm_data, class_data), priors, targets)
    jax.block_until_ready(losses)
    print("KERNEL_OK")
</pallas_src>

<mosaic_0001>
module attributes {stable_mosaic.version = 11 : i64} {
  func.func @_match_kernel(%arg0: i32, %arg1: memref<1x41x8xf32, #tpu.memory_space<vmem>>, %arg2: memref<9x256xf32, #tpu.memory_space<vmem>>, %arg3: memref<1x4x256xf32, #tpu.memory_space<vmem>>, %arg4: memref<1x36x256xf32, #tpu.memory_space<vmem>>, %arg5: memref<1x1x256xf32, #tpu.memory_space<vmem>>, %arg6: memref<1x1x256xi32, #tpu.memory_space<vmem>>) attributes {dimension_semantics = [#tpu.dimension_semantics<parallel>], iteration_bounds = array<i64: 2>, scalar_prefetch = 0 : i64, scratch_operands = 0 : i64, tpu.core_type = #tpu.core_type<tc>, window_params = [{transform_indices = @transform_0, window_bounds = array<i64: 1, 41, 8>}, {pipeline_mode = #tpu.pipeline_mode<synchronous>, transform_indices = @transform_1, window_bounds = array<i64: 9, 256>}, {transform_indices = @transform_2, window_bounds = array<i64: 1, 4, 256>}, {transform_indices = @transform_3, window_bounds = array<i64: 1, 36, 256>}, {transform_indices = @transform_4, window_bounds = array<i64: 1, 1, 256>}, {transform_indices = @transform_5, window_bounds = array<i64: 1, 1, 256>}]} {
    %c0 = arith.constant 0 : index
    %c0_0 = arith.constant 0 : index
    %c0_1 = arith.constant 0 : index
    %0 = vector.load %arg1[%c0, %c0_0, %c0_1] : memref<1x41x8xf32, #tpu.memory_space<vmem>>, vector<1x41x8xf32>
    %1 = vector.shape_cast %0 : vector<1x41x8xf32> to vector<41x8xf32>
    %c0_2 = arith.constant 0 : index
    %c0_3 = arith.constant 0 : index
    %2 = vector.load %arg2[%c0_2, %c0_3] : memref<9x256xf32, #tpu.memory_space<vmem>>, vector<9x256xf32>
    %3 = vector.extract_strided_slice %2 {offsets = [0, 0], sizes = [1, 256], strides = [1, 1]} : vector<9x256xf32> to vector<1x256xf32>
    %4 = vector.extract_strided_slice %2 {offsets = [1, 0], sizes = [1, 256], strides = [1, 1]} : vector<9x256xf32> to vector<1x256xf32>
    %5 = vector.extract_strided_slice %2 {offsets = [2, 0], sizes = [1, 256], strides = [1, 1]} : vector<9x256xf32> to vector<1x256xf32>
    %6 = vector.extract_strided_slice %2 {offsets = [3, 0], sizes = [1, 256], strides = [1, 1]} : vector<9x256xf32> to vector<1x256xf32>
    %7 = vector.extract_strided_slice %2 {offsets = [4, 0], sizes = [1, 256], strides = [1, 1]} : vector<9x256xf32> to vector<1x256xf32>
    %8 = vector.extract_strided_slice %2 {offsets = [5, 0], sizes = [1, 256], strides = [1, 1]} : vector<9x256xf32> to vector<1x256xf32>
    %9 = vector.extract_strided_slice %2 {offsets = [6, 0], sizes = [1, 256], strides = [1, 1]} : vector<9x256xf32> to vector<1x256xf32>
    %10 = vector.extract_strided_slice %2 {offsets = [7, 0], sizes = [1, 256], strides = [1, 1]} : vector<9x256xf32> to vector<1x256xf32>
    %11 = vector.extract_strided_slice %2 {offsets = [8, 0], sizes = [1, 256], strides = [1, 1]} : vector<9x256xf32> to vector<1x256xf32>
    %12 = tpu.iota {dimensions = array<i32: 1>} : vector<1x256xi32>
    %cst = arith.constant -1.000000e+00 : f32
    %13 = vector.broadcast %cst : f32 to vector<1x256xf32>
    %c0_i32 = arith.constant 0 : i32
    %14 = vector.broadcast %c0_i32 : i32 to vector<1x256xi32>
    %15 = vector.extract_strided_slice %1 {offsets = [0, 0], sizes = [41, 1], strides = [1, 1]} : vector<41x8xf32> to vector<41x1xf32>
    %16 = vector.extract_strided_slice %15 {offsets = [0, 0], sizes = [1, 1], strides = [1, 1]} : vector<41x1xf32> to vector<1x1xf32>
    %17 = vector.extract_strided_slice %15 {offsets = [1, 0], sizes = [1, 1], strides = [1, 1]} : vector<41x1xf32> to vector<1x1xf32>
    %18 = vector.extract_strided_slice %15 {offsets = [2, 0], sizes = [1, 1], strides = [1, 1]} : vector<41x1xf32> to vector<1x1xf32>
    %19 = vector.extract_strided_slice %15 {offsets = [3, 0], sizes = [1, 1], strides = [1, 1]} : vector<41x1xf32> to vector<1x1xf32>
    %20 = vector.broadcast %18 : vector<1x1xf32> to vector<1x256xf32>
    %21 = arith.minimumf %9, %20 : vector<1x256xf32>
    %22 = vector.broadcast %16 : vector<1x1xf32> to vector<1x256xf32>
    %23 = arith.maximumf %7, %22 : vector<1x256xf32>
    %24 = arith.subf %21, %23 : vector<1x256xf32>
    %cst_4 = arith.constant 0.000000e+00 : f32
    %25 = vector.broadcast %cst_4 : f32 to vector<1x256xf32>
    %26 = arith.maximumf %24, %25 : vector<1x256xf32>
    %27 = vector.broadcast %19 : vector<1x1xf32> to vector<1x256xf32>
    %28 = arith.minimumf %10, %27 : vector<1x256xf32>
    %29 = vector.broadcast %17 : vector<1x1xf32> to vector<1x256xf32>
    %30 = arith.maximumf %8, %29 : vector<1x256xf32>
    %31 = arith.subf %28, %30 : vector<1x256xf32>
    %cst_5 = arith.constant 0.000000e+00 : f32
    %32 = vector.broadcast %cst_5 : f32 to vector<1x256xf32>
    %33 = arith.maximumf %31, %32 : vector<1x256xf32>
    %34 = arith.mulf %26, %33 : vector<1x256xf32>
    %35 = arith.subf %18, %16 : vector<1x1xf32>
    %36 = arith.subf %19, %17 : vector<1x1xf32>
    %37 = arith.mulf %35, %36 : vector<1x1xf32>
    %38 = vector.broadcast %37 : vector<1x1xf32> to vector<1x256xf32>
    %39 = arith.addf %38, %11 : vector<1x256xf32>
    %40 = arith.subf %39, %34 : vector<1x256xf32>
    %cst_6 = arith.constant 0.000000e+00 : f32
    %41 = vector.broadcast %cst_6 : f32 to vector<1x256xf32>
    %42 = arith.cmpf ogt, %40, %41 : vector<1x256xf32>
    %43 = arith.divf %34, %40 : vector<1x256xf32>
    %cst_7 = arith.constant 0.000000e+00 : f32
    %44 = vector.broadcast %cst_7 : f32 to vector<1x256xf32>
    %45 = arith.select %42, %43, %44 : vector<1x256xi1>, vector<1x256xf32>
    %cst_8 = arith.constant 0.000000e+00 : f32
    %46 = vector.broadcast %cst_8 : f32 to vector<1x1xf32>
    %47 = arith.cmpf ogt, %37, %46 : vector<1x1xf32>
    %48 = arith.cmpf ogt, %45, %13 : vector<1x256xf32>
    %cst_9 = arith.constant dense<0xFF800000> : vector<1xf32>
    %49 = vector.multi_reduction <maximumf>, %45, %cst_9 [1] : vector<1x256xf32> to vector<1xf32>
    %50 = vector.shape_cast %49 : vector<1xf32> to vector<1x1xf32>
    %51 = vector.broadcast %50 : vector<1x1xf32> to vector<1x256xf32>
    %52 = arith.cmpf oeq, %45, %51 : vector<1x256xf32>
    %c256_i32 = arith.constant 256 : i32
    %53 = vector.broadcast %c256_i32 : i32 to vector<1x256xi32>
    %54 = arith.select %52, %12, %53 : vector<1x256xi1>, vector<1x256xi32>
    %cst_10 = arith.constant dense<2147483647> : vector<1xi32>
    %55 = vector.multi_reduction <minsi>, %54, %cst_10 [1] : vector<1x256xi32> to vector<1xi32>
    %56 = vector.shape_cast %55 : vector<1xi32> to vector<1x1xi32>
    %57 = vector.broadcast %56 : vector<1x1xi32> to vector<1x256xi32>
    %58 = arith.cmpi eq, %12, %57 : vector<1x256xi32>
    %59 = vector.broadcast %47 : vector<1x1xi1> to vector<1x256xi1>
    %60 = arith.andi %58, %59 : vector<1x256xi1>
    %61 = arith.ori %48, %60 : vector<1x256xi1>
    %62 = arith.select %48, %45, %13 : vector<1x256xi1>, vector<1x256xf32>
    %cst_11 = arith.constant 2.000000e+00 : f32
    %63 = vector.broadcast %cst_11 : f32 to vector<1x256xf32>
    %64 = arith.select %60, %63, %62 : vector<1x256xi1>, vector<1x256xf32>
    %c0_i32_12 = arith.constant 0 : i32
    %65 = vector.broadcast %c0_i32_12 : i32 to vector<1x256xi32>
    %66 = arith.select %61, %65, %14 : vector<1x256xi1>, vector<1x256xi32>
    %67 = vector.extract_strided_slice %1 {offsets = [0, 1], sizes = [41, 1], strides = [1, 1]} : vector<41x8xf32> to vector<41x1xf32>
    %68 = vector.extract_strided_slice %67 {offsets = [0, 0], sizes = [1, 1], strides = [1, 1]} : vector<41x1xf32> to vector<1x1xf32>
    %69 = vector.extract_strided_slice %67 {offsets = [1, 0], sizes = [1, 1], strides = [1, 1]} : vector<41x1xf32> to vector<1x1xf32>
    %70 = vector.extract_strided_slice %67 {offsets = [2, 0], sizes = [1, 1], strides = [1, 1]} : vector<41x1xf32> to vector<1x1xf32>
    %71 = vector.extract_strided_slice %67 {offsets = [3, 0], sizes = [1, 1], strides = [1, 1]} : vector<41x1xf32> to vector<1x1xf32>
    %72 = vector.broadcast %70 : vector<1x1xf32> to vector<1x256xf32>
    %73 = arith.minimumf %9, %72 : vector<1x256xf32>
    %74 = vector.broadcast %68 : vector<1x1xf32> to vector<1x256xf32>
    %75 = arith.maximumf %7, %74 : vector<1x256xf32>
    %76 = arith.subf %73, %75 : vector<1x256xf32>
    %cst_13 = arith.constant 0.000000e+00 : f32
    %77 = vector.broadcast %cst_13 : f32 to vector<1x256xf32>
    %78 = arith.maximumf %76, %77 : vector<1x256xf32>
    %79 = vector.broadcast %71 : vector<1x1xf32> to vector<1x256xf32>
    %80 = arith.minimumf %10, %79 : vector<1x256xf32>
    %81 = vector.broadcast %69 : vector<1x1xf32> to vector<1x256xf32>
    %82 = arith.maximumf %8, %81 : vector<1x256xf32>
    %83 = arith.subf %80, %82 : vector<1x256xf32>
    %cst_14 = arith.constant 0.000000e+00 : f32
    %84 = vector.broadcast %cst_14 : f32 to vector<1x256xf32>
    %85 = arith.maximumf %83, %84 : vector<1x256xf32>
    %86 = arith.mulf %78, %85 : vector<1x256xf32>
    %87 = arith.subf %70, %68 : vector<1x1xf32>
    %88 = arith.subf %71, %69 : vector<1x1xf32>
    %89 = arith.mulf %87, %88 : vector<1x1xf32>
    %90 = vector.broadcast %89 : vector<1x1xf32> to vector<1x256xf32>
    %91 = arith.addf %90, %11 : vector<1x256xf32>
    %92 = arith.subf %91, %86 : vector<1x256xf32>
    %cst_15 = arith.constant 0.000000e+00 : f32
    %93 = vector.broadcast %cst_15 : f32 to vector<1x256xf32>
    %94 = arith.cmpf ogt, %92, %93 : vector<1x256xf32>
    %95 = arith.divf %86, %92 : vector<1x256xf32>
    %cst_16 = arith.constant 0.000000e+00 : f32
    %96 = vector.broadcast %cst_16 : f32 to vector<1x256xf32>
    %97 = arith.select %94, %95, %96 : vector<1x256xi1>, vector<1x256xf32>
    %cst_17 = arith.constant 0.000000e+00 : f32
    %98 = vector.broadcast %cst_17 : f32 to vector<1x1xf32>
    %99 = arith.cmpf ogt, %89, %98 : vector<1x1xf32>
    %100 = arith.cmpf ogt, %97, %64 : vector<1x256xf32>
    %cst_18 = arith.constant dense<0xFF800000> : vector<1xf32>
    %101 = vector.multi_reduction <maximumf>, %97, %cst_18 [1] : vector<1x256xf32> to vector<1xf32>
    %102 = vector.shape_cast %101 : vector<1xf32> to vector<1x1xf32>
    %103 = vector.broadcast %102 : vector<1x1xf32> to vector<1x256xf32>
    %104 = arith.cmpf oeq, %97, %103 : vector<1x256xf32>
    %c256_i32_19 = arith.constant 256 : i32
    %105 = vector.broadcast %c256_i32_19 : i32 to vector<1x256xi32>
    %106 = arith.select %104, %12, %105 : vector<1x256xi1>, vector<1x256xi32>
    %cst_20 = arith.constant dense<2147483647> : vector<1xi32>
    %107 = vector.multi_reduction <minsi>, %106, %cst_20 [1] : vector<1x256xi32> to vector<1xi32>
    %108 = vector.shape_cast %107 : vector<1xi32> to vector<1x1xi32>
    %109 = vector.broadcast %108 : vector<1x1xi32> to vector<1x256xi32>
    %110 = arith.cmpi eq, %12, %109 : vector<1x256xi32>
    %111 = vector.broadcast %99 : vector<1x1xi1> to vector<1x256xi1>
    %112 = arith.andi %110, %111 : vector<1x256xi1>
    %113 = arith.ori %100, %112 : vector<1x256xi1>
    %114 = arith.select %100, %97, %64 : vector<1x256xi1>, vector<1x256xf32>
    %cst_21 = arith.constant 2.000000e+00 : f32
    %115 = vector.broadcast %cst_21 : f32 to vector<1x256xf32>
    %116 = arith.select %112, %115, %114 : vector<1x256xi1>, vector<1x256xf32>
    %c1_i32 = arith.constant 1 : i32
    %117 = vector.broadcast %c1_i32 : i32 to vector<1x256xi32>
    %118 = arith.select %113, %117, %66 : vector<1x256xi1>, vector<1x256xi32>
    %119 = vector.extract_strided_slice %1 {offsets = [0, 2], sizes = [41, 1], strides = [1, 1]} : vector<41x8xf32> to vector<41x1xf32>
    %120 = vector.extract_strided_slice %119 {offsets = [0, 0], sizes = [1, 1], strides = [1, 1]} : vector<41x1xf32> to vector<1x1xf32>
    %121 = vector.extract_strided_slice %119 {offsets = [1, 0], sizes = [1, 1], strides = [1, 1]} : vector<41x1xf32> to vector<1x1xf32>
    %122 = vector.extract_strided_slice %119 {offsets = [2, 0], sizes = [1, 1], strides = [1, 1]} : vector<41x1xf32> to vector<1x1xf32>
    %123 = vector.extract_strided_slice %119 {offsets = [3, 0], sizes = [1, 1], strides = [1, 1]} : vector<41x1xf32> to vector<1x1xf32>
    %124 = vector.broadcast %122 : vector<1x1xf32> to vector<1x256xf32>
    %125 = arith.minimumf %9, %124 : vector<1x256xf32>
    %126 = vector.broadcast %120 : vector<1x1xf32> to vector<1x256xf32>
    %127 = arith.maximumf %7, %126 : vector<1x256xf32>
    %128 = arith.subf %125, %127 : vector<1x256xf32>
    %cst_22 = arith.constant 0.000000e+00 : f32
    %129 = vector.broadcast %cst_22 : f32 to vector<1x256xf32>
    %130 = arith.maximumf %128, %129 : vector<1x256xf32>
    %131 = vector.broadcast %123 : vector<1x1xf32> to vector<1x256xf32>
    %132 = arith.minimumf %10, %131 : vector<1x256xf32>
    %133 = vector.broadcast %121 : vector<1x1xf32> to vector<1x256xf32>
    %134 = arith.maximumf %8, %133 : vector<1x256xf32>
    %135 = arith.subf %132, %134 : vector<1x256xf32>
    %cst_23 = arith.constant 0.000000e+00 : f32
    %136 = vector.broadcast %cst_23 : f32 to vector<1x256xf32>
    %137 = arith.maximumf %135, %136 : vector<1x256xf32>
    %138 = arith.mulf %130, %137 : vector<1x256xf32>
    %139 = arith.subf %122, %120 : vector<1x1xf32>
    %140 = arith.subf %123, %121 : vector<1x1xf32>
    %141 = arith.mulf %139, %140 : vector<1x1xf32>
    %142 = vector.broadcast %141 : vector<1x1xf32> to vector<1x256xf32>
    %143 = arith.addf %142, %11 : vector<1x256xf32>
    %144 = arith.subf %143, %138 : vector<1x256xf32>
    %cst_24 = arith.constant 0.000000e+00 : f32
    %145 = vector.broadcast %cst_24 : f32 to vector<1x256xf32>
    %146 = arith.cmpf ogt, %144, %145 : vector<1x256xf32>
    %147 = arith.divf %138, %144 : vector<1x256xf32>
    %cst_25 = arith.constant 0.000000e+00 : f32
    %148 = vector.broadcast %cst_25 : f32 to vector<1x256xf32>
    %149 = arith.select %146, %147, %148 : vector<1x256xi1>, vector<1x256xf32>
    %cst_26 = arith.constant 0.000000e+00 : f32
    %150 = vector.broadcast %cst_26 : f32 to vector<1x1xf32>
    %151 = arith.cmpf ogt, %141, %150 : vector<1x1xf32>
    %152 = arith.cmpf ogt, %149, %116 : vector<1x256xf32>
    %cst_27 = arith.constant dense<0xFF800000> : vector<1xf32>
    %153 = vector.multi_reduction <maximumf>, %149, %cst_27 [1] : vector<1x256xf32> to vector<1xf32>
    %154 = vector.shape_cast %153 : vector<1xf32> to vector<1x1xf32>
    %155 = vector.broadcast %154 : vector<1x1xf32> to vector<1x256xf32>
    %156 = arith.cmpf oeq, %149, %155 : vector<1x256xf32>
    %c256_i32_28 = arith.constant 256 : i32
    %157 = vector.broadcast %c256_i32_28 : i32 to vector<1x256xi32>
    %158 = arith.select %156, %12, %157 : vector<1x256xi1>, vector<1x256xi32>
    %cst_29 = arith.constant dense<2147483647> : vector<1xi32>
    %159 = vector.multi_reduction <minsi>, %158, %cst_29 [1] : vector<1x256xi32> to vector<1xi32>
    %160 = vector.shape_cast %159 : vector<1xi32> to vector<1x1xi32>
    %161 = vector.broadcast %160 : vector<1x1xi32> to vector<1x256xi32>
    %162 = arith.cmpi eq, %12, %161 : vector<1x256xi32>
    %163 = vector.broadcast %151 : vector<1x1xi1> to vector<1x256xi1>
    %164 = arith.andi %162, %163 : vector<1x256xi1>
    %165 = arith.ori %152, %164 : vector<1x256xi1>
    %166 = arith.select %152, %149, %116 : vector<1x256xi1>, vector<1x256xf32>
    %cst_30 = arith.constant 2.000000e+00 : f32
    %167 = vector.broadcast %cst_30 : f32 to vector<1x256xf32>
    %168 = arith.select %164, %167, %166 : vector<1x256xi1>, vector<1x256xf32>
    %c2_i32 = arith.constant 2 : i32
    %169 = vector.broadcast %c2_i32 : i32 to vector<1x256xi32>
    %170 = arith.select %165, %169, %118 : vector<1x256xi1>, vector<1x256xi32>
    %171 = vector.extract_strided_slice %1 {offsets = [0, 3], sizes = [41, 1], strides = [1, 1]} : vector<41x8xf32> to vector<41x1xf32>
    %172 = vector.extract_strided_slice %171 {offsets = [0, 0], sizes = [1, 1], strides = [1, 1]} : vector<41x1xf32> to vector<1x1xf32>
    %173 = vector.extract_strided_slice %171 {offsets = [1, 0], sizes = [1, 1], strides = [1, 1]} : vector<41x1xf32> to vector<1x1xf32>
    %174 = vector.extract_strided_slice %171 {offsets = [2, 0], sizes = [1, 1], strides = [1, 1]} : vector<41x1xf32> to vector<1x1xf32>
    %175 = vector.extract_strided_slice %171 {offsets = [3, 0], sizes = [1, 1], strides = [1, 1]} : vector<41x1xf32> to vector<1x1xf32>
    %176 = vector.broadcast %174 : vector<1x1xf32> to vector<1x256xf32>
    %177 = arith.minimumf %9, %176 : vector<1x256xf32>
    %178 = vector.broadcast %172 : vector<1x1xf32> to vector<1x256xf32>
    %179 = arith.maximumf %7, %178 : vector<1x256xf32>
    %180 = arith.subf %177, %179 : vector<1x256xf32>
    %cst_31 = arith.constant 0.000000e+00 : f32
    %181 = vector.broadcast %cst_31 : f32 to vector<1x256xf32>
    %182 = arith.maximumf %180, %181 : vector<1x256xf32>
    %183 = vector.broadcast %175 : vector<1x1xf32> to vector<1x256xf32>
    %184 = arith.minimumf %10, %183 : vector<1x256xf32>
    %185 = vector.broadcast %173 : vector<1x1xf32> to vector<1x256xf32>
    %186 = arith.maximumf %8, %185 : vector<1x256xf32>
    %187 = arith.subf %184, %186 : vector<1x256xf32>
    %cst_32 = arith.constant 0.000000e+00 : f32
    %188 = vector.broadcast %cst_32 : f32 to vector<1x256xf32>
    %189 = arith.maximumf %187, %188 : vector<1x256xf32>
    %190 = arith.mulf %182, %189 : vector<1x256xf32>
    %191 = arith.subf %174, %172 : vector<1x1xf32>
    %192 = arith.subf %175, %173 : vector<1x1xf32>
    %193 = arith.mulf %191, %192 : vector<1x1xf32>
    %194 = vector.broadcast %193 : vector<1x1xf32> to vector<1x256xf32>
    %195 = arith.addf %194, %11 : vector<1x256xf32>
    %196 = arith.subf %195, %190 : vector<1x256xf32>
    %cst_33 = arith.constant 0.000000e+00 : f32
    %197 = vector.broadcast %cst_33 : f32 to vector<1x256xf32>
    %198 = arith.cmpf ogt, %196, %197 : vector<1x256xf32>
    %199 = arith.divf %190, %196 : vector<1x256xf32>
    %cst_34 = arith.constant 0.000000e+00 : f32
    %200 = vector.broadcast %cst_34 : f32 to vector<1x256xf32>
    %201 = arith.select %198, %199, %200 : vector<1x256xi1>, vector<1x256xf32>
    %cst_35 = arith.constant 0.000000e+00 : f32
    %202 = vector.broadcast %cst_35 : f32 to vector<1x1xf32>
    %203 = arith.cmpf ogt, %193, %202 : vector<1x1xf32>
    %204 = arith.cmpf ogt, %201, %168 : vector<1x256xf32>
    %cst_36 = arith.constant dense<0xFF800000> : vector<1xf32>
    %205 = vector.multi_reduction <maximumf>, %201, %cst_36 [1] : vector<1x256xf32> to vector<1xf32>
    %206 = vector.shape_cast %205 : vector<1xf32> to vector<1x1xf32>
    %207 = vector.broadcast %206 : vector<1x1xf32> to vector<1x256xf32>
    %208 = arith.cmpf oeq, %201, %207 : vector<1x256xf32>
    %c256_i32_37 = arith.constant 256 : i32
    %209 = vector.broadcast %c256_i32_37 : i32 to vector<1x256xi32>
    %210 = arith.select %208, %12, %209 : vector<1x256xi1>, vector<1x256xi32>
    %cst_38 = arith.constant dense<2147483647> : vector<1xi32>
    %211 = vector.multi_reduction <minsi>, %210, %cst_38 [1] : vector<1x256xi32> to vector<1xi32>
    %212 = vector.shape_cast %211 : vector<1xi32> to vector<1x1xi32>
    %213 = vector.broadcast %212 : vector<1x1xi32> to vector<1x256xi32>
    %214 = arith.cmpi eq, %12, %213 : vector<1x256xi32>
    %215 = vector.broadcast %203 : vector<1x1xi1> to vector<1x256xi1>
    %216 = arith.andi %214, %215 : vector<1x256xi1>
    %217 = arith.ori %204, %216 : vector<1x256xi1>
    %218 = arith.select %204, %201, %168 : vector<1x256xi1>, vector<1x256xf32>
    %cst_39 = arith.constant 2.000000e+00 : f32
    %219 = vector.broadcast %cst_39 : f32 to vector<1x256xf32>
    %220 = arith.select %216, %219, %218 : vector<1x256xi1>, vector<1x256xf32>
    %c3_i32 = arith.constant 3 : i32
    %221 = vector.broadcast %c3_i32 : i32 to vector<1x256xi32>
    %222 = arith.select %217, %221, %170 : vector<1x256xi1>, vector<1x256xi32>
    %223 = vector.extract_strided_slice %1 {offsets = [0, 4], sizes = [41, 1], strides = [1, 1]} : vector<41x8xf32> to vector<41x1xf32>
    %224 = vector.extract_strided_slice %223 {offsets = [0, 0], sizes = [1, 1], strides = [1, 1]} : vector<41x1xf32> to vector<1x1xf32>
    %225 = vector.extract_strided_slice %223 {offsets = [1, 0], sizes = [1, 1], strides = [1, 1]} : vector<41x1xf32> to vector<1x1xf32>
    %226 = vector.extract_strided_slice %223 {offsets = [2, 0], sizes = [1, 1], strides = [1, 1]} : vector<41x1xf32> to vector<1x1xf32>
    %227 = vector.extract_strided_slice %223 {offsets = [3, 0], sizes = [1, 1], strides = [1, 1]} : vector<41x1xf32> to vector<1x1xf32>
    %228 = vector.broadcast %226 : vector<1x1xf32> to vector<1x256xf32>
    %229 = arith.minimumf %9, %228 : vector<1x256xf32>
    %230 = vector.broadcast %224 : vector<1x1xf32> to vector<1x256xf32>
    %231 = arith.maximumf %7, %230 : vector<1x256xf32>
    %232 = arith.subf %229, %231 : vector<1x256xf32>
    %cst_40 = arith.constant 0.000000e+00 : f32
    %233 = vector.broadcast %cst_40 : f32 to vector<1x256xf32>
    %234 = arith.maximumf %232, %233 : vector<1x256xf32>
    %235 = vector.broadcast %227 : vector<1x1xf32> to vector<1x256xf32>
    %236 = arith.minimumf %10, %235 : vector<1x256xf32>
    %237 = vector.broadcast %225 : vector<1x1xf32> to vector<1x256xf32>
    %238 = arith.maximumf %8, %237 : vector<1x256xf32>
    %239 = arith.subf %236, %238 : vector<1x256xf32>
    %cst_41 = arith.constant 0.000000e+00 : f32
    %240 = vector.broadcast %cst_41 : f32 to vector<1x256xf32>
    %241 = arith.maximumf %239, %240 : vector<1x256xf32>
    %242 = arith.mulf %234, %241 : vector<1x256xf32>
    %243 = arith.subf %226, %224 : vector<1x1xf32>
    %244 = arith.subf %227, %225 : vector<1x1xf32>
    %245 = arith.mulf %243, %244 : vector<1x1xf32>
    %246 = vector.broadcast %245 : vector<1x1xf32> to vector<1x256xf32>
    %247 = arith.addf %246, %11 : vector<1x256xf32>
    %248 = arith.subf %247, %242 : vector<1x256xf32>
    %cst_42 = arith.constant 0.000000e+00 : f32
    %249 = vector.broadcast %cst_42 : f32 to vector<1x256xf32>
    %250 = arith.cmpf ogt, %248, %249 : vector<1x256xf32>
    %251 = arith.divf %242, %248 : vector<1x256xf32>
    %cst_43 = arith.constant 0.000000e+00 : f32
    %252 = vector.broadcast %cst_43 : f32 to vector<1x256xf32>
    %253 = arith.select %250, %251, %252 : vector<1x256xi1>, vector<1x256xf32>
    %cst_44 = arith.constant 0.000000e+00 : f32
    %254 = vector.broadcast %cst_44 : f32 to vector<1x1xf32>
    %255 = arith.cmpf ogt, %245, %254 : vector<1x1xf32>
    %256 = arith.cmpf ogt, %253, %220 : vector<1x256xf32>
    %cst_45 = arith.constant dense<0xFF800000> : vector<1xf32>
    %257 = vector.multi_reduction <maximumf>, %253, %cst_45 [1] : vector<1x256xf32> to vector<1xf32>
    %258 = vector.shape_cast %257 : vector<1xf32> to vector<1x1xf32>
    %259 = vector.broadcast %258 : vector<1x1xf32> to vector<1x256xf32>
    %260 = arith.cmpf oeq, %253, %259 : vector<1x256xf32>
    %c256_i32_46 = arith.constant 256 : i32
    %261 = vector.broadcast %c256_i32_46 : i32 to vector<1x256xi32>
    %262 = arith.select %260, %12, %261 : vector<1x256xi1>, vector<1x256xi32>
    %cst_47 = arith.constant dense<2147483647> : vector<1xi32>
    %263 = vector.multi_reduction <minsi>, %262, %cst_47 [1] : vector<1x256xi32> to vector<1xi32>
    %264 = vector.shape_cast %263 : vector<1xi32> to vector<1x1xi32>
    %265 = vector.broadcast %264 : vector<1x1xi32> to vector<1x256xi32>
    %266 = arith.cmpi eq, %12, %265 : vector<1x256xi32>
    %267 = vector.broadcast %255 : vector<1x1xi1> to vector<1x256xi1>
    %268 = arith.andi %266, %267 : vector<1x256xi1>
    %269 = arith.ori %256, %268 : vector<1x256xi1>
    %270 = arith.select %256, %253, %220 : vector<1x256xi1>, vector<1x256xf32>
    %cst_48 = arith.constant 2.000000e+00 : f32
    %271 = vector.broadcast %cst_48 : f32 to vector<1x256xf32>
    %272 = arith.select %268, %271, %270 : vector<1x256xi1>, vector<1x256xf32>
    %c4_i32 = arith.constant 4 : i32
    %273 = vector.broadcast %c4_i32 : i32 to vector<1x256xi32>
    %274 = arith.select %269, %273, %222 : vector<1x256xi1>, vector<1x256xi32>
    %275 = vector.extract_strided_slice %1 {offsets = [0, 5], sizes = [41, 1], strides = [1, 1]} : vector<41x8xf32> to vector<41x1xf32>
    %276 = vector.extract_strided_slice %275 {offsets = [0, 0], sizes = [1, 1], strides = [1, 1]} : vector<41x1xf32> to vector<1x1xf32>
    %277 = vector.extract_strided_slice %275 {offsets = [1, 0], sizes = [1, 1], strides = [1, 1]} : vector<41x1xf32> to vector<1x1xf32>
    %278 = vector.extract_strided_slice %275 {offsets = [2, 0], sizes = [1, 1], strides = [1, 1]} : vector<41x1xf32> to vector<1x1xf32>
    %279 = vector.extract_strided_slice %275 {offsets = [3, 0], sizes = [1, 1], strides = [1, 1]} : vector<41x1xf32> to vector<1x1xf32>
    %280 = vector.broadcast %278 : vector<1x1xf32> to vector<1x256xf32>
    %281 = arith.minimumf %9, %280 : vector<1x256xf32>
    %282 = vector.broadcast %276 : vector<1x1xf32> to vector<1x256xf32>
    %283 = arith.maximumf %7, %282 : vector<1x256xf32>
    %284 = arith.subf %281, %283 : vector<1x256xf32>
    %cst_49 = arith.constant 0.000000e+00 : f32
    %285 = vector.broadcast %cst_49 : f32 to vector<1x256xf32>
    %286 = arith.maximumf %284, %285 : vector<1x256xf32>
    %287 = vector.broadcast %279 : vector<1x1xf32> to vector<1x256xf32>
    %288 = arith.minimumf %10, %287 : vector<1x256xf32>
    %289 = vector.broadcast %277 : vector<1x1xf32> to vector<1x256xf32>
    %290 = arith.maximumf %8, %289 : vector<1x256xf32>
    %291 = arith.subf %288, %290 : vector<1x256xf32>
    %cst_50 = arith.constant 0.000000e+00 : f32
    %292 = vector.broadcast %cst_50 : f32 to vector<1x256xf32>
    %293 = arith.maximumf %291, %292 : vector<1x256xf32>
    %294 = arith.mulf %286, %293 : vector<1x256xf32>
    %295 = arith.subf %278, %276 : vector<1x1xf32>
    %296 = arith.subf %279, %277 : vector<1x1xf32>
    %297 = arith.mulf %295, %296 : vector<1x1xf32>
    %298 = vector.broadcast %297 : vector<1x1xf32> to vector<1x256xf32>
    %299 = arith.addf %298, %11 : vector<1x256xf32>
    %300 = arith.subf %299, %294 : vector<1x256xf32>
    %cst_51 = arith.constant 0.000000e+00 : f32
    %301 = vector.broadcast %cst_51 : f32 to vector<1x256xf32>
    %302 = arith.cmpf ogt, %300, %301 : vector<1x256xf32>
    %303 = arith.divf %294, %300 : vector<1x256xf32>
    %cst_52 = arith.constant 0.000000e+00 : f32
    %304 = vector.broadcast %cst_52 : f32 to vector<1x256xf32>
    %305 = arith.select %302, %303, %304 : vector<1x256xi1>, vector<1x256xf32>
    %cst_53 = arith.constant 0.000000e+00 : f32
    %306 = vector.broadcast %cst_53 : f32 to vector<1x1xf32>
    %307 = arith.cmpf ogt, %297, %306 : vector<1x1xf32>
    %308 = arith.cmpf ogt, %305, %272 : vector<1x256xf32>
    %cst_54 = arith.constant dense<0xFF800000> : vector<1xf32>
    %309 = vector.multi_reduction <maximumf>, %305, %cst_54 [1] : vector<1x256xf32> to vector<1xf32>
    %310 = vector.shape_cast %309 : vector<1xf32> to vector<1x1xf32>
    %311 = vector.broadcast %310 : vector<1x1xf32> to vector<1x256xf32>
    %312 = arith.cmpf oeq, %305, %311 : vector<1x256xf32>
    %c256_i32_55 = arith.constant 256 : i32
    %313 = vector.broadcast %c256_i32_55 : i32 to vector<1x256xi32>
    %314 = arith.select %312, %12, %313 : vector<1x256xi1>, vector<1x256xi32>
    %cst_56 = arith.constant dense<2147483647> : vector<1xi32>
    %315 = vector.multi_reduction <minsi>, %314, %cst_56 [1] : vector<1x256xi32> to vector<1xi32>
    %316 = vector.shape_cast %315 : vector<1xi32> to vector<1x1xi32>
    %317 = vector.broadcast %316 : vector<1x1xi32> to vector<1x256xi32>
    %318 = arith.cmpi eq, %12, %317 : vector<1x256xi32>
    %319 = vector.broadcast %307 : vector<1x1xi1> to vector<1x256xi1>
    %320 = arith.andi %318, %319 : vector<1x256xi1>
    %321 = arith.ori %308, %320 : vector<1x256xi1>
    %322 = arith.select %308, %305, %272 : vector<1x256xi1>, vector<1x256xf32>
    %cst_57 = arith.constant 2.000000e+00 : f32
    %323 = vector.broadcast %cst_57 : f32 to vector<1x256xf32>
    %324 = arith.select %320, %323, %322 : vector<1x256xi1>, vector<1x256xf32>
    %c5_i32 = arith.constant 5 : i32
    %325 = vector.broadcast %c5_i32 : i32 to vector<1x256xi32>
    %326 = arith.select %321, %325, %274 : vector<1x256xi1>, vector<1x256xi32>
    %327 = vector.extract_strided_slice %1 {offsets = [0, 6], sizes = [41, 1], strides = [1, 1]} : vector<41x8xf32> to vector<41x1xf32>
    %328 = vector.extract_strided_slice %327 {offsets = [0, 0], sizes = [1, 1], strides = [1, 1]} : vector<41x1xf32> to vector<1x1xf32>
    %329 = vector.extract_strided_slice %327 {offsets = [1, 0], sizes = [1, 1], strides = [1, 1]} : vector<41x1xf32> to vector<1x1xf32>
    %330 = vector.extract_strided_slice %327 {offsets = [2, 0], sizes = [1, 1], strides = [1, 1]} : vector<41x1xf32> to vector<1x1xf32>
    %331 = vector.extract_strided_slice %327 {offsets = [3, 0], sizes = [1, 1], strides = [1, 1]} : vector<41x1xf32> to vector<1x1xf32>
    %332 = vector.broadcast %330 : vector<1x1xf32> to vector<1x256xf32>
    %333 = arith.minimumf %9, %332 : vector<1x256xf32>
    %334 = vector.broadcast %328 : vector<1x1xf32> to vector<1x256xf32>
    %335 = arith.maximumf %7, %334 : vector<1x256xf32>
    %336 = arith.subf %333, %335 : vector<1x256xf32>
    %cst_58 = arith.constant 0.000000e+00 : f32
    %337 = vector.broadcast %cst_58 : f32 to vector<1x256xf32>
    %338 = arith.maximumf %336, %337 : vector<1x256xf32>
    %339 = vector.broadcast %331 : vector<1x1xf32> to vector<1x256xf32>
    %340 = arith.minimumf %10, %339 : vector<1x256xf32>
    %341 = vector.broadcast %329 : vector<1x1xf32> to vector<1x256xf32>
    %342 = arith.maximumf %8, %341 : vector<1x256xf32>
    %343 = arith.subf %340, %342 : vector<1x256xf32>
    %cst_59 = arith.constant 0.000000e+00 : f32
    %344 = vector.broadcast %cst_59 : f32 to vector<1x256xf32>
    %345 = arith.maximumf %343, %344 : vector<1x256xf32>
    %346 = arith.mulf %338, %345 : vector<1x256xf32>
    %347 = arith.subf %330, %328 : vector<1x1xf32>
    %348 = arith.subf %331, %329 : vector<1x1xf32>
    %349 = arith.mulf %347, %348 : vector<1x1xf32>
    %350 = vector.broadcast %349 : vector<1x1xf32> to vector<1x256xf32>
    %351 = arith.addf %350, %11 : vector<1x256xf32>
    %352 = arith.subf %351, %346 : vector<1x256xf32>
    %cst_60 = arith.constant 0.000000e+00 : f32
    %353 = vector.broadcast %cst_60 : f32 to vector<1x256xf32>
    %354 = arith.cmpf ogt, %352, %353 : vector<1x256xf32>
    %355 = arith.divf %346, %352 : vector<1x256xf32>
    %cst_61 = arith.constant 0.000000e+00 : f32
    %356 = vector.broadcast %cst_61 : f32 to vector<1x256xf32>
    %357 = arith.select %354, %355, %356 : vector<1x256xi1>, vector<1x256xf32>
    %cst_62 = arith.constant 0.000000e+00 : f32
    %358 = vector.broadcast %cst_62 : f32 to vector<1x1xf32>
    %359 = arith.cmpf ogt, %349, %358 : vector<1x1xf32>
    %360 = arith.cmpf ogt, %357, %324 : vector<1x256xf32>
    %cst_63 = arith.constant dense<0xFF800000> : vector<1xf32>
    %361 = vector.multi_reduction <maximumf>, %357, %cst_63 [1] : vector<1x256xf32> to vector<1xf32>
    %362 = vector.shape_cast %361 : vector<1xf32> to vector<1x1xf32>
    %363 = vector.broadcast %362 : vector<1x1xf32> to vector<1x256xf32>
    %364 = arith.cmpf oeq, %357, %363 : vector<1x256xf32>
    %c256_i32_64 = arith.constant 256 : i32
    %365 = vector.broadcast %c256_i32_64 : i32 to vector<1x256xi32>
    %366 = arith.select %364, %12, %365 : vector<1x256xi1>, vector<1x256xi32>
    %cst_65 = arith.constant dense<2147483647> : vector<1xi32>
    %367 = vector.multi_reduction <minsi>, %366, %cst_65 [1] : vector<1x256xi32> to vector<1xi32>
    %368 = vector.shape_cast %367 : vector<1xi32> to vector<1x1xi32>
    %369 = vector.broadcast %368 : vector<1x1xi32> to vector<1x256xi32>
    %370 = arith.cmpi eq, %12, %369 : vector<1x256xi32>
    %371 = vector.broadcast %359 : vector<1x1xi1> to vector<1x256xi1>
    %372 = arith.andi %370, %371 : vector<1x256xi1>
    %373 = arith.ori %360, %372 : vector<1x256xi1>
    %374 = arith.select %360, %357, %324 : vector<1x256xi1>, vector<1x256xf32>
    %cst_66 = arith.constant 2.000000e+00 : f32
    %375 = vector.broadcast %cst_66 : f32 to vector<1x256xf32>
    %376 = arith.select %372, %375, %374 : vector<1x256xi1>, vector<1x256xf32>
    %c6_i32 = arith.constant 6 : i32
    %377 = vector.broadcast %c6_i32 : i32 to vector<1x256xi32>
    %378 = arith.select %373, %377, %326 : vector<1x256xi1>, vector<1x256xi32>
    %379 = vector.extract_strided_slice %1 {offsets = [0, 7], sizes = [41, 1], strides = [1, 1]} : vector<41x8xf32> to vector<41x1xf32>
    %380 = vector.extract_strided_slice %379 {offsets = [0, 0], sizes = [1, 1], strides = [1, 1]} : vector<41x1xf32> to vector<1x1xf32>
    %381 = vector.extract_strided_slice %379 {offsets = [1, 0], sizes = [1, 1], strides = [1, 1]} : vector<41x1xf32> to vector<1x1xf32>
    %382 = vector.extract_strided_slice %379 {offsets = [2, 0], sizes = [1, 1], strides = [1, 1]} : vector<41x1xf32> to vector<1x1xf32>
    %383 = vector.extract_strided_slice %379 {offsets = [3, 0], sizes = [1, 1], strides = [1, 1]} : vector<41x1xf32> to vector<1x1xf32>
    %384 = vector.broadcast %382 : vector<1x1xf32> to vector<1x256xf32>
    %385 = arith.minimumf %9, %384 : vector<1x256xf32>
    %386 = vector.broadcast %380 : vector<1x1xf32> to vector<1x256xf32>
    %387 = arith.maximumf %7, %386 : vector<1x256xf32>
    %388 = arith.subf %385, %387 : vector<1x256xf32>
    %cst_67 = arith.constant 0.000000e+00 : f32
    %389 = vector.broadcast %cst_67 : f32 to vector<1x256xf32>
    %390 = arith.maximumf %388, %389 : vector<1x256xf32>
    %391 = vector.broadcast %383 : vector<1x1xf32> to vector<1x256xf32>
    %392 = arith.minimumf %10, %391 : vector<1x256xf32>
    %393 = vector.broadcast %381 : vector<1x1xf32> to vector<1x256xf32>
    %394 = arith.maximumf %8, %393 : vector<1x256xf32>
    %395 = arith.subf %392, %394 : vector<1x256xf32>
    %cst_68 = arith.constant 0.000000e+00 : f32
    %396 = vector.broadcast %cst_68 : f32 to vector<1x256xf32>
    %397 = arith.maximumf %395, %396 : vector<1x256xf32>
    %398 = arith.mulf %390, %397 : vector<1x256xf32>
    %399 = arith.subf %382, %380 : vector<1x1xf32>
    %400 = arith.subf %383, %381 : vector<1x1xf32>
    %401 = arith.mulf %399, %400 : vector<1x1xf32>
    %402 = vector.broadcast %401 : vector<1x1xf32> to vector<1x256xf32>
    %403 = arith.addf %402, %11 : vector<1x256xf32>
    %404 = arith.subf %403, %398 : vector<1x256xf32>
    %cst_69 = arith.constant 0.000000e+00 : f32
    %405 = vector.broadcast %cst_69 : f32 to vector<1x256xf32>
    %406 = arith.cmpf ogt, %404, %405 : vector<1x256xf32>
    %407 = arith.divf %398, %404 : vector<1x256xf32>
    %cst_70 = arith.constant 0.000000e+00 : f32
    %408 = vector.broadcast %cst_70 : f32 to vector<1x256xf32>
    %409 = arith.select %406, %407, %408 : vector<1x256xi1>, vector<1x256xf32>
    %cst_71 = arith.constant 0.000000e+00 : f32
    %410 = vector.broadcast %cst_71 : f32 to vector<1x1xf32>
    %411 = arith.cmpf ogt, %401, %410 : vector<1x1xf32>
    %412 = arith.cmpf ogt, %409, %376 : vector<1x256xf32>
    %cst_72 = arith.constant dense<0xFF800000> : vector<1xf32>
    %413 = vector.multi_reduction <maximumf>, %409, %cst_72 [1] : vector<1x256xf32> to vector<1xf32>
    %414 = vector.shape_cast %413 : vector<1xf32> to vector<1x1xf32>
    %415 = vector.broadcast %414 : vector<1x1xf32> to vector<1x256xf32>
    %416 = arith.cmpf oeq, %409, %415 : vector<1x256xf32>
    %c256_i32_73 = arith.constant 256 : i32
    %417 = vector.broadcast %c256_i32_73 : i32 to vector<1x256xi32>
    %418 = arith.select %416, %12, %417 : vector<1x256xi1>, vector<1x256xi32>
    %cst_74 = arith.constant dense<2147483647> : vector<1xi32>
    %419 = vector.multi_reduction <minsi>, %418, %cst_74 [1] : vector<1x256xi32> to vector<1xi32>
    %420 = vector.shape_cast %419 : vector<1xi32> to vector<1x1xi32>
    %421 = vector.broadcast %420 : vector<1x1xi32> to vector<1x256xi32>
    %422 = arith.cmpi eq, %12, %421 : vector<1x256xi32>
    %423 = vector.broadcast %411 : vector<1x1xi1> to vector<1x256xi1>
    %424 = arith.andi %422, %423 : vector<1x256xi1>
    %425 = arith.ori %412, %424 : vector<1x256xi1>
    %426 = arith.select %412, %409, %376 : vector<1x256xi1>, vector<1x256xf32>
    %cst_75 = arith.constant 2.000000e+00 : f32
    %427 = vector.broadcast %cst_75 : f32 to vector<1x256xf32>
    %428 = arith.select %424, %427, %426 : vector<1x256xi1>, vector<1x256xf32>
    %c7_i32 = arith.constant 7 : i32
    %429 = vector.broadcast %c7_i32 : i32 to vector<1x256xi32>
    %430 = arith.select %425, %429, %378 : vector<1x256xi1>, vector<1x256xi32>
    %cst_76 = arith.constant 3.500000e-01 : f32
    %431 = vector.broadcast %cst_76 : f32 to vector<1x256xf32>
    %432 = arith.cmpf olt, %428, %431 : vector<1x256xf32>
    %cst_77 = arith.constant 0.000000e+00 : f32
    %cst_78 = arith.constant 1.000000e+00 : f32
    %433 = vector.broadcast %cst_77 : f32 to vector<1x256xf32>
    %434 = vector.broadcast %cst_78 : f32 to vector<1x256xf32>
    %435 = arith.select %432, %433, %434 : vector<1x256xi1>, vector<1x256xf32>
    %cst_79 = arith.constant 0.000000e+00 : f32
    %436 = vector.broadcast %cst_79 : f32 to vector<41x256xf32>
    %c0_i32_80 = arith.constant 0 : i32
    %437 = vector.broadcast %c0_i32_80 : i32 to vector<1x256xi32>
    %438 = arith.cmpi eq, %430, %437 : vector<1x256xi32>
    %439 = vector.extract_strided_slice %1 {offsets = [0, 0], sizes = [41, 1], strides = [1, 1]} : vector<41x8xf32> to vector<41x1xf32>
    %440 = vector.shape_cast %438 : vector<1x256xi1> to vector<1x256xi1>
    %441 = vector.broadcast %440 : vector<1x256xi1> to vector<41x256xi1>
    %442 = vector.shape_cast %439 : vector<41x1xf32> to vector<41x1xf32>
    %443 = vector.broadcast %442 : vector<41x1xf32> to vector<41x256xf32>
    %444 = arith.select %441, %443, %436 : vector<41x256xi1>, vector<41x256xf32>
    %c1_i32_81 = arith.constant 1 : i32
    %445 = vector.broadcast %c1_i32_81 : i32 to vector<1x256xi32>
    %446 = arith.cmpi eq, %430, %445 : vector<1x256xi32>
    %447 = vector.extract_strided_slice %1 {offsets = [0, 1], sizes = [41, 1], strides = [1, 1]} : vector<41x8xf32> to vector<41x1xf32>
    %448 = vector.shape_cast %446 : vector<1x256xi1> to vector<1x256xi1>
    %449 = vector.broadcast %448 : vector<1x256xi1> to vector<41x256xi1>
    %450 = vector.shape_cast %447 : vector<41x1xf32> to vector<41x1xf32>
    %451 = vector.broadcast %450 : vector<41x1xf32> to vector<41x256xf32>
    %452 = arith.select %449, %451, %444 : vector<41x256xi1>, vector<41x256xf32>
    %c2_i32_82 = arith.constant 2 : i32
    %453 = vector.broadcast %c2_i32_82 : i32 to vector<1x256xi32>
    %454 = arith.cmpi eq, %430, %453 : vector<1x256xi32>
    %455 = vector.extract_strided_slice %1 {offsets = [0, 2], sizes = [41, 1], strides = [1, 1]} : vector<41x8xf32> to vector<41x1xf32>
    %456 = vector.shape_cast %454 : vector<1x256xi1> to vector<1x256xi1>
    %457 = vector.broadcast %456 : vector<1x256xi1> to vector<41x256xi1>
    %458 = vector.shape_cast %455 : vector<41x1xf32> to vector<41x1xf32>
    %459 = vector.broadcast %458 : vector<41x1xf32> to vector<41x256xf32>
    %460 = arith.select %457, %459, %452 : vector<41x256xi1>, vector<41x256xf32>
    %c3_i32_83 = arith.constant 3 : i32
    %461 = vector.broadcast %c3_i32_83 : i32 to vector<1x256xi32>
    %462 = arith.cmpi eq, %430, %461 : vector<1x256xi32>
    %463 = vector.extract_strided_slice %1 {offsets = [0, 3], sizes = [41, 1], strides = [1, 1]} : vector<41x8xf32> to vector<41x1xf32>
    %464 = vector.shape_cast %462 : vector<1x256xi1> to vector<1x256xi1>
    %465 = vector.broadcast %464 : vector<1x256xi1> to vector<41x256xi1>
    %466 = vector.shape_cast %463 : vector<41x1xf32> to vector<41x1xf32>
    %467 = vector.broadcast %466 : vector<41x1xf32> to vector<41x256xf32>
    %468 = arith.select %465, %467, %460 : vector<41x256xi1>, vector<41x256xf32>
    %c4_i32_84 = arith.constant 4 : i32
    %469 = vector.broadcast %c4_i32_84 : i32 to vector<1x256xi32>
    %470 = arith.cmpi eq, %430, %469 : vector<1x256xi32>
    %471 = vector.extract_strided_slice %1 {offsets = [0, 4], sizes = [41, 1], strides = [1, 1]} : vector<41x8xf32> to vector<41x1xf32>
    %472 = vector.shape_cast %470 : vector<1x256xi1> to vector<1x256xi1>
    %473 = vector.broadcast %472 : vector<1x256xi1> to vector<41x256xi1>
    %474 = vector.shape_cast %471 : vector<41x1xf32> to vector<41x1xf32>
    %475 = vector.broadcast %474 : vector<41x1xf32> to vector<41x256xf32>
    %476 = arith.select %473, %475, %468 : vector<41x256xi1>, vector<41x256xf32>
    %c5_i32_85 = arith.constant 5 : i32
    %477 = vector.broadcast %c5_i32_85 : i32 to vector<1x256xi32>
    %478 = arith.cmpi eq, %430, %477 : vector<1x256xi32>
    %479 = vector.extract_strided_slice %1 {offsets = [0, 5], sizes = [41, 1], strides = [1, 1]} : vector<41x8xf32> to vector<41x1xf32>
    %480 = vector.shape_cast %478 : vector<1x256xi1> to vector<1x256xi1>
    %481 = vector.broadcast %480 : vector<1x256xi1> to vector<41x256xi1>
    %482 = vector.shape_cast %479 : vector<41x1xf32> to vector<41x1xf32>
    %483 = vector.broadcast %482 : vector<41x1xf32> to vector<41x256xf32>
    %484 = arith.select %481, %483, %476 : vector<41x256xi1>, vector<41x256xf32>
    %c6_i32_86 = arith.constant 6 : i32
    %485 = vector.broadcast %c6_i32_86 : i32 to vector<1x256xi32>
    %486 = arith.cmpi eq, %430, %485 : vector<1x256xi32>
    %487 = vector.extract_strided_slice %1 {offsets = [0, 6], sizes = [41, 1], strides = [1, 1]} : vector<41x8xf32> to vector<41x1xf32>
    %488 = vector.shape_cast %486 : vector<1x256xi1> to vector<1x256xi1>
    %489 = vector.broadcast %488 : vector<1x256xi1> to vector<41x256xi1>
    %490 = vector.shape_cast %487 : vector<41x1xf32> to vector<41x1xf32>
    %491 = vector.broadcast %490 : vector<41x1xf32> to vector<41x256xf32>
    %492 = arith.select %489, %491, %484 : vector<41x256xi1>, vector<41x256xf32>
    %c7_i32_87 = arith.constant 7 : i32
    %493 = vector.broadcast %c7_i32_87 : i32 to vector<1x256xi32>
    %494 = arith.cmpi eq, %430, %493 : vector<1x256xi32>
    %495 = vector.extract_strided_slice %1 {offsets = [0, 7], sizes = [41, 1], strides = [1, 1]} : vector<41x8xf32> to vector<41x1xf32>
    %496 = vector.shape_cast %494 : vector<1x256xi1> to vector<1x256xi1>
    %497 = vector.broadcast %496 : vector<1x256xi1> to vector<41x256xi1>
    %498 = vector.shape_cast %495 : vector<41x1xf32> to vector<41x1xf32>
    %499 = vector.broadcast %498 : vector<41x1xf32> to vector<41x256xf32>
    %500 = arith.select %497, %499, %492 : vector<41x256xi1>, vector<41x256xf32>
    %501 = vector.extract_strided_slice %500 {offsets = [40, 0], sizes = [1, 256], strides = [1, 1]} : vector<41x256xf32> to vector<1x256xf32>
    %cst_88 = arith.constant 0.000000e+00 : f32
    %502 = vector.broadcast %cst_88 : f32 to vector<1x256xf32>
    %503 = arith.select %432, %502, %501 : vector<1x256xi1>, vector<1x256xf32>
    %504 = vector.extract_strided_slice %500 {offsets = [0, 0], sizes = [1, 256], strides = [1, 1]} : vector<41x256xf32> to vector<1x256xf32>
    %505 = vector.extract_strided_slice %500 {offsets = [1, 0], sizes = [1, 256], strides = [1, 1]} : vector<41x256xf32> to vector<1x256xf32>
    %506 = vector.extract_strided_slice %500 {offsets = [2, 0], sizes = [1, 256], strides = [1, 1]} : vector<41x256xf32> to vector<1x256xf32>
    %507 = vector.extract_strided_slice %500 {offsets = [3, 0], sizes = [1, 256], strides = [1, 1]} : vector<41x256xf32> to vector<1x256xf32>
    %508 = arith.addf %504, %506 : vector<1x256xf32>
    %cst_89 = arith.constant 5.000000e-01 : f32
    %509 = vector.broadcast %cst_89 : f32 to vector<1x256xf32>
    %510 = arith.mulf %508, %509 : vector<1x256xf32>
    %511 = arith.subf %510, %3 : vector<1x256xf32>
    %cst_90 = arith.constant 1.000000e-01 : f32
    %512 = vector.broadcast %cst_90 : f32 to vector<1x256xf32>
    %513 = arith.mulf %512, %5 : vector<1x256xf32>
    %514 = arith.divf %511, %513 : vector<1x256xf32>
    %515 = arith.addf %505, %507 : vector<1x256xf32>
    %cst_91 = arith.constant 5.000000e-01 : f32
    %516 = vector.broadcast %cst_91 : f32 to vector<1x256xf32>
    %517 = arith.mulf %515, %516 : vector<1x256xf32>
    %518 = arith.subf %517, %4 : vector<1x256xf32>
    %cst_92 = arith.constant 1.000000e-01 : f32
    %519 = vector.broadcast %cst_92 : f32 to vector<1x256xf32>
    %520 = arith.mulf %519, %6 : vector<1x256xf32>
    %521 = arith.divf %518, %520 : vector<1x256xf32>
    %522 = arith.subf %506, %504 : vector<1x256xf32>
    %523 = arith.divf %522, %5 : vector<1x256xf32>
    %524 = math.log %523 : vector<1x256xf32>
    %cst_93 = arith.constant 2.000000e-01 : f32
    %525 = vector.broadcast %cst_93 : f32 to vector<1x256xf32>
    %526 = arith.divf %524, %525 : vector<1x256xf32>
    %527 = arith.subf %507, %505 : vector<1x256xf32>
    %528 = arith.divf %527, %6 : vector<1x256xf32>
    %529 = math.log %528 : vector<1x256xf32>
    %cst_94 = arith.constant 2.000000e-01 : f32
    %530 = vector.broadcast %cst_94 : f32 to vector<1x256xf32>
    %531 = arith.divf %529, %530 : vector<1x256xf32>
    %532 = tpu.concatenate %514, %521, %526, %531 in 0 : vector<1x256xf32>, vector<1x256xf32>, vector<1x256xf32>, vector<1x256xf32> -> vector<4x256xf32>
    %cst_95 = arith.constant 0.000000e+00 : f32
    %533 = vector.shape_cast %432 : vector<1x256xi1> to vector<1x256xi1>
    %534 = vector.broadcast %533 : vector<1x256xi1> to vector<4x256xi1>
    %535 = vector.broadcast %cst_95 : f32 to vector<4x256xf32>
    %536 = arith.select %534, %535, %532 : vector<4x256xi1>, vector<4x256xf32>
    %537 = tpu.iota {dimensions = array<i32: 0>} : vector<36x256xi32>
    %c2_i32_96 = arith.constant 2 : i32
    %c0_i32_97 = arith.constant 0 : i32
    %538 = arith.cmpi eq, %c2_i32_96, %c0_i32_97 : i32
    %c1_i32_98 = arith.constant 1 : i32
    %539 = arith.select %538, %c1_i32_98, %c2_i32_96 : i32
    %540 = vector.broadcast %539 : i32 to vector<36x256xi32>
    %541 = arith.remsi %537, %540 : vector<36x256xi32>
    %c0_i32_99 = arith.constant 0 : i32
    %542 = vector.broadcast %c0_i32_99 : i32 to vector<36x256xi32>
    %543 = arith.cmpi ne, %541, %542 : vector<36x256xi32>
    %c0_i32_100 = arith.constant 0 : i32
    %544 = vector.broadcast %c0_i32_100 : i32 to vector<36x256xi32>
    %545 = arith.cmpi slt, %541, %544 : vector<36x256xi32>
    %c0_i32_101 = arith.constant 0 : i32
    %546 = arith.cmpi slt, %539, %c0_i32_101 : i32
    %547 = vector.broadcast %546 : i1 to vector<36x256xi1>
    %548 = vector.broadcast %547 : vector<36x256xi1> to vector<36x256xi1>
    %549 = arith.xori %545, %548 : vector<36x256xi1>
    %550 = arith.andi %549, %543 : vector<36x256xi1>
    %551 = vector.broadcast %539 : i32 to vector<36x256xi32>
    %552 = arith.addi %541, %551 : vector<36x256xi32>
    %553 = arith.select %550, %552, %541 : vector<36x256xi1>, vector<36x256xi32>
    %c0_i32_102 = arith.constant 0 : i32
    %554 = vector.broadcast %c0_i32_102 : i32 to vector<36x256xi32>
    %555 = arith.cmpi eq, %553, %554 : vector<36x256xi32>
    %556 = vector.shape_cast %3 : vector<1x256xf32> to vector<1x256xf32>
    %557 = vector.broadcast %556 : vector<1x256xf32> to vector<36x256xf32>
    %558 = vector.shape_cast %4 : vector<1x256xf32> to vector<1x256xf32>
    %559 = vector.broadcast %558 : vector<1x256xf32> to vector<36x256xf32>
    %560 = arith.select %555, %557, %559 : vector<36x256xi1>, vector<36x256xf32>
    %cst_103 = arith.constant 1.000000e-01 : f32
    %561 = vector.broadcast %cst_103 : f32 to vector<1x256xf32>
    %562 = arith.mulf %561, %5 : vector<1x256xf32>
    %cst_104 = arith.constant 1.000000e-01 : f32
    %563 = vector.broadcast %cst_104 : f32 to vector<1x256xf32>
    %564 = arith.mulf %563, %6 : vector<1x256xf32>
    %565 = vector.shape_cast %562 : vector<1x256xf32> to vector<1x256xf32>
    %566 = vector.broadcast %565 : vector<1x256xf32> to vector<36x256xf32>
    %567 = vector.shape_cast %564 : vector<1x256xf32> to vector<1x256xf32>
    %568 = vector.broadcast %567 : vector<1x256xf32> to vector<36x256xf32>
    %569 = arith.select %555, %566, %568 : vector<36x256xi1>, vector<36x256xf32>
    %570 = vector.extract_strided_slice %500 {offsets = [4, 0], sizes = [36, 256], strides = [1, 1]} : vector<41x256xf32> to vector<36x256xf32>
    %571 = arith.subf %570, %560 : vector<36x256xf32>
    %572 = arith.divf %571, %569 : vector<36x256xf32>
    %c0_105 = arith.constant 0 : index
    %c0_106 = arith.constant 0 : index
    %c0_107 = arith.constant 0 : index
    %573 = vector.load %arg3[%c0_105, %c0_106, %c0_107] : memref<1x4x256xf32, #tpu.memory_space<vmem>>, vector<1x4x256xf32>
    %574 = vector.shape_cast %573 : vector<1x4x256xf32> to vector<4x256xf32>
    %575 = vector.shape_cast %536 : vector<4x256xf32> to vector<1x4x256xf32>
    tpu.vector_store %arg3[%c0_105, %c0_106, %c0_107], %575 {strides = array<i32>} : memref<1x4x256xf32, #tpu.memory_space<vmem>>, vector<1x4x256xf32>,
    %c0_108 = arith.constant 0 : index
    %c0_109 = arith.constant 0 : index
    %c0_110 = arith.constant 0 : index
    %576 = vector.load %arg4[%c0_108, %c0_109, %c0_110] : memref<1x36x256xf32, #tpu.memory_space<vmem>>, vector<1x36x256xf32>
    %577 = vector.shape_cast %576 : vector<1x36x256xf32> to vector<36x256xf32>
    %578 = vector.shape_cast %572 : vector<36x256xf32> to vector<1x36x256xf32>
    tpu.vector_store %arg4[%c0_108, %c0_109, %c0_110], %578 {strides = array<i32>} : memref<1x36x256xf32, #tpu.memory_space<vmem>>, vector<1x36x256xf32>,
    %c0_111 = arith.constant 0 : index
    %c0_112 = arith.constant 0 : index
    %c0_113 = arith.constant 0 : index
    %579 = vector.load %arg5[%c0_111, %c0_112, %c0_113] : memref<1x1x256xf32, #tpu.memory_space<vmem>>, vector<1x1x256xf32>
    %580 = vector.shape_cast %579 : vector<1x1x256xf32> to vector<1x256xf32>
    %581 = vector.shape_cast %435 : vector<1x256xf32> to vector<1x1x256xf32>
    tpu.vector_store %arg5[%c0_111, %c0_112, %c0_113], %581 {strides = array<i32>} : memref<1x1x256xf32, #tpu.memory_space<vmem>>, vector<1x1x256xf32>,
    %582 = arith.fptosi %503 : vector<1x256xf32> to vector<1x256xi32>
    %c0_114 = arith.constant 0 : index
    %c0_115 = arith.constant 0 : index
    %c0_116 = arith.constant 0 : index
    %583 = vector.load %arg6[%c0_114, %c0_115, %c0_116] : memref<1x1x256xi32, #tpu.memory_space<vmem>>, vector<1x1x256xi32>
    %584 = vector.shape_cast %583 : vector<1x1x256xi32> to vector<1x256xi32>
    %585 = vector.shape_cast %582 : vector<1x256xi32> to vector<1x1x256xi32>
    tpu.vector_store %arg6[%c0_114, %c0_115, %c0_116], %585 {strides = array<i32>} : memref<1x1x256xi32, #tpu.memory_space<vmem>>, vector<1x1x256xi32>,
    return
  }
  func.func @transform_0(%arg0: i32) -> (i32, i32, i32) {
    %c0_i32 = arith.constant 0 : i32
    %c0_i32_0 = arith.constant 0 : i32
    %c0_i32_1 = arith.constant 0 : i32
    return %arg0, %c0_i32, %c0_i32_0 : i32, i32, i32
  }
  func.func @transform_1(%arg0: i32) -> (i32, i32) {
    %c0_i32 = arith.constant 0 : i32
    %c0_i32_0 = arith.constant 0 : i32
    %c0_i32_1 = arith.constant 0 : i32
    return %c0_i32, %c0_i32_0 : i32, i32
  }
  func.func @transform_2(%arg0: i32) -> (i32, i32, i32) {
    %c0_i32 = arith.constant 0 : i32
    %c0_i32_0 = arith.constant 0 : i32
    %c0_i32_1 = arith.constant 0 : i32
    return %arg0, %c0_i32, %c0_i32_0 : i32, i32, i32
  }
  func.func @transform_3(%arg0: i32) -> (i32, i32, i32) {
    %c0_i32 = arith.constant 0 : i32
    %c0_i32_0 = arith.constant 0 : i32
    %c0_i32_1 = arith.constant 0 : i32
    return %arg0, %c0_i32, %c0_i32_0 : i32, i32, i32
  }
  func.func @transform_4(%arg0: i32) -> (i32, i32, i32) {
    %c0_i32 = arith.constant 0 : i32
    %c0_i32_0 = arith.constant 0 : i32
    %c0_i32_1 = arith.constant 0 : i32
    return %arg0, %c0_i32, %c0_i32_0 : i32, i32, i32
  }
  func.func @transform_5(%arg0: i32) -> (i32, i32, i32) {
    %c0_i32 = arith.constant 0 : i32
    %c0_i32_0 = arith.constant 0 : i32
    %c0_i32_1 = arith.constant 0 : i32
    return %arg0, %c0_i32, %c0_i32_0 : i32, i32, i32
  }
}

</mosaic_0001>

<bundles_post_ra>
// kernel: tpu_custom_call.1
= control target key start
LH: loop header
LB: loop body
LE: loop exit
PB: predicated region body
PF: predicated region fallthrough
CT: control target
= control target key end

     0   :  { %11 = vsyncpa [#allocation3], 0  ;;  %s4804_s0 = inlined_call_operand.vmem [shape: f32[2,41,8], index: 0, kind: input, shape index: {}]   ;;  %s4805_s1 = inlined_call_operand.vmem [shape: f32[9,256], index: 1, kind: input, shape index: {}]   ;;  %s4806_s2 = inlined_call_operand.hbm [shape: f32[2,4,256], index: 2, kind: output, shape index: {0}]   ;;  %s4807_s3 = inlined_call_operand.vmem [shape: f32[2,36,256], index: 3, kind: output, shape index: {1}]   ;;  %s4808_s4 = inlined_call_operand.hbm [shape: f32[2,1,256], index: 4, kind: output, shape index: {2}]   ;;  %s4809_s5 = inlined_call_operand.hbm [shape: s32[2,1,256], index: 5, kind: output, shape index: {3}]  }
   0x1   :  { %13 = vsyncpa [#allocation3 + $0x1], 0 }
   0x2   :  { %14 = vsyncpa [#allocation5], 0 }
   0x3   :  { %16 = vsyncpa [#allocation5 + $0x1], 0  ;;  %s2782_s18 = smov 0   ;;  %s2784_s19 = smov 0  }
   0x4   :  { %s2786_s20 = smov 0   ;;  %s2788_s21 = smov 0  }
   0x5 LB: > { %s2803_s22 = sadd.s32 4294967295, %s2740_s21   ;;  %s2413_s23 = sadd.s32 4294967294, %s2740_s21   ;;  %s2740_s21 = sphi %s2788_s21, %s5131_s21   ;;  %s2736_s20 = sphi %s2786_s20, %s5130_s20   ;;  %s2732_s19 = sphi %s2784_s19, %s5129_s19   ;;  %s2728_s18 = sphi %s2782_s18, %s5128_s18  }
   0x6   : > { %s2807_s24 = sadd.s32 1, %s2740_s21   ;;  %s76_s25 = sadd.s32 1, %s2736_s20 }
   0x7   : > { %s73_s26 = ssub.s32 %s2740_s21, %s2807_s24  ;;  %p86_p0 = scmp.ne.s32.totalorder %s2736_s20, %s2732_s19 }
   0x8   : > { %p74_p1 = scmp.eq.s32.totalorder %s73_s26, 0  ;;  %p87_p2 = scmp.eq.s32.totalorder %s2803_s22, 1 }
   0x9   : > { %p92_p3 = scmp.ne.s32.totalorder %s2732_s19, %s2728_s18  ;;  %p93_p4 = scmp.eq.s32.totalorder %s2413_s23, 1 }
   0xa   : > { %s2820_s27 = scalar_select %p74_p1, %s2736_s20, %s76_s25  }
   0xb   : > { %p2822_p5 = por %p87_p2, %p86_p0  ;;  %p2826_p6 = por %p93_p4, %p92_p3 }
   0xc   : > { %p2416_p7 = scmp.ge.s32.totalorder %s2740_s21, 1  ;;  %p200_p8 = scmp.lt.s32.totalorder %s2740_s21, 3 }
   0xe   : > { %p201_p9 = pnand %p2416_p7, %p200_p8 }
  0x10   : > { %204 = sbr.rel (%p201_p9) target bundleno = 1877 (0x755), region = 28 }
  0x15   : > { %p243_p10 = scmp.lt.s32.totalorder %s2803_s22, 1  ;;  %v4824_v0 = vmov 0   ;;  %v4822_v1 = vmov 1   ;;  %v4820_v7 = vmov 2   ;;  %v4818_v8 = vmov 3   ;;  %v2876_v10 = vld [vmem:[%s4805_s1] sm:$0xff] }
  0x16   : > { %2503 = vset.pattern.permute.xlu0 %v4824_v0  ;;  %2506 = vset.pattern.permute.xlu1 %v4822_v1  ;;  %v2881_v11 = vld [vmem:[%s4805_s1 + $0x8] sm:$0xff]  ;;  %v261_v22 = vld [vmem:[%s4805_s1 + $0x10] sm:$0x1]  ;;  %v262_v23 = vld [vmem:[%s4805_s1 + $0x18] sm:$0x1]  ;;  %vm371_vm5 = vcmask 1042434  }
  0x17   : > { %s2836_s30 = scalar_select %p243_p10, %s2803_s22, 1  ;;  %2504 = vset.pattern.permute.xlu2 %v4824_v0  ;;  %v2898_v30 = vrot.slane %v261_v22, 6  ;;  %v2900_v31 = vrot.slane %v262_v23, 6 }
  0x18   : > { %s2427_s13 = sshll.u32 %s2803_s22, 1  ;;  %s2213_s7 = sand.u32 1, %s2803_s22  }
  0x19   : > { %s2432_s6 = smul.u32 48, %s2836_s30  ;;  %s4432_s11 = scalar_lea.sflag [#allocation5], %s2213_s7 }
  0x1a   : > { %s2433_s12 = smul.u32 80, %s2836_s30  ;;  %s4320_s30 = sand.u32 1, %s2732_s19  }
  0x1b   : > { %s2843_s9 = scalar_lea.vmem %s4804_s0, %s2432_s6  ;;  %s2418_s17 = sshll.u32 %s4320_s30, 1 }
  0x1c   : > { %v2846_v2 = vld [vmem:[%s2843_s9] sm:$0xff]  ;;  %s4332_s16 = scalar_lea.vmem %s4807_s3, %s2433_s12  ;;  %s2247_s6 = scalar_lea.hbm %s4808_s4, %s2427_s13 }
  0x1d   : > { %268 = vperm.xlu0 %2503, %v2846_v2   ;;  %v294_v3 = vrot.slane %v2846_v2, 6  ;;  %s235_s8 = scalar_lea.vmem [#allocation4], %s2418_s17  ;;  %s2251_s10 = sshll.u32 %s2247_s6, 4  ;;  %s4402_s10 = int_to_ptr.hbm [resolvable:$true] %s2251_s10 }
  0x1e   : > { %s2632_s12 = sshra.s32 %s4402_s10, 4  ;;  %s2638_s26 = scalar_lea.hbm %s4808_s4, 4  ;;  %s2633_s12 = int_to_ptr.hbm [resolvable:$true] %s2632_s12 }
  0x1f   : > { %v296_v4 = vsub.f32 %v2846_v2, %v294_v3  ;;  %s2634_s14 = scalar_lea.hbm %s2633_s12, 2  ;;  %p2639_p0 = scmp.lt.s32.totalorder %s2633_s12, %s4808_s4 }
  0x20   : > { %p2635_p11 = scmp.ne.s32.totalorder %s2633_s12, %s2634_s14  ;;  %p2640_p1 = scmp.lt.s32.totalorder %s2638_s26, %s2634_s14 }
  0x21   : > { %v298_v5 = vrot.slane %v296_v4, 1 }
  0x22   : > { %p2636_p12 = pnand %p2635_p11, %p2822_p5  ;;  %p2641_p2 = por %p2640_p1, %p2639_p0 }
  0x23   : > { %v2851_v6 = vmul.f32 %v298_v5, %v296_v4 }
  0x24   : > { %p2637_p13 = pneg %p2636_p12 }
  0x25   : > { %440 = vperm.xlu1 %2506, %v2851_v6   ;;  %303 = vperm.xlu0 %2503, %v2851_v6   ;;  %vm368_vm0 = vcmp.gt.f32.partialorder %v2851_v6, 0.0 }
  0x26   : > { %v2867_v9 = vsel %vm368_vm0, 1, %v4824_v0  ;;  %p2642_p3 = pnand %p2641_p2, %p2637_p13 }
  0x27   : > { %403 = vperm.xlu2 %2504, %v2867_v9  }
  0x2d   : > { %2509 = vset.pattern.permute.xlu1 %v4820_v7  ;;  %2505 = vset.pattern.permute.xlu0 %v4822_v1 }
  0x2e   : > { %572 = vperm.xlu1 %2509, %v2851_v6   ;;  %413 = vperm.xlu0 %2505, %v2846_v2  }
  0x2f   : > { %2507 = vset.pattern.permute.xlu2 %v4822_v1 }
  0x30   : > { %531 = vperm.xlu2 %2507, %v2867_v9  }
  0x36   : > { %2511 = vset.pattern.permute.xlu1 %v4818_v8  ;;  %2508 = vset.pattern.permute.xlu0 %v4820_v7 }
  0x37   : > { %677 = vperm.xlu1 %2511, %v2846_v2   ;;  %545 = vperm.xlu0 %2508, %v2846_v2  }
  0x38   : > { %2510 = vset.pattern.permute.xlu2 %v4820_v7 }
  0x39   : > { %663 = vperm.xlu2 %2510, %v2867_v9  }
  0x3f   : > { %2512 = vset.pattern.permute.xlu0 %v4818_v8 }
  0x40   : > { %704 = vperm.xlu0 %2512, %v2851_v6  }
  0x41   : > { %2513 = vset.pattern.permute.xlu2 %v4818_v8 }
  0x8f   : > { %v2883_v12 = vpop.permute.xlu0 %268 }
  0x90   : > { %v270_v13 = vrot.slane %v2883_v12, 4 }
  0x92   : > { %v274_v14 = vmax.f32 %v2876_v10, %v270_v13  ;;  %v275_v15 = vmax.f32 %v2881_v11, %v270_v13  ;;  %v272_v16 = vmin.f32 %v2876_v10, %v270_v13  ;;  %v273_v17 = vmin.f32 %v2881_v11, %v270_v13 }
  0x94   : > { %v278_v18 = vrot.slane %v274_v14, 6  ;;  %v279_v19 = vrot.slane %v275_v15, 6 }
  0x96   : > { %v282_v20 = vsub.f32 %v272_v16, %v278_v18  ;;  %v283_v21 = vsub.f32 %v273_v17, %v279_v19 }
  0x97   : > { %v304_v24 = vpop.permute.xlu0 %303  ;;  %v441_v25 = vpop.permute.xlu1 %440 }
  0x98   : > { %v284_v26 = vmax.f32 %v282_v20, 0.0  ;;  %v285_v27 = vmax.f32 %v283_v21, 0.0  ;;  %v312_v36 = vadd.f32 %v2898_v30, %v304_v24  ;;  %v313_v37 = vadd.f32 %v2900_v31, %v304_v24 }
  0x99   : > { %v2929_v55 = vadd.f32 %v441_v25, %v2898_v30  ;;  %v2932_v56 = vadd.f32 %v441_v25, %v2900_v31 }
  0x9a   : > { %v288_v28 = vrot.slane %v284_v26, 1  ;;  %v289_v29 = vrot.slane %v285_v27, 1 }
  0x9c   : > { %v2902_v32 = vmul.f32 %v288_v28, %v284_v26  ;;  %v2904_v33 = vmul.f32 %v289_v29, %v285_v27 }
  0x9e   : > { %v316_v34 = vrot.slane %v2902_v32, 4  ;;  %v317_v35 = vrot.slane %v2904_v33, 4 }
  0xa0   : > { %v2910_v38 = vsub.f32 %v312_v36, %v316_v34  ;;  %v2912_v39 = vsub.f32 %v313_v37, %v317_v35  ;;  %v2914_v40 = vpop.permute.xlu0 %413  ;;  %v2916_v41 = vpop.permute.xlu1 %572 }
  0xa1   : > { %v415_v42 = vrot.slane %v2914_v40, 4 }
  0xa2   : > { %v326_v43 = vrot.slane %v2910_v38, 4  ;;  %v2921_v44 = vrot.slane %v2912_v39, 4  ;;  %vm322_vm6 = vcmp.gt.f32.partialorder %v2910_v38, 0.0  ;;  %vm323_vm11 = vcmp.gt.f32.partialorder %v2912_v39, 0.0 }
  0xa3   : > { %v419_v45 = vmax.f32 %v2876_v10, %v415_v42  ;;  %v420_v46 = vmax.f32 %v2881_v11, %v415_v42  ;;  %v417_v47 = vmin.f32 %v2876_v10, %v415_v42  ;;  %v418_v48 = vmin.f32 %v2881_v11, %v415_v42 }
  0xa4   : > { %2547 = vrcp.f32 %v326_v43  ;;  %v341_v51 = vand.u32 2147483648, %v326_v43  ;;  %v339_v52 = vand.u32 2147483647, %v326_v43  ;;  %vm335_vm1 = vweird.f32 %v326_v43 }
  0xa5   : > { %2549 = vrcp.f32 %v2921_v44  ;;  %v423_v49 = vrot.slane %v419_v45, 6  ;;  %v424_v50 = vrot.slane %v420_v46, 6  ;;  %vm350_vm2 = vweird.f32 %v2921_v44 }
  0xa6   : > { %v342_v3 = vor.u32 1.1754944e-38, %v341_v51  ;;  %vm2943_vm3 = vcmp.eq.f32.partialorder %v339_v52, 8.507059e+37  ;;  %v354_v14 = vand.u32 2147483647, %v2921_v44  ;;  %v356_v15 = vand.u32 2147483648, %v2921_v44 }
  0xa7   : > { %v427_v53 = vsub.f32 %v417_v47, %v423_v49  ;;  %v428_v54 = vsub.f32 %v418_v48, %v424_v50 }
  0xa8   : > { %vm355_vm9 = vcmp.eq.f32.partialorder %v354_v14, 8.507059e+37  ;;  %v357_v51 = vor.u32 1.1754944e-38, %v356_v15 }
  0xa9   : > { %v2934_v57 = vpop.permute.xlu1 %677  ;;  %v2936_v58 = vpop.permute.xlu0 %545  ;;  %v429_v59 = vmax.f32 %v427_v53, 0.0  ;;  %v430_v60 = vmax.f32 %v428_v54, 0.0 }
  0xaa   : > { %4887 = vst [vmem:[#allocation9_spill] sm:$0xff] %v2934_v57  ;;  %v2548_v61 = vpop.eup %2547  ;;  %v679_v62 = vrot.slane %v2934_v57, 4  ;;  %v2940_v63 = vrot.slane %v2936_v58, 4 }
  0xab   : > { %4888 = vst [vmem:[#allocation10_spill] sm:$0xff] %v2936_v58  ;;  %v2550_v4 = vpop.eup %2549  ;;  %v331_v5 = vmul.f32 %v2548_v61, %v326_v43  ;;  %v433_v16 = vrot.slane %v429_v59, 1  ;;  %vm336_vm4 = vweird.f32 %v2548_v61  ;;  %v434_v23 = vrot.slane %v430_v60, 1 }
  0xac   : > { %v346_v17 = vmul.f32 %v2550_v4, %v2921_v44  ;;  %v681_v18 = vmin.f32 %v2876_v10, %v679_v62  ;;  %v683_v19 = vmax.f32 %v2876_v10, %v679_v62  ;;  %v682_v21 = vmin.f32 %v2881_v11, %v679_v62  ;;  %vm337_vm8 = vmor %vm335_vm1, %vm336_vm4 }
  0xad   : > { %v332_v20 = vsub.f32 1.0, %v331_v5  ;;  %v684_v22 = vmax.f32 %v2881_v11, %v679_v62  ;;  %v549_v26 = vmin.f32 %v2876_v10, %v2940_v63  ;;  %v551_v27 = vmax.f32 %v2876_v10, %v2940_v63 }
  0xae   : > { %v347_v24 = vsub.f32 1.0, %v346_v17  ;;  %v687_v25 = vrot.slane %v683_v19, 6  ;;  %v552_v29 = vmax.f32 %v2881_v11, %v2940_v63  ;;  %v2960_v35 = vmul.f32 %v433_v16, %v429_v59 }
  0xaf   : > { %v688_v28 = vrot.slane %v684_v22, 6  ;;  %v333_v34 = vmul.f32 %v2548_v61, %v332_v20  ;;  %v555_v36 = vrot.slane %v551_v27, 6  ;;  %vm351_vm7 = vweird.f32 %v2550_v4 }
  0xb0   : > { %v691_v37 = vsub.f32 %v681_v18, %v687_v25  ;;  %v348_v42 = vmul.f32 %v2550_v4, %v347_v24  ;;  %v2963_v47 = vmul.f32 %v434_v23, %v430_v60  ;;  %v447_v48 = vrot.slane %v2960_v35, 4  ;;  %vm352_vm10 = vmor %vm350_vm2, %vm351_vm7 }
  0xb1   : > { %v692_v45 = vsub.f32 %v682_v21, %v688_v28  ;;  %v334_v46 = vadd.f32 %v2548_v61, %v333_v34  ;;  %v556_v52 = vrot.slane %v552_v29, 6  ;;  %v559_v62 = vsub.f32 %v549_v26, %v555_v36 }
  0xb2   : > { %v693_v49 = vmax.f32 %v691_v37, 0.0  ;;  %v349_v50 = vadd.f32 %v2550_v4, %v348_v42  ;;  %v705_v54 = vpop.permute.xlu0 %704  ;;  %v448_v17 = vrot.slane %v2963_v47, 4  ;;  %v2975_v15 = vsub.f32 %v2929_v55, %v447_v48 }
  0xb3   : > { %v694_v53 = vmax.f32 %v692_v45, 0.0  ;;  %v338_v59 = vsel %vm337_vm8, %v2548_v61, %v334_v46  ;;  %v707_v44 = vadd.f32 %v705_v54, %v2898_v30  ;;  %v550_v55 = vmin.f32 %v2881_v11, %v2940_v63 }
  0xb4   : > { %v697_v5 = vrot.slane %v693_v49, 1  ;;  %v343_v60 = vsel %vm2943_vm3, %v342_v3, %v338_v59  ;;  %v353_v16 = vsel %vm352_vm10, %v2550_v4, %v349_v50  ;;  %v2982_v20 = vsub.f32 %v2932_v56, %v448_v17 }
  0xb5   : > { %v698_v43 = vrot.slane %v694_v53, 1  ;;  %v344_v18 = vmul.f32 %v343_v60, %v2902_v32  ;;  %v358_v14 = vsel %vm355_vm9, %v357_v51, %v353_v16  ;;  %v708_v4 = vadd.f32 %v705_v54, %v2900_v31 }
  0xb6   : > { %v2977_v19 = vmul.f32 %v697_v5, %v693_v49  ;;  %v359_v61 = vmul.f32 %v358_v14, %v2904_v33  ;;  %v457_v32 = vrot.slane %v2975_v15, 4  ;;  %v2992_v23 = vrot.slane %v2982_v20, 4 }
  0xb7   : > { %v2984_v3 = vmul.f32 %v698_v43, %v694_v53  ;;  %v362_v13 = vrot.slane %v344_v18, 4  ;;  %v560_v26 = vsub.f32 %v550_v55, %v556_v52  ;;  %v561_v28 = vmax.f32 %v559_v62, 0.0 }
  0xb8   : > { %v711_v21 = vrot.slane %v2977_v19, 4  ;;  %v363_v22 = vrot.slane %v359_v61, 4  ;;  %2551 = vrcp.f32 %v457_v32  ;;  %v575_v48 = vadd.f32 %v2916_v41, %v2898_v30 }
  0xb9   : > { %v712_v33 = vrot.slane %v2984_v3, 4  ;;  %v2998_v56 = vsel %vm322_vm6, %v362_v13, 0.0  ;;  %2553 = vrcp.f32 %v2992_v23  ;;  %v562_v36 = vmax.f32 %v560_v26, 0.0 }
  0xba   : > { %v3000_v24 = vsub.f32 %v707_v44, %v711_v21  ;;  %v3002_v25 = vsel %vm323_vm11, %v363_v22, 0.0  ;;  %v372_v63 = vsel %vm371_vm5, %v2998_v56, -inf  ;;  %v565_v42 = vrot.slane %v561_v28, 1 }
  0xbb   : > { %v3006_v27 = vsub.f32 %v708_v4, %v712_v33  ;;  %v373_v39 = vsel %vm371_vm5, %v3002_v25, -inf  ;;  %v576_v49 = vadd.f32 %v2916_v41, %v2900_v31  ;;  %v566_v50 = vrot.slane %v562_v36, 1 }
  0xbc   : > { %v3012_v38 = vrot.slane %v3000_v24, 4  ;;  %v374_v29 = vmax.f32 %v372_v63, %v373_v39  ;;  %v3023_v51 = vmul.f32 %v565_v42, %v561_v28  ;;  %vm466_vm12 = vweird.f32 %v457_v32 }
  0xbd   : > { %v3015_v34 = vrot.slane %v3006_v27, 4  ;;  %v470_v53 = vand.u32 2147483647, %v457_v32  ;;  %v472_v59 = vand.u32 2147483648, %v457_v32  ;;  %v487_v62 = vand.u32 2147483648, %v2992_v23 }
  0xbe   : > { %2555 = vrcp.f32 %v3012_v38  ;;  %375 = vmax.xlane.f32.xlu1 %v374_v29  ;;  %v2552_v37 = vpop.eup %2551  ;;  %v3027_v5 = vmul.f32 %v566_v50, %v562_v36  ;;  %v579_v60 = vrot.slane %v3023_v51, 4  ;;  %v485_v14 = vand.u32 2147483647, %v2992_v23 }
  0xbf   : > { %2557 = vrcp.f32 %v3015_v34  ;;  %v462_v45 = vmul.f32 %v2552_v37, %v457_v32  ;;  %v2554_v46 = vpop.eup %2553  ;;  %vm467_vm13 = vweird.f32 %v2552_v37  ;;  %v4816_v4 = vmov 4  }
  0xc0   : > { %v477_v54 = vmul.f32 %v2554_v46, %v2992_v23  ;;  %v580_v44 = vrot.slane %v3027_v5, 4  ;;  %v3038_v61 = vsub.f32 %v575_v48, %v579_v60  ;;  %2514 = vset.pattern.permute.xlu1 %v4816_v4  ;;  %vm482_vm14 = vweird.f32 %v2554_v46  ;;  %vm468_vm15 = vmor %vm466_vm12, %vm467_vm13 }
  0xc1   : > { %v463_v52 = vsub.f32 1.0, %v462_v45  ;;  %vm471_vm0 = vcmp.eq.f32.partialorder %v470_v53, 8.507059e+37  ;;  %v473_v22 = vor.u32 1.1754944e-38, %v472_v59  ;;  %vm481_vm1 = vweird.f32 %v2992_v23 }
  0xc2   : > { %v478_v41 = vsub.f32 1.0, %v477_v54  ;;  %v3044_v33 = vsub.f32 %v576_v49, %v580_v44  ;;  %v3047_v63 = vrot.slane %v3038_v61, 4  ;;  %v488_v28 = vor.u32 1.1754944e-38, %v487_v62  ;;  %vm483_vm2 = vmor %vm481_vm1, %vm482_vm14 }
  0xc3   : > { %v464_v17 = vmul.f32 %v2552_v37, %v463_v52  ;;  %vm486_vm3 = vcmp.eq.f32.partialorder %v485_v14, 8.507059e+37  ;;  %v734_v50 = vand.u32 2147483647, %v3012_v38  ;;  %vm453_vm4 = vcmp.gt.f32.partialorder %v2975_v15, 0.0 }
  0xc4   : > { %v3030_v16 = vpop.eup %2555  ;;  %v479_v21 = vmul.f32 %v2554_v46, %v478_v41  ;;  %v3051_v42 = vrot.slane %v3044_v33, 4  ;;  %2559 = vrcp.f32 %v3047_v63  ;;  %vm454_vm6 = vcmp.gt.f32.partialorder %v2982_v20, 0.0 }
  0xc5   : > { %v3032_v43 = vpop.eup %2557  ;;  %v726_v18 = vmul.f32 %v3030_v16, %v3012_v38  ;;  %v465_v55 = vadd.f32 %v2552_v37, %v464_v17  ;;  %vm730_vm7 = vweird.f32 %v3012_v38  ;;  %vm3070_vm8 = vcmp.eq.f32.partialorder %v734_v50, 8.507059e+37 }
  0xc6   : > { %v741_v13 = vmul.f32 %v3032_v43, %v3015_v34  ;;  %v480_v39 = vadd.f32 %v2554_v46, %v479_v21  ;;  %2561 = vrcp.f32 %v3051_v42  ;;  %v736_v60 = vand.u32 2147483648, %v3012_v38 }
  0xc7   : > { %v469_v26 = vsel %vm468_vm15, %v2552_v37, %v465_v55  ;;  %v727_v29 = vsub.f32 1.0, %v726_v18  ;;  %vm731_vm9 = vweird.f32 %v3030_v16  ;;  %vm746_vm10 = vweird.f32 %v3032_v43 }
  0xc8   : > { %v474_v36 = vsel %vm471_vm0, %v473_v22, %v469_v26  ;;  %v742_v32 = vsub.f32 1.0, %v741_v13  ;;  %v484_v48 = vsel %vm483_vm2, %v2554_v46, %v480_v39  ;;  %v604_v55 = vand.u32 2147483648, %v3047_v63  ;;  %vm3091_vm13 = vmor %vm730_vm7, %vm731_vm9 }
  0xc9   : > { %v475_v45 = vmul.f32 %v474_v36, %v2960_v35  ;;  %v489_v49 = vsel %vm486_vm3, %v488_v28, %v484_v48  ;;  %v728_v52 = vmul.f32 %v3030_v16, %v727_v29  ;;  %vm745_vm11 = vweird.f32 %v3015_v34 }
  0xca   : > { %v490_v37 = vmul.f32 %v489_v49, %v2963_v47  ;;  %v743_v59 = vmul.f32 %v3032_v43, %v742_v32  ;;  %v2560_v35 = vpop.eup %2559  ;;  %v749_v21 = vand.u32 2147483647, %v3015_v34  ;;  %v751_v22 = vand.u32 2147483648, %v3015_v34  ;;  %vm3103_vm15 = vmor %vm745_vm11, %vm746_vm10 }
  0xcb   : > { %v493_v23 = vrot.slane %v475_v45, 4  ;;  %v594_v62 = vmul.f32 %v2560_v35, %v3047_v63  ;;  %v729_v20 = vadd.f32 %v3030_v16, %v728_v52  ;;  %vm599_vm12 = vweird.f32 %v2560_v35 }
  0xcc   : > { %v494_v53 = vrot.slane %v490_v37, 4  ;;  %v2562_v17 = vpop.eup %2561  ;;  %v744_v13 = vadd.f32 %v3032_v43, %v743_v59  ;;  %v602_v39 = vand.u32 2147483647, %v3047_v63  ;;  %vm598_vm14 = vweird.f32 %v3047_v63 }
  0xcd   : > { %v3060_v54 = vsel %vm453_vm4, %v493_v23, 0.0  ;;  %v595_v14 = vsub.f32 1.0, %v594_v62  ;;  %v609_v44 = vmul.f32 %v2562_v17, %v3051_v42  ;;  %v617_v36 = vand.u32 2147483647, %v3051_v42  ;;  %vm600_vm1 = vmor %vm598_vm14, %vm599_vm12 }
  0xce   : > { %v501_v46 = vsel %vm371_vm5, %v3060_v54, -inf  ;;  %v3067_v47 = vsel %vm454_vm6, %v494_v53, 0.0  ;;  %v619_v34 = vand.u32 2147483648, %v3051_v42  ;;  %v733_v32 = vsel %vm3091_vm13, %v3030_v16, %v729_v20 }
  0xcf   : > { %v502_v41 = vsel %vm371_vm5, %v3067_v47, -inf  ;;  %v596_v26 = vmul.f32 %v2560_v35, %v595_v14  ;;  %v610_v28 = vsub.f32 1.0, %v609_v44  ;;  %vm614_vm0 = vweird.f32 %v2562_v17 }
  0xd0   : > { %v503_v18 = vmax.f32 %v501_v46, %v502_v41  ;;  %v748_v63 = vsel %vm3103_vm15, %v3032_v43, %v744_v13  ;;  %v605_v49 = vor.u32 1.1754944e-38, %v604_v55  ;;  %v737_v37 = vor.u32 1.1754944e-38, %v736_v60 }
  0xd1   : > { %v597_v38 = vadd.f32 %v2560_v35, %v596_v26  ;;  %v611_v48 = vmul.f32 %v2562_v17, %v610_v28  ;;  %vm750_vm2 = vcmp.eq.f32.partialorder %v749_v21, 8.507059e+37  ;;  %v752_v16 = vor.u32 1.1754944e-38, %v751_v22 }
  0xd2   : > { %504 = vmax.xlane.f32.xlu0 %v503_v18  ;;  %vm603_vm3 = vcmp.eq.f32.partialorder %v602_v39, 8.507059e+37  ;;  %vm613_vm4 = vweird.f32 %v3051_v42  ;;  %v620_v53 = vor.u32 1.1754944e-38, %v619_v34  ;;  %v738_v59 = vsel %vm3070_vm8, %v737_v37, %v733_v32 }
  0xd3   : > { %v601_v23 = vsel %vm600_vm1, %v2560_v35, %v597_v38  ;;  %v612_v50 = vadd.f32 %v2562_v17, %v611_v48  ;;  %vm615_vm6 = vmor %vm613_vm4, %vm614_vm0  ;;  %v753_v46 = vsel %vm750_vm2, %v752_v16, %v748_v63  ;;  %vm618_vm7 = vcmp.eq.f32.partialorder %v617_v36, 8.507059e+37  ;;  %v3161_v38 = vpop.permute.xlu2 %403 }
  0xd4   : > { %v606_v52 = vsel %vm603_vm3, %v605_v49, %v601_v23  ;;  %v739_v35 = vmul.f32 %v738_v59, %v2977_v19  ;;  %v754_v18 = vmul.f32 %v753_v46, %v2984_v3  ;;  %vm585_vm9 = vcmp.gt.f32.partialorder %v3038_v61, 0.0 }
  0xd5   : > { %v607_v43 = vmul.f32 %v606_v52, %v3023_v51  ;;  %v616_v62 = vsel %vm615_vm6, %v2562_v17, %v612_v50  ;;  %vm586_vm8 = vcmp.gt.f32.partialorder %v3044_v33, 0.0  ;;  %vm717_vm10 = vcmp.gt.f32.partialorder %v3000_v24, 0.0 }
  0xd6   : > { %v621_v41 = vsel %vm618_vm7, %v620_v53, %v616_v62  ;;  %v757_v17 = vrot.slane %v739_v35, 4  ;;  %v758_v44 = vrot.slane %v754_v18, 4  ;;  %vm718_vm11 = vcmp.gt.f32.partialorder %v3006_v27, 0.0 }
  0xd7   : > { %809 = vperm.xlu1 %2514, %v2846_v2   ;;  %v622_v60 = vmul.f32 %v621_v41, %v3027_v5  ;;  %v625_v20 = vrot.slane %v607_v43, 4  ;;  %v4814_v21 = vmov 5   ;;  %v4810_v24 = vlaneseq }
  0xd8   : > { %v3130_v3 = vsel %vm717_vm10, %v757_v17, 0.0  ;;  %v3132_v61 = vsel %vm718_vm11, %v758_v44, 0.0 }
  0xd9   : > { %v626_v42 = vrot.slane %v622_v60, 4  ;;  %v3119_v14 = vsel %vm585_vm9, %v625_v20, 0.0  ;;  %v765_v33 = vsel %vm371_vm5, %v3130_v3, -inf  ;;  %v766_v13 = vsel %vm371_vm5, %v3132_v61, -inf }
  0xda   : > { %v633_v51 = vsel %vm371_vm5, %v3119_v14, -inf  ;;  %v767_v55 = vmax.f32 %v765_v33, %v766_v13  ;;  %v3145_v27 = vand.u32 127, %v4810_v24 }
  0xdb   : > { %v3124_v15 = vsel %vm586_vm8, %v626_v42, 0.0  ;;  %v3164_v48 = vpop.permute.xlu2 %531 }
  0xdc   : > { %v634_v5 = vsel %vm371_vm5, %v3124_v15, -inf  ;;  %v3148_v22 = vadd.s32 128, %v3145_v27 }
  0xdd   : > { %v635_v19 = vmax.f32 %v633_v51, %v634_v5 }
  0xdf   : > { %636 = vmax.xlane.f32.xlu2 %v635_v19  ;;  %2517 = vset.pattern.permute.xlu1 %v4814_v21 }
  0xe0   : > { %968 = vperm.xlu1 %2517, %v2851_v6  }
  0xe3   : > { %v3166_v63 = vpop.permute.xlu2 %663 }
  0xe7   : > { %768 = vmax.xlane.f32.xlu2 %v767_v55 }
  0xff   : > { %795 = vperm.xlu2 %2513, %v2867_v9  }
 0x107   : > { %2515 = vset.pattern.permute.xlu2 %v4816_v4 }
 0x108   : > { %836 = vperm.xlu2 %2515, %v2851_v6  }
 0x110   : > { %2516 = vset.pattern.permute.xlu2 %v4814_v21 }
 0x131   : > { %v376_v26 = vpop.xlane.xlu1 %375 }
 0x132   : > { %vm377_vm12 = vcmp.eq.f32.partialorder %v2998_v56, %v376_v26  ;;  %vm378_vm13 = vcmp.eq.f32.partialorder %v3002_v25, %v376_v26 }
 0x133   : > { %v379_v39 = vsel %vm377_vm12, %v3145_v27, 256  ;;  %v380_v28 = vsel %vm378_vm13, %v3148_v22, 256 }
 0x134   : > { %v381_v29 = vsel %vm371_vm5, %v379_v39, 2147483647  ;;  %v382_v36 = vsel %vm371_vm5, %v380_v28, 2147483647 }
 0x135   : > { %vm383_vm14 = vcmp.lt.s32.totalorder %v381_v29, %v382_v36 }
 0x136   : > { %v3156_v34 = vsel %vm383_vm14, %v381_v29, %v382_v36 }
 0x137   : > { %v386_v32 = vshra.s32 %v3156_v34, 16 }
 0x139   : > { %v3159_v45 = vcvt.s32.f32 %v386_v32 }
 0x13b   : > { %389 = vmin.xlane.f32.xlu1 %v3159_v45 }
 0x149   : > { %v3168_v49 = vpop.permute.xlu1 %809 }
 0x14a   : > { %4897 = vst [vmem:[#allocation11_spill] sm:$0xff] %v3168_v49  ;;  %v811_v37 = vrot.slane %v3168_v49, 4 }
 0x14c   : > { %v815_v23 = vmax.f32 %v2876_v10, %v811_v37  ;;  %v816_v50 = vmax.f32 %v2881_v11, %v811_v37  ;;  %v813_v43 = vmin.f32 %v2876_v10, %v811_v37  ;;  %v814_v62 = vmin.f32 %v2881_v11, %v811_v37 }
 0x14e   : > { %v819_v41 = vrot.slane %v815_v23, 6  ;;  %v820_v60 = vrot.slane %v816_v50, 6 }
 0x150   : > { %v823_v51 = vsub.f32 %v813_v43, %v819_v41  ;;  %v824_v17 = vsub.f32 %v814_v62, %v820_v60 }
 0x152   : > { %v637_v16 = vpop.xlane.xlu2 %636  ;;  %v825_v55 = vmax.f32 %v823_v51, 0.0  ;;  %v826_v26 = vmax.f32 %v824_v17, 0.0 }
 0x153   : > { %vm638_vm15 = vcmp.eq.f32.partialorder %v3119_v14, %v637_v16  ;;  %vm639_vm0 = vcmp.eq.f32.partialorder %v3124_v15, %v637_v16 }
 0x154   : > { %v640_v52 = vsel %vm638_vm15, %v3145_v27, 256  ;;  %v641_v53 = vsel %vm639_vm0, %v3148_v22, 256  ;;  %v829_v36 = vrot.slane %v825_v55, 1  ;;  %v830_v32 = vrot.slane %v826_v26, 1 }
 0x155   : > { %v642_v59 = vsel %vm371_vm5, %v640_v52, 2147483647  ;;  %v643_v46 = vsel %vm371_vm5, %v641_v53, 2147483647 }
 0x156   : > { %vm644_vm1 = vcmp.lt.s32.totalorder %v642_v59, %v643_v46  ;;  %v833_v37 = vmul.f32 %v829_v36, %v825_v55  ;;  %v834_v16 = vmul.f32 %v830_v32, %v826_v26 }
 0x157   : > { %v3181_v20 = vsel %vm644_vm1, %v642_v59, %v643_v46 }
 0x158   : > { %v647_v35 = vshra.s32 %v3181_v20, 16  ;;  %v843_v50 = vrot.slane %v833_v37, 4  ;;  %v844_v52 = vrot.slane %v834_v16, 4 }
 0x15a   : > { %v769_v18 = vpop.xlane.xlu2 %768  ;;  %v3184_v42 = vcvt.s32.f32 %v647_v35 }
 0x15b   : > { %vm770_vm2 = vcmp.eq.f32.partialorder %v3130_v3, %v769_v18  ;;  %vm771_vm3 = vcmp.eq.f32.partialorder %v3132_v61, %v769_v18 }
 0x15c   : > { %v772_v44 = vsel %vm770_vm2, %v3145_v27, 256  ;;  %v773_v5 = vsel %vm771_vm3, %v3148_v22, 256  ;;  %650 = vmin.xlane.f32.xlu1 %v3184_v42 }
 0x15d   : > { %v774_v19 = vsel %vm371_vm5, %v772_v44, 2147483647  ;;  %v775_v33 = vsel %vm371_vm5, %v773_v5, 2147483647 }
 0x15e   : > { %vm776_vm4 = vcmp.lt.s32.totalorder %v774_v19, %v775_v33 }
 0x15f   : > { %v3193_v13 = vsel %vm776_vm4, %v774_v19, %v775_v33 }
 0x160   : > { %v779_v39 = vshra.s32 %v3193_v13, 16 }
 0x162   : > { %v3196_v28 = vpop.permute.xlu2 %795  ;;  %v3198_v29 = vcvt.s32.f32 %v779_v39 }
 0x164   : > { %782 = vmin.xlane.f32.xlu1 %v3198_v29 }
 0x16a   : > { %v837_v23 = vpop.permute.xlu2 %836 }
 0x16b   : > { %v839_v53 = vadd.f32 %v837_v23, %v2898_v30  ;;  %v840_v59 = vadd.f32 %v837_v23, %v2900_v31 }
 0x16d   : > { %v847_v46 = vsub.f32 %v839_v53, %v843_v50  ;;  %v848_v43 = vsub.f32 %v840_v59, %v844_v52 }
 0x16f   : > { %v853_v62 = vrot.slane %v847_v46, 4  ;;  %v854_v41 = vrot.slane %v848_v43, 4  ;;  %vm849_vm14 = vcmp.gt.f32.partialorder %v847_v46, 0.0  ;;  %vm850_vm15 = vcmp.gt.f32.partialorder %v848_v43, 0.0 }
 0x171   : > { %2563 = vrcp.f32 %v853_v62  ;;  %v868_v5 = vand.u32 2147483648, %v853_v62  ;;  %v866_v33 = vand.u32 2147483647, %v853_v62  ;;  %v883_v55 = vand.u32 2147483648, %v854_v41 }
 0x172   : > { %2565 = vrcp.f32 %v854_v41  ;;  %v881_v39 = vand.u32 2147483647, %v854_v41  ;;  %vm862_vm9 = vweird.f32 %v853_v62  ;;  %vm877_vm10 = vweird.f32 %v854_v41 }
 0x173   : > { %v869_v32 = vor.u32 1.1754944e-38, %v868_v5  ;;  %vm867_vm11 = vcmp.eq.f32.partialorder %v866_v33, 8.507059e+37  ;;  %v884_v52 = vor.u32 1.1754944e-38, %v883_v55 }
 0x174   : > { %vm882_vm13 = vcmp.eq.f32.partialorder %v881_v39, 8.507059e+37  ;;  %v646_v39 = vand.u32 65535, %v3181_v20 }
 0x177   : > { %v2564_v60 = vpop.eup %2563 }
 0x178   : > { %v2566_v35 = vpop.eup %2565  ;;  %v858_v18 = vmul.f32 %v2564_v60, %v853_v62  ;;  %vm863_vm6 = vweird.f32 %v2564_v60 }
 0x179   : > { %v873_v51 = vmul.f32 %v2566_v35, %v854_v41  ;;  %vm878_vm7 = vweird.f32 %v2566_v35  ;;  %vm864_vm8 = vmor %vm862_vm9, %vm863_vm6 }
 0x17a   : > { %v859_v17 = vsub.f32 1.0, %v858_v18  ;;  %vm879_vm12 = vmor %vm877_vm10, %vm878_vm7 }
 0x17b   : > { %v874_v44 = vsub.f32 1.0, %v873_v51 }
 0x17c   : > { %v860_v19 = vmul.f32 %v2564_v60, %v859_v17 }
 0x17d   : > { %v875_v26 = vmul.f32 %v2566_v35, %v874_v44 }
 0x17e   : > { %v861_v36 = vadd.f32 %v2564_v60, %v860_v19 }
 0x17f   : > { %v876_v23 = vadd.f32 %v2566_v35, %v875_v26 }
 0x180   : > { %v865_v50 = vsel %vm864_vm8, %v2564_v60, %v861_v36 }
 0x181   : > { %v870_v53 = vsel %vm867_vm11, %v869_v32, %v865_v50  ;;  %v880_v59 = vsel %vm879_vm12, %v2566_v35, %v876_v23  ;;  %v969_v35 = vpop.permute.xlu1 %968  ;;  %v648_v32 = vcvt.s32.f32 %v646_v39  ;;  %v4812_v50 = vmov 6  }
 0x182   : > { %v871_v18 = vmul.f32 %v870_v53, %v833_v37  ;;  %v885_v51 = vsel %vm882_vm13, %v884_v52, %v880_v59  ;;  %v505_v37 = vpop.xlane.xlu0 %504  ;;  %2519 = vset.pattern.permute.xlu1 %v4812_v50 }
 0x183   : > { %v886_v17 = vmul.f32 %v885_v51, %v834_v16  ;;  %vm506_vm0 = vcmp.eq.f32.partialorder %v3060_v54, %v505_v37  ;;  %vm507_vm1 = vcmp.eq.f32.partialorder %v3067_v47, %v505_v37  ;;  %1100 = vperm.xlu1 %2519, %v2851_v6  }
 0x184   : > { %v889_v24 = vrot.slane %v871_v18, 4  ;;  %v509_v16 = vsel %vm507_vm1, %v3148_v22, 256 }
 0x185   : > { %v890_v44 = vrot.slane %v886_v17, 4  ;;  %v511_v43 = vsel %vm371_vm5, %v509_v16, 2147483647 }
 0x186   : > { %v3203_v19 = vsel %vm849_vm14, %v889_v24, 0.0  ;;  %v508_v24 = vsel %vm506_vm0, %v3145_v27, 256 }
 0x187   : > { %v3205_v62 = vsel %vm850_vm15, %v890_v44, 0.0  ;;  %v897_v41 = vsel %vm371_vm5, %v3203_v19, -inf  ;;  %v510_v46 = vsel %vm371_vm5, %v508_v24, 2147483647 }
 0x188   : > { %v898_v60 = vsel %vm371_vm5, %v3205_v62, -inf  ;;  %vm512_vm2 = vcmp.lt.s32.totalorder %v510_v46, %v511_v43 }
 0x189   : > { %v899_v5 = vmax.f32 %v897_v41, %v898_v60  ;;  %v3218_v33 = vsel %vm512_vm2, %v510_v46, %v511_v43  ;;  %v971_v46 = vadd.f32 %v969_v35, %v2898_v30  ;;  %v972_v43 = vadd.f32 %v969_v35, %v2900_v31 }
 0x18a   : > { %v515_v55 = vshra.s32 %v3218_v33, 16 }
 0x18b   : > { %900 = vmax.xlane.f32.xlu2 %v899_v5 }
 0x18c   : > { %v3223_v26 = vcvt.s32.f32 %v515_v55 }
 0x1a3   : > { %941 = vperm.xlu2 %2516, %v2846_v2  }
 0x1ab   : > { %2518 = vset.pattern.permute.xlu2 %v4812_v50 }
 0x1ae   : > { %v3221_v2 = vpop.xlane.xlu1 %389 }
 0x1cc   : > { %518 = vmin.xlane.f32.xlu2 %v3223_v26 }
 0x1cf   : > { %v3227_v36 = vpop.xlane.xlu1 %650 }
 0x1d0   : > { %vm652_vm3 = vcmp.eq.f32.partialorder %v3184_v42, %v3227_v36 }
 0x1d1   : > { %v3231_v23 = vsel %vm652_vm3, %v648_v32, inf }
 0x1fe   : > { %v901_v52 = vpop.xlane.xlu2 %900 }
 0x1ff   : > { %vm902_vm6 = vcmp.eq.f32.partialorder %v3203_v19, %v901_v52  ;;  %vm903_vm9 = vcmp.eq.f32.partialorder %v3205_v62, %v901_v52 }
 0x206   : > { %v3236_v53 = vpop.permute.xlu2 %941 }
 0x207   : > { %4898 = vst [vmem:[#allocation12_spill] sm:$0xff] %v3236_v53  ;;  %v943_v20 = vrot.slane %v3236_v53, 4 }
 0x209   : > { %v947_v59 = vmax.f32 %v2876_v10, %v943_v20  ;;  %v948_v18 = vmax.f32 %v2881_v11, %v943_v20  ;;  %v945_v42 = vmin.f32 %v2876_v10, %v943_v20  ;;  %v946_v51 = vmin.f32 %v2881_v11, %v943_v20 }
 0x20b   : > { %v951_v17 = vrot.slane %v947_v59, 6  ;;  %v952_v44 = vrot.slane %v948_v18, 6 }
 0x20d   : > { %v955_v41 = vsub.f32 %v945_v42, %v951_v17  ;;  %v956_v60 = vsub.f32 %v946_v51, %v952_v44 }
 0x20f   : > { %v957_v5 = vmax.f32 %v955_v41, 0.0  ;;  %v958_v37 = vmax.f32 %v956_v60, 0.0 }
 0x211   : > { %v961_v24 = vrot.slane %v957_v5, 1  ;;  %v962_v16 = vrot.slane %v958_v37, 1 }
 0x213   : > { %v965_v55 = vmul.f32 %v961_v24, %v957_v5  ;;  %v966_v39 = vmul.f32 %v962_v16, %v958_v37 }
 0x215   : > { %v975_v32 = vrot.slane %v965_v55, 4  ;;  %v976_v50 = vrot.slane %v966_v39, 4 }
 0x217   : > { %v979_v21 = vsub.f32 %v971_v46, %v975_v32  ;;  %v980_v10 = vsub.f32 %v972_v43, %v976_v50  ;;  %v904_v46 = vsel %vm902_vm6, %v3145_v27, 256 }
 0x219   : > { %v985_v4 = vrot.slane %v979_v21, 4  ;;  %v986_v11 = vrot.slane %v980_v10, 4  ;;  %vm981_vm15 = vcmp.gt.f32.partialorder %v979_v21, 0.0  ;;  %vm982_vm0 = vcmp.gt.f32.partialorder %v980_v10, 0.0 }
 0x21a   : > { %v514_v21 = vand.u32 65535, %v3218_v33 }
 0x21b   : > { %2567 = vrcp.f32 %v985_v4  ;;  %v1000_v17 = vand.u32 2147483648, %v985_v4  ;;  %v998_v35 = vand.u32 2147483647, %v985_v4  ;;  %v1015_v60 = vand.u32 2147483648, %v986_v11 }
 0x21c   : > { %2569 = vrcp.f32 %v986_v11  ;;  %v1013_v50 = vand.u32 2147483647, %v986_v11  ;;  %vm994_vm8 = vweird.f32 %v985_v4  ;;  %vm1009_vm11 = vweird.f32 %v986_v11 }
 0x21d   : > { %v1001_v24 = vor.u32 1.1754944e-38, %v1000_v17  ;;  %vm999_vm12 = vcmp.eq.f32.partialorder %v998_v35, 8.507059e+37  ;;  %v1016_v32 = vor.u32 1.1754944e-38, %v1015_v60 }
 0x21e   : > { %vm1014_vm14 = vcmp.eq.f32.partialorder %v1013_v50, 8.507059e+37  ;;  %v516_v50 = vcvt.s32.f32 %v514_v21 }
 0x221   : > { %v2568_v20 = vpop.eup %2567 }
 0x222   : > { %v2570_v59 = vpop.eup %2569  ;;  %v990_v18 = vmul.f32 %v2568_v20, %v985_v4  ;;  %vm995_vm4 = vweird.f32 %v2568_v20  ;;  %v906_v4 = vsel %vm371_vm5, %v904_v46, 2147483647 }
 0x223   : > { %v1005_v42 = vmul.f32 %v2570_v59, %v986_v11  ;;  %vm1010_vm7 = vweird.f32 %v2570_v59  ;;  %vm996_vm10 = vmor %vm994_vm8, %vm995_vm4 }
 0x224   : > { %v991_v51 = vsub.f32 1.0, %v990_v18  ;;  %vm1011_vm13 = vmor %vm1009_vm11, %vm1010_vm7  ;;  %v905_v18 = vsel %vm903_vm9, %v3148_v22, 256 }
 0x225   : > { %v1006_v44 = vsub.f32 1.0, %v1005_v42  ;;  %v907_v17 = vsel %vm371_vm5, %v905_v18, 2147483647 }
 0x226   : > { %v992_v41 = vmul.f32 %v2568_v20, %v991_v51  ;;  %vm908_vm1 = vcmp.lt.s32.totalorder %v906_v4, %v907_v17 }
 0x227   : > { %v1007_v5 = vmul.f32 %v2570_v59, %v1006_v44 }
 0x228   : > { %v993_v37 = vadd.f32 %v2568_v20, %v992_v41 }
 0x229   : > { %v1008_v16 = vadd.f32 %v2570_v59, %v1007_v5 }
 0x22a   : > { %v997_v43 = vsel %vm996_vm10, %v2568_v20, %v993_v37 }
 0x22b   : > { %v1002_v42 = vsel %vm999_vm12, %v1001_v24, %v997_v43  ;;  %v1012_v51 = vsel %vm1011_vm13, %v2570_v59, %v1008_v16 }
 0x22c   : > { %v1003_v44 = vmul.f32 %v1002_v42, %v965_v55  ;;  %v1017_v8 = vsel %vm1014_vm14, %v1016_v32, %v1012_v51 }
 0x22d   : > { %v1018_v52 = vmul.f32 %v1017_v8, %v966_v39  ;;  %v909_v39 = vsel %vm908_vm1, %v906_v4, %v907_v17  ;;  %v3274_v4 = vld [vmem:[%s2843_s9] sm:$0xff] }
 0x22e   : > { %v1021_v41 = vrot.slane %v1003_v44, 4  ;;  %v911_v60 = vshra.s32 %v909_v39, 16  ;;  %v910_v32 = vand.u32 65535, %v909_v39  ;;  %v3286_v39 = vld [vmem:[%s4805_s1] sm:$0xff] }
 0x22f   : > { %v1022_v11 = vrot.slane %v1018_v52, 4 }
 0x230   : > { %v3251_v20 = vsel %vm981_vm15, %v1021_v41, 0.0  ;;  %v913_v5 = vcvt.s32.f32 %v911_v60  ;;  %v912_v44 = vcvt.s32.f32 %v910_v32 }
 0x231   : > { %v3253_v35 = vsel %vm982_vm0, %v1022_v11, 0.0  ;;  %v1029_v59 = vsel %vm371_vm5, %v3251_v20, -inf }
 0x232   : > { %v1030_v55 = vsel %vm371_vm5, %v3253_v35, -inf }
 0x233   : > { %v1031_v8 = vmax.f32 %v1029_v59, %v1030_v55 }
 0x235   : > { %1032 = vmax.xlane.f32.xlu0 %v1031_v8 }
 0x23d   : > { %914 = vmin.xlane.f32.xlu0 %v913_v5 }
 0x23f   : > { %v3260_v10 = vpop.xlane.xlu2 %518 }
 0x240   : > { %vm520_vm2 = vcmp.eq.f32.partialorder %v3223_v26, %v3260_v10 }
 0x241   : > { %v521_v37 = vsel %vm520_vm2, %v516_v50, inf  ;;  %v3295_v50 = vpop.xlane.xlu1 %782 }
 0x242   : > { %522 = vmin.xlane.f32.xlu1 %v521_v37 }
 0x2a8   : > { %v1033_v24 = vpop.xlane.xlu0 %1032 }
 0x2a9   : > { %vm1034_vm3 = vcmp.eq.f32.partialorder %v3251_v20, %v1033_v24  ;;  %vm1035_vm4 = vcmp.eq.f32.partialorder %v3253_v35, %v1033_v24 }
 0x2aa   : > { %v1036_v16 = vsel %vm1034_vm3, %v3145_v27, 256  ;;  %v1037_v46 = vsel %vm1035_vm4, %v3148_v22, 256  ;;  %vm391_vm3 = vcmp.eq.f32.partialorder %v3159_v45, %v3221_v2 }
 0x2ab   : > { %v1038_v33 = vsel %vm371_vm5, %v1036_v16, 2147483647  ;;  %v1039_v43 = vsel %vm371_vm5, %v1037_v46, 2147483647 }
 0x2ac   : > { %vm1040_vm6 = vcmp.lt.s32.totalorder %v1038_v33, %v1039_v43 }
 0x2ad   : > { %v1041_v18 = vsel %vm1040_vm6, %v1038_v33, %v1039_v43 }
 0x2ae   : > { %v1043_v26 = vshra.s32 %v1041_v18, 16  ;;  %v1042_v17 = vand.u32 65535, %v1041_v18 }
 0x2b0   : > { %v3270_v42 = vpop.xlane.xlu0 %914  ;;  %v1045_v51 = vcvt.s32.f32 %v1043_v26  ;;  %v1044_v11 = vcvt.s32.f32 %v1042_v17 }
 0x2b1   : > { %vm916_vm7 = vcmp.eq.f32.partialorder %v913_v5, %v3270_v42  ;;  %v3292_v5 = vld [vmem:[%s4805_s1 + $0x8] sm:$0xff] }
 0x2b2   : > { %1046 = vmin.xlane.f32.xlu2 %v1045_v51  ;;  %v917_v52 = vsel %vm916_vm7, %v912_v44, inf  ;;  %v1101_v44 = vpop.permute.xlu1 %1100 }
 0x2b3   : > { %918 = vmin.xlane.f32.xlu1 %v917_v52  ;;  %v1103_v52 = vadd.f32 %v1101_v44, %v2898_v30  ;;  %v1104_v17 = vadd.f32 %v1101_v44, %v2900_v31 }
 0x2ca   : > { %1073 = vperm.xlu2 %2518, %v3274_v4  }
 0x325   : > { %v3277_v41 = vpop.xlane.xlu2 %1046 }
 0x326   : > { %vm1048_vm9 = vcmp.eq.f32.partialorder %v1045_v51, %v3277_v41 }
 0x327   : > { %v1049_v59 = vsel %vm1048_vm9, %v1044_v11, inf }
 0x328   : > { %1050 = vmin.xlane.f32.xlu1 %v1049_v59 }
 0x32d   : > { %v3280_v55 = vpop.permute.xlu2 %1073 }
 0x32e   : > { %4899 = vst [vmem:[#allocation13_spill] sm:$0xff] %v3280_v55  ;;  %v1075_v8 = vrot.slane %v3280_v55, 4 }
 0x330   : > { %v1079_v60 = vmax.f32 %v3286_v39, %v1075_v8  ;;  %v1080_v21 = vmax.f32 %v3292_v5, %v1075_v8  ;;  %v1077_v37 = vmin.f32 %v3286_v39, %v1075_v8  ;;  %v1078_v24 = vmin.f32 %v3292_v5, %v1075_v8 }
 0x332   : > { %v1083_v16 = vrot.slane %v1079_v60, 6  ;;  %v1084_v46 = vrot.slane %v1080_v21, 6 }
 0x334   : > { %v1087_v33 = vsub.f32 %v1077_v37, %v1083_v16  ;;  %v1088_v43 = vsub.f32 %v1078_v24, %v1084_v46 }
 0x336   : > { %v1089_v32 = vmax.f32 %v1087_v33, 0.0  ;;  %v1090_v18 = vmax.f32 %v1088_v43, 0.0 }
 0x338   : > { %v1093_v26 = vrot.slane %v1089_v32, 1  ;;  %v1094_v51 = vrot.slane %v1090_v18, 1 }
 0x33a   : > { %v1097_v11 = vmul.f32 %v1093_v26, %v1089_v32  ;;  %v1098_v59 = vmul.f32 %v1094_v51, %v1090_v18 }
 0x33c   : > { %v1107_v7 = vrot.slane %v1097_v11, 4  ;;  %v1108_v1 = vrot.slane %v1098_v59, 4 }
 0x33e   : > { %v1111_v0 = vsub.f32 %v1103_v52, %v1107_v7  ;;  %v1112_v55 = vsub.f32 %v1104_v17, %v1108_v1 }
 0x340   : > { %v1117_v8 = vrot.slane %v1111_v0, 4  ;;  %v1118_v60 = vrot.slane %v1112_v55, 4  ;;  %vm1113_vm1 = vcmp.gt.f32.partialorder %v1111_v0, 0.0  ;;  %vm1114_vm2 = vcmp.gt.f32.partialorder %v1112_v55, 0.0 }
 0x341   : > { %v525_v55 = vcvt.f32.s32 %v3260_v10 }
 0x342   : > { %2571 = vrcp.f32 %v1117_v8  ;;  %v1132_v33 = vand.u32 2147483648, %v1117_v8  ;;  %v1130_v44 = vand.u32 2147483647, %v1117_v8  ;;  %v1147_v32 = vand.u32 2147483648, %v1118_v60 }
 0x343   : > { %2573 = vrcp.f32 %v1118_v60  ;;  %v1145_v26 = vand.u32 2147483647, %v1118_v60  ;;  %vm1126_vm11 = vweird.f32 %v1117_v8  ;;  %vm1141_vm13 = vweird.f32 %v1118_v60 }
 0x344   : > { %v1133_v1 = vor.u32 1.1754944e-38, %v1132_v33  ;;  %vm1131_vm14 = vcmp.eq.f32.partialorder %v1130_v44, 8.507059e+37  ;;  %v1148_v17 = vor.u32 1.1754944e-38, %v1147_v32 }
 0x345   : > { %vm1146_vm0 = vcmp.eq.f32.partialorder %v1145_v26, 8.507059e+37  ;;  %v396_v26 = vcvt.f32.s32 %v3221_v2 }
 0x348   : > { %v2572_v21 = vpop.eup %2571 }
 0x349   : > { %v2574_v37 = vpop.eup %2573  ;;  %v1122_v24 = vmul.f32 %v2572_v21, %v1117_v8  ;;  %vm1127_vm8 = vweird.f32 %v2572_v21 }
 0x34a   : > { %v1137_v16 = vmul.f32 %v2574_v37, %v1118_v60  ;;  %vm1142_vm10 = vweird.f32 %v2574_v37  ;;  %vm1128_vm12 = vmor %vm1126_vm11, %vm1127_vm8  ;;  %vm369_vm8 = vcmp.gt.f32.partialorder %v2998_v56, -1.0  ;;  %vm370_vm11 = vcmp.gt.f32.partialorder %v3002_v25, -1.0 }
 0x34b   : > { %v1123_v46 = vsub.f32 1.0, %v1122_v24  ;;  %vm1143_vm15 = vmor %vm1141_vm13, %vm1142_vm10  ;;  %vm533_vm10 = vcmp.eq.s32.totalorder %v3164_v48, 1  ;;  %v408_v2 = vsel %vm369_vm8, %v2998_v56, -1.0  ;;  %vm784_vm8 = vcmp.eq.f32.partialorder %v3198_v29, %v3295_v50 }
 0x34c   : > { %v1138_v43 = vsub.f32 1.0, %v1137_v16 }
 0x34d   : > { %v1124_v53 = vmul.f32 %v2572_v21, %v1123_v46 }
 0x34e   : > { %v1139_v18 = vmul.f32 %v2574_v37, %v1138_v43 }
 0x34f   : > { %v1125_v7 = vadd.f32 %v2572_v21, %v1124_v53 }
 0x350   : > { %v1140_v51 = vadd.f32 %v2574_v37, %v1139_v18  ;;  %v526_v18 = vshll.u32 %v525_v55, 16 }
 0x351   : > { %v1129_v52 = vsel %vm1128_vm12, %v2572_v21, %v1125_v7  ;;  %vm405_vm12 = vcmp.eq.s32.totalorder %v3161_v38, 1 }
 0x352   : > { %v1134_v24 = vsel %vm1131_vm14, %v1133_v1, %v1129_v52  ;;  %v1144_v49 = vsel %vm1143_vm15, %v2574_v37, %v1140_v51 }
 0x353   : > { %v1135_v16 = vmul.f32 %v1134_v24, %v1097_v11  ;;  %v1149_v46 = vsel %vm1146_vm0, %v1148_v17, %v1144_v49  ;;  %v385_v11 = vand.u32 65535, %v3156_v34  ;;  %v523_v49 = vpop.xlane.xlu1 %522  ;;  %v397_v17 = vshll.u32 %v396_v26, 16 }
 0x354   : > { %v1150_v57 = vmul.f32 %v1149_v46, %v1098_v59  ;;  %v524_v34 = vcvt.f32.s32 %v523_v49  ;;  %v409_v46 = vsel %vm370_vm11, %v3002_v25, -1.0 }
 0x355   : > { %v1153_v58 = vrot.slane %v1135_v16, 4  ;;  %v387_v0 = vcvt.s32.f32 %v385_v11  ;;  %v4904_v11 = vmov 0  }
 0x356   : > { %v1154_v43 = vrot.slane %v1150_v57, 4  ;;  %v527_v10 = vadd.s32 %v526_v18, %v524_v34 }
 0x357   : > { %v3301_v53 = vsel %vm1113_vm1, %v1153_v58, 0.0  ;;  %v392_v57 = vsel %vm391_vm3, %v387_v0, inf  ;;  %v2749_v58 = vmov 7  }
 0x358   : > { %v3303_v8 = vsel %vm1114_vm2, %v1154_v43, 0.0  ;;  %v1161_v60 = vsel %vm371_vm5, %v3301_v53, -inf  ;;  %2520 = vset.pattern.permute.xlu0 %v2749_v58  ;;  %2521 = vset.pattern.permute.xlu1 %v2749_v58  ;;  %vm528_vm9 = vcmp.eq.s32.totalorder %v3145_v27, %v527_v10  ;;  %vm529_vm13 = vcmp.eq.s32.totalorder %v3148_v22, %v527_v10 }
 0x359   : > { %v1162_v21 = vsel %vm371_vm5, %v3303_v8, -inf  ;;  %vm534_vm14 = vmand %vm528_vm9, %vm533_vm10 }
 0x35a   : > { %v1163_v33 = vmax.f32 %v1161_v60, %v1162_v21  ;;  %vm535_vm3 = vmand %vm529_vm13, %vm533_vm10  ;;  %vm665_vm13 = vcmp.eq.s32.totalorder %v3166_v63, 1 }
 0x35c   : > { %1164 = vmax.xlane.f32.xlu2 %v1163_v33 }
 0x364   : > { %393 = vmin.xlane.f32.xlu2 %v392_v57 }
 0x37c   : > { %1191 = vperm.xlu2 %2518, %v2867_v9  }
 0x384   : > { %2522 = vset.pattern.permute.xlu2 %v2749_v58 }
 0x3cf   : > { %v1165_v59 = vpop.xlane.xlu2 %1164 }
 0x3d0   : > { %vm1166_vm4 = vcmp.eq.f32.partialorder %v3301_v53, %v1165_v59  ;;  %vm1167_vm6 = vcmp.eq.f32.partialorder %v3303_v8, %v1165_v59 }
 0x3d1   : > { %v1168_v45 = vsel %vm1166_vm4, %v3145_v27, 256  ;;  %v1169_v37 = vsel %vm1167_vm6, %v3148_v22, 256 }
 0x3d2   : > { %v1170_v44 = vsel %vm371_vm5, %v1168_v45, 2147483647  ;;  %v1171_v32 = vsel %vm371_vm5, %v1169_v37, 2147483647  ;;  %v789_v37 = vcvt.f32.s32 %v3295_v50 }
 0x3d3   : > { %vm1172_vm7 = vcmp.lt.s32.totalorder %v1170_v44, %v1171_v32 }
 0x3d4   : > { %v1173_v7 = vsel %vm1172_vm7, %v1170_v44, %v1171_v32  ;;  %v790_v26 = vshll.u32 %v789_v37, 16 }
 0x3d5   : > { %v1175_v1 = vshra.s32 %v1173_v7, 16 }
 0x3d7   : > { %v394_v51 = vpop.xlane.xlu2 %393  ;;  %v1177_v52 = vcvt.s32.f32 %v1175_v1 }
 0x3d8   : > { %v395_v24 = vcvt.f32.s32 %v394_v51 }
 0x3d9   : > { %1178 = vmin.xlane.f32.xlu0 %v1177_v52 }
 0x3da   : > { %v398_v16 = vadd.s32 %v397_v17, %v395_v24 }
 0x3dc   : > { %vm399_vm15 = vcmp.eq.s32.totalorder %v3145_v27, %v398_v16  ;;  %vm400_vm0 = vcmp.eq.s32.totalorder %v3148_v22, %v398_v16 }
 0x3dd   : > { %vm406_vm1 = vmand %vm399_vm15, %vm405_vm12 }
 0x3de   : > { %vm407_vm2 = vmand %vm400_vm0, %vm405_vm12  ;;  %v410_v43 = vsel %vm406_vm1, 2.0, %v408_v2 }
 0x3df   : > { %v411_v48 = vsel %vm407_vm2, 2.0, %v409_v46  ;;  %vm499_vm4 = vcmp.gt.f32.partialorder %v3060_v54, %v410_v43 }
 0x3e0   : > { %vm500_vm6 = vcmp.gt.f32.partialorder %v3067_v47, %v411_v48  ;;  %v538_v38 = vsel %vm499_vm4, %v3060_v54, %v410_v43  ;;  %vm3337_vm7 = vmor %vm499_vm4, %vm534_vm14  ;;  %v778_v54 = vand.u32 65535, %v3193_v13  ;;  %v657_v13 = vcvt.f32.s32 %v3227_v36 }
 0x3e1   : > { %v539_v21 = vsel %vm500_vm6, %v3067_v47, %v411_v48  ;;  %v540_v56 = vsel %vm534_vm14, 2.0, %v538_v38  ;;  %vm3342_vm9 = vmor %vm500_vm6, %vm535_vm3  ;;  %v1174_v47 = vand.u32 65535, %v1173_v7  ;;  %v542_v63 = vsel %vm3337_vm7, 1, %v4904_v11 }
 0x3e2   : > { %v541_v25 = vsel %vm535_vm3, 2.0, %v539_v21  ;;  %v780_v0 = vcvt.s32.f32 %v778_v54  ;;  %v658_v34 = vshll.u32 %v657_v13, 16  ;;  %vm631_vm11 = vcmp.gt.f32.partialorder %v3119_v14, %v540_v56 }
 0x3e3   : > { %v1176_v55 = vcvt.s32.f32 %v1174_v47  ;;  %vm632_vm12 = vcmp.gt.f32.partialorder %v3124_v15, %v541_v25  ;;  %v543_v10 = vsel %vm3342_vm9, 1, %v4904_v11  ;;  %vm797_vm7 = vcmp.eq.s32.totalorder %v3196_v28, 1  ;;  %v3406_v28 = vpop.xlane.xlu1 %918 }
 0x3e4   : > { %v785_v57 = vsel %vm784_vm8, %v780_v0, inf  ;;  %v671_v36 = vsel %vm632_vm12, %v3124_v15, %v541_v25 }
 0x3eb   : > { %v3408_v43 = vpop.xlane.xlu1 %1050 }
 0x3ed   : > { %1205 = vperm.xlu0 %2520, %v3274_v4  }
 0x3f5   : > { %2524 = vset.pattern.permute.xlu0 %v4904_v11 }
 0x417   : > { %654 = vmin.xlane.f32.xlu0 %v3231_v23 }
 0x41f   : > { %786 = vmin.xlane.f32.xlu0 %v785_v57 }
 0x44c   : > { %v1179_v49 = vpop.xlane.xlu0 %1178 }
 0x44d   : > { %vm1180_vm10 = vcmp.eq.f32.partialorder %v1177_v52, %v1179_v49  ;;  %v1185_v48 = vcvt.f32.s32 %v1179_v49 }
 0x44e   : > { %v1181_v59 = vsel %vm1180_vm10, %v1176_v55, inf }
 0x44f   : > { %1182 = vmin.xlane.f32.xlu1 %v1181_v59  ;;  %v1186_v60 = vshll.u32 %v1185_v48, 16 }
 0x45f   : > { %v3354_v4 = vpop.permute.xlu0 %1205 }
 0x468   : > { %1232 = vperm.xlu1 %2521, %v2851_v6   ;;  %v670_v6 = vsel %vm631_vm11, %v3119_v14, %v540_v56 }
 0x470   : > { %2523 = vset.pattern.permute.xlu1 %v4904_v11 }
 0x48a   : > { %v655_v23 = vpop.xlane.xlu0 %654 }
 0x48b   : > { %v656_v29 = vcvt.f32.s32 %v655_v23 }
 0x48d   : > { %v659_v45 = vadd.s32 %v658_v34, %v656_v29 }
 0x48f   : > { %vm660_vm14 = vcmp.eq.s32.totalorder %v3145_v27, %v659_v45  ;;  %vm661_vm15 = vcmp.eq.s32.totalorder %v3148_v22, %v659_v45 }
 0x490   : > { %vm666_vm0 = vmand %vm660_vm14, %vm665_vm13 }
 0x491   : > { %vm667_vm1 = vmand %vm661_vm15, %vm665_vm13  ;;  %v672_v44 = vsel %vm666_vm0, 2.0, %v670_v6 }
 0x492   : > { %v673_v32 = vsel %vm667_vm1, 2.0, %v671_v36  ;;  %v787_v18 = vpop.xlane.xlu0 %786  ;;  %vm3374_vm2 = vmor %vm631_vm11, %vm666_vm0  ;;  %vm763_vm4 = vcmp.gt.f32.partialorder %v3130_v3, %v672_v44 }
 0x493   : > { %v788_v7 = vcvt.f32.s32 %v787_v18  ;;  %vm3383_vm3 = vmor %vm632_vm12, %vm667_vm1  ;;  %v674_v51 = vsel %vm3374_vm2, 2, %v542_v63  ;;  %vm764_vm6 = vcmp.gt.f32.partialorder %v3132_v61, %v673_v32  ;;  %v802_v15 = vsel %vm763_vm4, %v3130_v3, %v672_v44 }
 0x494   : > { %v675_v14 = vsel %vm3383_vm3, 2, %v543_v10  ;;  %v803_v17 = vsel %vm764_vm6, %v3132_v61, %v673_v32  ;;  %v1207_v3 = vrot.slane %v3354_v4, 4 }
 0x495   : > { %v791_v52 = vadd.s32 %v790_v26, %v788_v7 }
 0x496   : > { %v1211_v61 = vmax.f32 %v3286_v39, %v1207_v3  ;;  %v1212_v21 = vmax.f32 %v3292_v5, %v1207_v3  ;;  %v1209_v25 = vmin.f32 %v3286_v39, %v1207_v3  ;;  %v1210_v54 = vmin.f32 %v3292_v5, %v1207_v3 }
 0x497   : > { %vm792_vm9 = vcmp.eq.s32.totalorder %v3145_v27, %v791_v52  ;;  %vm793_vm8 = vcmp.eq.s32.totalorder %v3148_v22, %v791_v52 }
 0x498   : > { %vm798_vm10 = vmand %vm792_vm9, %vm797_vm7  ;;  %v1215_v0 = vrot.slane %v1211_v61, 6  ;;  %v1216_v57 = vrot.slane %v1212_v21, 6 }
 0x499   : > { %vm799_vm11 = vmand %vm793_vm8, %vm797_vm7  ;;  %v3398_v24 = vsel %vm798_vm10, 2.0, %v802_v15 }
 0x49a   : > { %vm800_vm12 = vmor %vm763_vm4, %vm798_vm10  ;;  %v3400_v16 = vsel %vm799_vm11, 2.0, %v803_v17  ;;  %v1219_v47 = vsub.f32 %v1209_v25, %v1215_v0  ;;  %v1220_v55 = vsub.f32 %v1210_v54, %v1216_v57 }
 0x49b   : > { %vm801_vm13 = vmor %vm764_vm6, %vm799_vm11  ;;  %v3402_v2 = vsel %vm800_vm12, 3, %v674_v51 }
 0x49c   : > { %v3404_v46 = vsel %vm801_vm13, 3, %v675_v14  ;;  %v1221_v49 = vmax.f32 %v1219_v47, 0.0  ;;  %v1222_v59 = vmax.f32 %v1220_v55, 0.0 }
 0x49e   : > { %v1225_v13 = vrot.slane %v1221_v49, 1  ;;  %v1226_v23 = vrot.slane %v1222_v59, 1 }
 0x4a0   : > { %v1229_v34 = vmul.f32 %v1225_v13, %v1221_v49  ;;  %v1230_v29 = vmul.f32 %v1226_v23, %v1222_v59 }
 0x4a2   : > { %v1239_v37 = vrot.slane %v1229_v34, 4  ;;  %v1240_v6 = vrot.slane %v1230_v29, 4 }
 0x4c2   : > { %v1183_v38 = vpop.xlane.xlu1 %1182 }
 0x4c3   : > { %v1184_v56 = vcvt.f32.s32 %v1183_v38 }
 0x4c5   : > { %v3413_v33 = vadd.s32 %v1186_v60, %v1184_v56 }
 0x4da   : > { %v1233_v45 = vpop.permute.xlu1 %1232 }
 0x4db   : > { %v1235_v36 = vadd.f32 %v1233_v45, %v2898_v30  ;;  %v1236_v44 = vadd.f32 %v1233_v45, %v2900_v31 }
 0x4dd   : > { %v1243_v32 = vsub.f32 %v1235_v36, %v1239_v37  ;;  %v1244_v18 = vsub.f32 %v1236_v44, %v1240_v6 }
 0x4df   : > { %v1249_v63 = vrot.slane %v1243_v32, 4  ;;  %v1250_v50 = vrot.slane %v1244_v18, 4  ;;  %vm1245_vm7 = vcmp.gt.f32.partialorder %v1243_v32, 0.0  ;;  %vm1246_vm9 = vcmp.gt.f32.partialorder %v1244_v18, 0.0 }
 0x4e1   : > { %2575 = vrcp.f32 %v1249_v63  ;;  %v1264_v52 = vand.u32 2147483648, %v1249_v63  ;;  %v1262_v17 = vand.u32 2147483647, %v1249_v63  ;;  %v1279_v48 = vand.u32 2147483648, %v1250_v50 }
 0x4e2   : > { %2577 = vrcp.f32 %v1250_v50  ;;  %v1277_v31 = vand.u32 2147483647, %v1250_v50  ;;  %vm1258_vm0 = vweird.f32 %v1249_v63  ;;  %vm1273_vm2 = vweird.f32 %v1250_v50 }
 0x4e3   : > { %v1265_v38 = vor.u32 1.1754944e-38, %v1264_v52  ;;  %vm1263_vm3 = vcmp.eq.f32.partialorder %v1262_v17, 8.507059e+37  ;;  %v1280_v21 = vor.u32 1.1754944e-38, %v1279_v48  ;;  %v4911_v52 = vmov 3  }
 0x4e4   : > { %vm1278_vm6 = vcmp.eq.f32.partialorder %v1277_v31, 8.507059e+37  ;;  %v4913_v17 = vmov 5  }
 0x4e7   : > { %v2576_v26 = vpop.eup %2575 }
 0x4e8   : > { %v2578_v7 = vpop.eup %2577  ;;  %v1254_v10 = vmul.f32 %v2576_v26, %v1249_v63  ;;  %vm1259_vm14 = vweird.f32 %v2576_v26 }
 0x4e9   : > { %v1269_v1 = vmul.f32 %v2578_v7, %v1250_v50  ;;  %vm1274_vm15 = vweird.f32 %v2578_v7  ;;  %vm1260_vm1 = vmor %vm1258_vm0, %vm1259_vm14  ;;  %v3438_v50 = vld [vmem:[%s2843_s9 + $0x18] sm:$0xff] }
 0x4ea   : > { %v1255_v51 = vsub.f32 1.0, %v1254_v10  ;;  %vm1275_vm4 = vmor %vm1273_vm2, %vm1274_vm15  ;;  %v4909_v10 = vmov 1  }
 0x4eb   : > { %v1270_v14 = vsub.f32 1.0, %v1269_v1  ;;  %v258_v1 = vld [vmem:[%s2843_s9 + $0x28] sm:$0x1] }
 0x4ec   : > { %v1256_v15 = vmul.f32 %v2576_v26, %v1255_v51  ;;  %v255_v51 = vld [vmem:[%s2843_s9 + $0x10] sm:$0xff] }
 0x4ed   : > { %v1271_v30 = vmul.f32 %v2578_v7, %v1270_v14  ;;  %v4910_v14 = vmov 2  }
 0x4ee   : > { %v1257_v3 = vadd.f32 %v2576_v26, %v1256_v15  ;;  %v4912_v15 = vmov 4  }
 0x4ef   : > { %v1272_v60 = vadd.f32 %v2578_v7, %v1271_v30 }
 0x4f0   : > { %v1261_v61 = vsel %vm1260_vm1, %v2576_v26, %v1257_v3  ;;  %v3442_v26 = vld [vmem:[%s2843_s9 + $0x20] sm:$0xff] }
 0x4f1   : > { %v1266_v56 = vsel %vm1263_vm3, %v1265_v38, %v1261_v61  ;;  %v1276_v25 = vsel %vm1275_vm4, %v2578_v7, %v1272_v60  ;;  %v3446_v7 = vld [vmem:[%s2843_s9 + $0x8] sm:$0xff]  ;;  %v4914_v38 = vmov 6   ;;  %s2249_s9 = sshll.u32 %s235_s8, 4  ;;  %s4400_s9 = int_to_ptr.vmem [resolvable:$true] %s2249_s9 }
 0x4f2   : > { %v1267_v54 = vmul.f32 %v1266_v56, %v1229_v34  ;;  %v1281_v0 = vsel %vm1278_vm6, %v1280_v21, %v1276_v25  ;;  %v3429_v34 = vpop.permute.xlu2 %1191  ;;  %vm895_vm6 = vcmp.gt.f32.partialorder %v3203_v19, %v3398_v24 }
 0x4f3   : > { %v1282_v57 = vmul.f32 %v1281_v0, %v1230_v29 }
 0x4f4   : > { %v1285_v47 = vrot.slane %v1267_v54, 4 }
 0x4f5   : > { %v1286_v55 = vrot.slane %v1282_v57, 4 }
 0x4f6   : > { %v3419_v49 = vsel %vm1245_vm7, %v1285_v47, 0.0 }
 0x4f7   : > { %v3421_v59 = vsel %vm1246_vm9, %v1286_v55, 0.0  ;;  %v1293_v13 = vsel %vm371_vm5, %v3419_v49, -inf  ;;  %vm896_vm9 = vcmp.gt.f32.partialorder %v3205_v62, %v3400_v16 }
 0x4f8   : > { %v1294_v23 = vsel %vm371_vm5, %v3421_v59, -inf }
 0x4f9   : > { %v1295_v45 = vmax.f32 %v1293_v13, %v1294_v23 }
 0x4fb   : > { %1296 = vmax.xlane.f32.xlu2 %v1295_v45 }
 0x513   : > { %1323 = vperm.xlu2 %2522, %v2867_v9  }
 0x51b   : > { %2525 = vset.pattern.permute.xlu2 %v4904_v11 }
 0x51c   : > { %1361 = vperm.xlu2 %2525, %v3438_v50  }
 0x524   : > { %1366 = vperm.xlu2 %2525, %v3442_v26  }
 0x52c   : > { %2526 = vset.pattern.permute.xlu2 %v4909_v10 }
 0x52d   : > { %1396 = vperm.xlu2 %2526, %v3446_v7  }
 0x535   : > { %1404 = vperm.xlu2 %2526, %v3438_v50  }
 0x53d   : > { %1412 = vperm.xlu2 %2526, %v258_v1  }
 0x545   : > { %2530 = vset.pattern.permute.xlu2 %v4910_v14 }
 0x546   : > { %1445 = vperm.xlu2 %2530, %v3438_v50  }
 0x54e   : > { %1453 = vperm.xlu2 %2530, %v258_v1  }
 0x556   : > { %2534 = vset.pattern.permute.xlu2 %v4911_v52 }
 0x557   : > { %1486 = vperm.xlu2 %2534, %v3438_v50  }
 0x55f   : > { %1494 = vperm.xlu2 %2534, %v258_v1  }
 0x567   : > { %2537 = vset.pattern.permute.xlu2 %v4912_v15 }
 0x568   : > { %1527 = vperm.xlu2 %2537, %v3438_v50  }
 0x56e   : > { %v1297_v29 = vpop.xlane.xlu2 %1296 }
 0x56f   : > { %vm1298_vm8 = vcmp.eq.f32.partialorder %v3419_v49, %v1297_v29  ;;  %vm1299_vm10 = vcmp.eq.f32.partialorder %v3421_v59, %v1297_v29 }
 0x570   : > { %v1300_v37 = vsel %vm1298_vm8, %v3145_v27, 256  ;;  %v1301_v6 = vsel %vm1299_vm10, %v3148_v22, 256  ;;  %1535 = vperm.xlu2 %2537, %v258_v1  }
 0x571   : > { %v1302_v36 = vsel %vm371_vm5, %v1300_v37, 2147483647  ;;  %v1303_v44 = vsel %vm371_vm5, %v1301_v6, 2147483647 }
 0x572   : > { %vm1304_vm11 = vcmp.lt.s32.totalorder %v1302_v36, %v1303_v44 }
 0x573   : > { %v1305_v32 = vsel %vm1304_vm11, %v1302_v36, %v1303_v44  ;;  %vm1188_vm11 = vcmp.eq.s32.totalorder %v3145_v27, %v3413_v33 }
 0x574   : > { %v1307_v18 = vshra.s32 %v1305_v32, 16  ;;  %v1306_v48 = vand.u32 65535, %v1305_v32 }
 0x576   : > { %v1309_v63 = vcvt.s32.f32 %v1307_v18  ;;  %v1308_v31 = vcvt.s32.f32 %v1306_v48  ;;  %v1324_v60 = vpop.permute.xlu2 %1323  ;;  %v4938_v48 = vmov 0 }
 0x577   : > { %vm1325_vm12 = vcmp.eq.s32.totalorder %v1324_v60, 1  ;;  %v1053_v60 = vcvt.f32.s32 %v3277_v41 }
 0x578   : > { %1310 = vmin.xlane.f32.xlu1 %v1309_v63  ;;  %2539 = vset.pattern.permute.xlu2 %v4913_v17 }
 0x579   : > { %1568 = vperm.xlu2 %2539, %v3438_v50  }
 0x57e   : > { %v3492_v61 = vpop.permute.xlu2 %1361 }
 0x581   : > { %1576 = vperm.xlu2 %2539, %v258_v1  }
 0x586   : > { %v3497_v56 = vpop.permute.xlu2 %1366 }
 0x589   : > { %2542 = vset.pattern.permute.xlu2 %v2749_v58 }
 0x58a   : > { %1658 = vperm.xlu2 %2542, %v258_v1  }
 0x591   : > { %1351 = vperm.xlu1 %2523, %v3446_v7  }
 0x592   : > { %2543 = vset.pattern.permute.xlu2 %v4914_v38 }
 0x593   : > { %1609 = vperm.xlu2 %2543, %v3438_v50  }
 0x599   : > { %1371 = vperm.xlu1 %2523, %v258_v1  }
 0x59b   : > { %2545 = vset.pattern.permute.xlu2 %v2749_v58 }
 0x59c   : > { %1646 = vperm.xlu2 %2545, %v255_v51  }
 0x5a1   : > { %2527 = vset.pattern.permute.xlu1 %v4909_v10 }
 0x5a2   : > { %1400 = vperm.xlu1 %2527, %v255_v51  }
 0x5aa   : > { %1408 = vperm.xlu1 %2527, %v3442_v26  }
 0x5b2   : > { %2529 = vset.pattern.permute.xlu1 %v4910_v14 }
 0x5b3   : > { %1441 = vperm.xlu1 %2529, %v255_v51  }
 0x5bb   : > { %1449 = vperm.xlu1 %2529, %v3442_v26  }
 0x5c3   : > { %2533 = vset.pattern.permute.xlu1 %v4911_v52 }
 0x5c4   : > { %1482 = vperm.xlu1 %2533, %v255_v51  }
 0x5cc   : > { %1490 = vperm.xlu1 %2533, %v3442_v26  }
 0x5d4   : > { %2536 = vset.pattern.permute.xlu1 %v4912_v15 }
 0x5d5   : > { %1523 = vperm.xlu1 %2536, %v255_v51  }
 0x5dd   : > { %1531 = vperm.xlu1 %2536, %v3442_v26  }
 0x5e5   : > { %2538 = vset.pattern.permute.xlu1 %v4913_v17 }
 0x5e6   : > { %1564 = vperm.xlu1 %2538, %v255_v51  }
 0x5eb   : > { %v1311_v30 = vpop.xlane.xlu1 %1310 }
 0x5ec   : > { %vm1312_vm5 = vcmp.eq.f32.partialorder %v1309_v63, %v1311_v30  ;;  %v1317_v0 = vcvt.f32.s32 %v1311_v30 }
 0x5ed   : > { %v1313_v3 = vsel %vm1312_vm5, %v1308_v31, inf  ;;  %vm1189_vm5 = vcmp.eq.s32.totalorder %v3148_v22, %v3413_v33 }
 0x5ee   : > { %1314 = vmin.xlane.f32.xlu0 %v1313_v3  ;;  %1572 = vperm.xlu1 %2538, %v3442_v26   ;;  %v1318_v55 = vshll.u32 %v1317_v0, 16 }
 0x5f6   : > { %2541 = vset.pattern.permute.xlu1 %v4914_v38 }
 0x5f7   : > { %1617 = vperm.xlu1 %2541, %v258_v1   ;;  %v920_v1 = vcvt.f32.s32 %v3406_v28 }
 0x5ff   : > { %1605 = vperm.xlu1 %2541, %v255_v51  }
 0x602   : > { %1356 = vperm.xlu0 %2524, %v255_v51  }
 0x603   : > { %v3494_v21 = vpop.permute.xlu1 %1351 }
 0x607   : > { %2544 = vset.pattern.permute.xlu1 %v2749_v58 }
 0x608   : > { %1642 = vperm.xlu1 %2544, %v3446_v7  }
 0x60a   : > { %2528 = vset.pattern.permute.xlu0 %v4910_v14 }
 0x60b   : > { %1437 = vperm.xlu0 %2528, %v3446_v7   ;;  %v3499_v25 = vpop.permute.xlu1 %1371 }
 0x610   : > { %1654 = vperm.xlu1 %2544, %v3442_v26  }
 0x613   : > { %2531 = vset.pattern.permute.xlu0 %v4911_v52 }
 0x614   : > { %1478 = vperm.xlu0 %2531, %v3446_v7   ;;  %v3505_v54 = vpop.permute.xlu1 %1400 }
 0x61c   : > { %2532 = vset.pattern.permute.xlu0 %v4912_v15  ;;  %v3509_v13 = vpop.permute.xlu1 %1408 }
 0x61d   : > { %927 = vperm.xlu0 %2532, %v2867_v9   ;;  %4915 = vst [vmem:[#allocation14_spill] sm:$0xff] %v3509_v13 }
 0x625   : > { %1519 = vperm.xlu0 %2532, %v3446_v7   ;;  %v3523_v6 = vpop.permute.xlu1 %1441 }
 0x62d   : > { %2535 = vset.pattern.permute.xlu0 %v4913_v17  ;;  %v3529_v32 = vpop.permute.xlu1 %1449 }
 0x62e   : > { %1059 = vperm.xlu0 %2535, %v2867_v9   ;;  %v3503_v9 = vpop.permute.xlu2 %1396  ;;  %4920 = vst [vmem:[#allocation15_spill] sm:$0xff] %v3529_v32 }
 0x636   : > { %1560 = vperm.xlu0 %2535, %v3446_v7   ;;  %v3507_v57 = vpop.permute.xlu2 %1404 }
 0x63e   : > { %2540 = vset.pattern.permute.xlu0 %v4914_v38  ;;  %v3517_v29 = vpop.permute.xlu2 %1412 }
 0x63f   : > { %1601 = vperm.xlu0 %2540, %v3446_v7   ;;  %v921_v7 = vcvt.f32.s32 %v3270_v42 }
 0x641   : > { %v922_v51 = vshll.u32 %v921_v7, 16  ;;  %v1054_v7 = vshll.u32 %v1053_v60, 16 }
 0x643   : > { %v923_v52 = vadd.s32 %v922_v51, %v920_v1  ;;  %v934_v1 = vsel %vm895_vm6, %v3203_v19, %v3398_v24  ;;  %v3605_v19 = vmul.f32 0.1, %v3292_v5 }
 0x645   : > { %vm924_vm1 = vcmp.eq.s32.totalorder %v3145_v27, %v923_v52  ;;  %vm925_vm3 = vcmp.eq.s32.totalorder %v3148_v22, %v923_v52  ;;  %v3598_v52 = vmul.f32 0.1, %v3286_v39  ;;  %4932 = vst [vmem:[#allocation18_spill] sm:$0xff] %v3605_v19  ;;  %v3638_v42 = vperm.slane %v3605_v19, 3 }
 0x646   : > { %v3525_v36 = vpop.permute.xlu2 %1445 }
 0x647   : > { %1613 = vperm.xlu0 %2540, %v3442_v26   ;;  %4931 = vst [vmem:[#allocation17_spill] sm:$0xff] %v3598_v52  ;;  %v3624_v33 = vperm.slane %v3598_v52, 3 }
 0x64e   : > { %v3531_v18 = vpop.permute.xlu2 %1453 }
 0x64f   : > { %2546 = vset.pattern.permute.xlu0 %v2749_v58  ;;  %v4982_v58 = vmov 0 }
 0x650   : > { %1650 = vperm.xlu0 %2546, %v3438_v50   ;;  %v3535_v50 = vpop.permute.xlu1 %1482 }
 0x656   : > { %v3537_v26 = vpop.permute.xlu2 %1486 }
 0x658   : > { %v3543_v14 = vpop.permute.xlu1 %1490 }
 0x659   : > { %4921 = vst [vmem:[#allocation16_spill] sm:$0xff] %v3543_v14 }
 0x65e   : > { %v3545_v15 = vpop.permute.xlu2 %1494 }
 0x660   : > { %v3567_v30 = vpop.permute.xlu1 %1523 }
 0x661   : > { %v1315_v47 = vpop.xlane.xlu0 %1314 }
 0x662   : > { %v1316_v23 = vcvt.f32.s32 %v1315_v47  ;;  %v4930_v47 = vlaneseq }
 0x664   : > { %v1319_v45 = vadd.s32 %v1318_v55, %v1316_v23  ;;  %v3585_v55 = vshrl.u32 %v4930_v47, 7  ;;  %v1052_v23 = vcvt.f32.s32 %v3408_v43 }
 0x666   : > { %vm1320_vm13 = vcmp.eq.s32.totalorder %v3145_v27, %v1319_v45  ;;  %vm1321_vm14 = vcmp.eq.s32.totalorder %v3148_v22, %v1319_v45  ;;  %v3588_v45 = vpop.permute.xlu2 %1527  ;;  %v1055_v51 = vadd.s32 %v1054_v7, %v1052_v23  ;;  %v1804_v24 = vand.u32 1, %v3585_v55 }
 0x667   : > { %vm3513_vm15 = vmand %vm1320_vm13, %vm1325_vm12  ;;  %v4940_v7 = vmov 0 }
 0x668   : > { %vm3519_vm0 = vmand %vm1321_vm14, %vm1325_vm12  ;;  %vm1193_vm12 = vcmp.eq.s32.totalorder %v3429_v34, 1 }
 0x66e   : > { %v3640_v28 = vpop.permute.xlu2 %1535 }
 0x674   : > { %v3527_v44 = vpop.permute.xlu0 %1356 }
 0x67d   : > { %v3533_v63 = vpop.permute.xlu0 %1437 }
 0x686   : > { %v3540_v10 = vpop.permute.xlu0 %1478 }
 0x68f   : > { %v928_v17 = vpop.permute.xlu0 %927 }
 0x690   : > { %vm929_vm2 = vcmp.eq.s32.totalorder %v928_v17, 1  ;;  %v3621_v17 = vperm.slane %v3598_v52, 2 }
 0x691   : > { %vm3549_vm4 = vmand %vm924_vm1, %vm929_vm2  ;;  %vm1056_vm1 = vcmp.eq.s32.totalorder %v3145_v27, %v1055_v51  ;;  %v3635_v27 = vperm.slane %v3605_v19, 2 }
 0x692   : > { %vm3555_vm7 = vmand %vm925_vm3, %vm929_vm2  ;;  %v936_v41 = vsel %vm3549_vm4, 2.0, %v934_v1 }
 0x693   : > { %vm3563_vm8 = vmor %vm895_vm6, %vm3549_vm4  ;;  %vm1027_vm13 = vcmp.gt.f32.partialorder %v3251_v20, %v936_v41  ;;  %vm3630_vm6 = vcmp.eq.s32.totalorder %v1804_v24, 0  ;;  %v5051_v24 = vlaneseq }
 0x694   : > { %vm3571_vm10 = vmor %vm896_vm9, %vm3555_vm7  ;;  %v938_v3 = vsel %vm3563_vm8, 4, %v3402_v2  ;;  %v1796_v2 = vadd.s32 8, %v3585_v55  ;;  %v4939_v48 = vsel %vm3630_vm6, 4294967295, %v4938_v48  ;;  %v1066_v31 = vsel %vm1027_vm13, %v3251_v20, %v936_v41 }
 0x695   : > { %v939_v38 = vsel %vm3571_vm10, 4, %v3404_v46  ;;  %v935_v46 = vsel %vm896_vm9, %v3205_v62, %v3400_v16  ;;  %v3610_v62 = vpop.permute.xlu1 %1531  ;;  %vm3616_vm2 = vmand %vm1188_vm11, %vm1193_vm12  ;;  %v1884_v20 = vsel %vm3630_vm6, %v3635_v27, %v3638_v42 }
 0x696   : > { %v937_v43 = vsel %vm3555_vm7, 2.0, %v935_v46  ;;  %4933 = vst [vmem:[#allocation19_spill] sm:$0xff] %v3610_v62  ;;  %v1811_v39 = vand.u32 1, %v1796_v2  ;;  %vm3626_vm3 = vmand %vm1189_vm5, %vm1193_vm12  ;;  %vm1057_vm7 = vcmp.eq.s32.totalorder %v3148_v22, %v1055_v51  ;;  %v1883_v22 = vsel %vm3630_vm6, %v3621_v17, %v3624_v33 }
 0x697   : > { %v3582_v0 = vpop.permute.xlu0 %1519  ;;  %vm1028_vm14 = vcmp.gt.f32.partialorder %v3253_v35, %v937_v43  ;;  %v3706_v34 = vrot.slane %v1883_v22, 4  ;;  %v3729_v22 = vpop.permute.xlu2 %1568 }
 0x698   : > { %v1067_v60 = vsel %vm1028_vm14, %v3253_v35, %v937_v43  ;;  %vm3649_vm10 = vcmp.eq.s32.totalorder %v1811_v39, 0 }
 0x699   : > { %v4941_v7 = vsel %vm3649_vm10, 4294967295, %v4940_v7  ;;  %v4989_v14 = vsel %vm3649_vm10, %v3635_v27, %v3638_v42  ;;  %2579 = vrcp.f32 %v3706_v34 }
 0x69d   : > { %v3696_v39 = vpop.permute.xlu1 %1564 }
 0x69f   : > { %v1577_v19 = vpop.permute.xlu2 %1576 }
 0x6a0   : > { %v1060_v5 = vpop.permute.xlu0 %1059 }
 0x6a1   : > { %vm1061_vm4 = vcmp.eq.s32.totalorder %v1060_v5, 1 }
 0x6a2   : > { %vm1062_vm9 = vmand %vm1056_vm1, %vm1061_vm4 }
 0x6a3   : > { %vm1063_vm8 = vmand %vm1057_vm7, %vm1061_vm4  ;;  %v1068_v23 = vsel %vm1062_vm9, 2.0, %v1066_v31 }
 0x6a4   : > { %vm1064_vm11 = vmor %vm1027_vm13, %vm1062_vm9  ;;  %v1069_v1 = vsel %vm1063_vm8, 2.0, %v1067_v60  ;;  %vm1159_vm5 = vcmp.gt.f32.partialorder %v3301_v53, %v1068_v23 }
 0x6a5   : > { %vm1065_vm12 = vmor %vm1028_vm14, %vm1063_vm8  ;;  %v1070_v2 = vsel %vm1064_vm11, 5, %v938_v3  ;;  %vm1160_vm1 = vcmp.gt.f32.partialorder %v3303_v8, %v1069_v1  ;;  %v1198_v51 = vsel %vm1159_vm5, %v3301_v53, %v1068_v23 }
 0x6a6   : > { %v1071_v46 = vsel %vm1065_vm12, 5, %v939_v38  ;;  %vm3670_vm13 = vmor %vm1159_vm5, %vm3616_vm2  ;;  %v1199_v35 = vsel %vm1160_vm1, %v3303_v8, %v1069_v1  ;;  %v1200_v3 = vsel %vm3616_vm2, 2.0, %v1198_v51  ;;  %v3718_v1 = vrot.slane %v1884_v20, 4 }
 0x6a7   : > { %vm3683_vm14 = vmor %vm1160_vm1, %vm3626_vm3  ;;  %v1201_v43 = vsel %vm3626_vm3, 2.0, %v1199_v35  ;;  %v1202_v8 = vsel %vm3670_vm13, 6, %v1070_v2  ;;  %vm1291_vm4 = vcmp.gt.f32.partialorder %v3419_v49, %v1200_v3 }
 0x6a8   : > { %v1203_v16 = vsel %vm3683_vm14, 6, %v1071_v46  ;;  %vm1292_vm2 = vcmp.gt.f32.partialorder %v3421_v59, %v1201_v43  ;;  %vm1328_vm3 = vmor %vm1291_vm4, %vm3513_vm15  ;;  %v3704_v5 = vsel %vm1291_vm4, %v3419_v49, %v1200_v3  ;;  %2581 = vrcp.f32 %v3718_v1 }
 0x6a9   : > { %vm1329_vm7 = vmor %vm1292_vm2, %vm3519_vm0  ;;  %v3710_v31 = vsel %vm1328_vm3, 7, %v1202_v8  ;;  %v3713_v60 = vsel %vm1292_vm2, %v3421_v59, %v1201_v43  ;;  %v1798_v43 = vadd.s32 24, %v3585_v55 }
 0x6aa   : > { %v3720_v2 = vsel %vm1329_vm7, 7, %v1203_v16  ;;  %vm1340_vm9 = vcmp.eq.s32.totalorder %v3710_v31, 0  ;;  %vm1386_vm8 = vcmp.eq.s32.totalorder %v3710_v31, 1  ;;  %vm1427_vm11 = vcmp.eq.s32.totalorder %v3710_v31, 2 }
 0x6ab   : > { %vm1341_vm5 = vcmp.eq.s32.totalorder %v3720_v2, 0  ;;  %v1342_v49 = vsel %vm1340_vm9, 1, %v4904_v11  ;;  %vm1387_vm12 = vcmp.eq.s32.totalorder %v3720_v2, 1  ;;  %v1388_v59 = vsel %vm1386_vm8, 1, %v4904_v11 }
 0x6ac   : > { %v1343_v51 = vsel %vm1341_vm5, 1, %v4904_v11  ;;  %v1344_v20 = vperm.slane %v1342_v49, 2  ;;  %v1389_v46 = vsel %vm1387_vm12, 1, %v4904_v11  ;;  %v1390_v41 = vperm.slane %v1388_v59, 2 }
 0x6ad   : > { %v1345_v35 = vperm.slane %v1343_v51, 2  ;;  %v1391_v3 = vperm.slane %v1389_v46, 2  ;;  %vm1428_vm1 = vcmp.eq.s32.totalorder %v3720_v2, 2  ;;  %v1429_v38 = vsel %vm1427_vm11, 1, %v4904_v11 }
 0x6ae   : > { %vm3735_vm13 = vcmp.eq.s32.totalorder %v1344_v20, 1  ;;  %vm3739_vm14 = vcmp.eq.s32.totalorder %v1390_v41, 1  ;;  %v1430_v16 = vsel %vm1428_vm1, 1, %v4904_v11  ;;  %v1431_v49 = vperm.slane %v1429_v38, 2 }
 0x6af   : > { %vm3744_vm4 = vcmp.eq.s32.totalorder %v1345_v35, 1  ;;  %v1384_v59 = vsel %vm3735_vm13, %v3499_v25, 0.0  ;;  %vm3751_vm2 = vcmp.eq.s32.totalorder %v1391_v3, 1  ;;  %v4952_v51 = vmov 0 }
 0x6b0   : > { %v4953_v51 = vsel %vm3751_vm2, 4294967295, %v4952_v51  ;;  %v1432_v20 = vperm.slane %v1430_v16, 2  ;;  %v1385_v46 = vsel %vm3744_vm4, %v3499_v25, 0.0  ;;  %v1425_v41 = vsel %vm3739_vm14, %v3517_v29, %v1384_v59  ;;  %v3777_v16 = vpop.permute.xlu1 %1572 }
 0x6b1   : > { %4954 = vst [vmem:[#allocation20_spill] sm:$0xff] %v4953_v51  ;;  %vm3761_vm3 = vcmp.eq.s32.totalorder %v1431_v49, 1  ;;  %v4955_v35 = vmov 0  ;;  %vm1468_vm7 = vcmp.eq.s32.totalorder %v3710_v31, 3  ;;  %v1426_v3 = vsel %vm3751_vm2, %v3517_v29, %v1385_v46  ;;  %v5021_v51 = vld [vmem:[#allocation9_spill] sm:$0xff] }
 0x6b2   : > { %v4956_v35 = vsel %vm3761_vm3, 4294967295, %v4955_v35  ;;  %vm3769_vm9 = vcmp.eq.s32.totalorder %v1432_v20, 1  ;;  %v1466_v25 = vsel %vm3761_vm3, %v3531_v18, %v1425_v41  ;;  %vm1469_vm8 = vcmp.eq.s32.totalorder %v3720_v2, 3  ;;  %4960 = vst [vmem:[#allocation22_spill] sm:$0xff] %v3777_v16 }
 0x6b3   : > { %4957 = vst [vmem:[#allocation21_spill] sm:$0xff] %v4956_v35  ;;  %v1467_v49 = vsel %vm3769_vm9, %v3531_v18, %v1426_v3  ;;  %v1470_v59 = vsel %vm1468_vm7, 1, %v4904_v11  ;;  %v1471_v29 = vsel %vm1469_vm8, 1, %v4904_v11  ;;  %vm1509_vm11 = vcmp.eq.s32.totalorder %v3710_v31, 4 }
 0x6b4   : > { %v1472_v20 = vperm.slane %v1470_v59, 2  ;;  %v1473_v46 = vperm.slane %v1471_v29, 2  ;;  %vm1510_vm5 = vcmp.eq.s32.totalorder %v3720_v2, 4  ;;  %v1511_v41 = vsel %vm1509_vm11, 1, %v4904_v11 }
 0x6b5   : > { %v1512_v53 = vsel %vm1510_vm5, 1, %v4904_v11  ;;  %v1513_v23 = vperm.slane %v1511_v41, 2  ;;  %vm1550_vm12 = vcmp.eq.s32.totalorder %v3710_v31, 5  ;;  %vm1551_vm1 = vcmp.eq.s32.totalorder %v3720_v2, 5 }
 0x6b6   : > { %vm3790_vm6 = vcmp.eq.s32.totalorder %v1472_v20, 1  ;;  %v4961_v18 = vmov 0  ;;  %vm3794_vm7 = vcmp.eq.s32.totalorder %v1473_v46, 1  ;;  %v4963_v3 = vmov 0 }
 0x6b7   : > { %v4962_v18 = vsel %vm3790_vm6, 4294967295, %v4961_v18  ;;  %v4964_v3 = vsel %vm3794_vm7, 4294967295, %v4963_v3  ;;  %v1514_v59 = vperm.slane %v1512_v53, 2  ;;  %v1552_v29 = vsel %vm1550_vm12, 1, %v4904_v11 }
 0x6b8   : > { %v1507_v41 = vsel %vm3790_vm6, %v3545_v15, %v1466_v25  ;;  %v1508_v52 = vsel %vm3794_vm7, %v3545_v15, %v1467_v49  ;;  %vm3805_vm8 = vcmp.eq.s32.totalorder %v1513_v23, 1  ;;  %v4965_v20 = vmov 0 }
 0x6b9   : > { %v4966_v20 = vsel %vm3805_vm8, 4294967295, %v4965_v20  ;;  %v1553_v46 = vsel %vm1551_vm1, 1, %v4904_v11  ;;  %vm3810_vm11 = vcmp.eq.s32.totalorder %v1514_v59, 1  ;;  %v4967_v16 = vmov 0 }
 0x6ba   : > { %v4968_v16 = vsel %vm3810_vm11, 4294967295, %v4967_v16  ;;  %v1548_v53 = vsel %vm3805_vm8, %v3640_v28, %v1507_v41  ;;  %v1554_v62 = vperm.slane %v1552_v29, 2  ;;  %v1555_v25 = vperm.slane %v1553_v46, 2 }
 0x6bb   : > { %v1549_v15 = vsel %vm3810_vm11, %v3640_v28, %v1508_v52  ;;  %vm1591_vm5 = vcmp.eq.s32.totalorder %v3710_v31, 6  ;;  %vm1592_vm12 = vcmp.eq.s32.totalorder %v3720_v2, 6  ;;  %v1333_v23 = vsel %vm3519_vm0, 2.0, %v3713_v60 }
 0x6bc   : > { %vm3825_vm1 = vcmp.eq.s32.totalorder %v1554_v62, 1  ;;  %v4969_v49 = vmov 0  ;;  %vm3829_vm7 = vcmp.eq.s32.totalorder %v1555_v25, 1  ;;  %v4971_v59 = vmov 0 }
 0x6bd   : > { %v4970_v49 = vsel %vm3825_vm1, 4294967295, %v4969_v49  ;;  %v4972_v59 = vsel %vm3829_vm7, 4294967295, %v4971_v59  ;;  %v1593_v29 = vsel %vm1591_vm5, 1, %v4904_v11  ;;  %v1594_v52 = vsel %vm1592_vm12, 1, %v4904_v11 }
 0x6be   : > { %v1589_v28 = vsel %vm3825_vm1, %v1577_v19, %v1548_v53  ;;  %v1590_v41 = vsel %vm3829_vm7, %v1577_v19, %v1549_v15  ;;  %v1595_v37 = vperm.slane %v1593_v29, 2  ;;  %v1596_v60 = vperm.slane %v1594_v52, 2  ;;  %v1618_v53 = vpop.permute.xlu1 %1617 }
 0x6bf   : > { %v4973_v62 = vsel %vm3513_vm15, 2.0, %v3704_v5  ;;  %v4974_v46 = vmov 0  ;;  %vm3847_vm11 = vcmp.lt.f32.partialorder %v1333_v23, 0.35  ;;  %v4977_v25 = vmov 0 }
 0x6c0   : > { %vm3843_vm0 = vcmp.lt.f32.partialorder %v4973_v62, 0.35  ;;  %v4978_v25 = vsel %vm3847_vm11, 4294967295, %v4977_v25  ;;  %vm1632_vm5 = vcmp.eq.s32.totalorder %v3710_v31, 7  ;;  %vm1633_vm12 = vcmp.eq.s32.totalorder %v3720_v2, 7 }
 0x6c1   : > { %v4975_v46 = vsel %vm3843_vm0, 4294967295, %v4974_v46  ;;  %4979 = vst [vmem:[#allocation24_spill] sm:$0xff] %v4978_v25  ;;  %vm3853_vm7 = vcmp.eq.s32.totalorder %v1595_v37, 1  ;;  %vm3857_vm1 = vcmp.eq.s32.totalorder %v1596_v60, 1  ;;  %v2750_v5 = vmov 1.0  }
 0x6c2   : > { %4976 = vst [vmem:[#allocation23_spill] sm:$0xff] %v4975_v46  ;;  %v4983_v58 = vsel %vm3857_vm1, 4294967295, %v4982_v58  ;;  %v1338_v15 = vsel %vm3843_vm0, 0.0, %v2750_v5  ;;  %v1339_v23 = vsel %vm3847_vm11, 0.0, %v2750_v5  ;;  %v1630_v31 = vsel %vm3853_vm7, %v1618_v53, %v1589_v28 }
 0x6c3   : > { %v1631_v2 = vsel %vm3857_vm1, %v1618_v53, %v1590_v41  ;;  %v1634_v29 = vsel %vm1632_vm5, 1, %v4904_v11  ;;  %v1635_v52 = vsel %vm1633_vm12, 1, %v4904_v11  ;;  %2186 = vst [vmem:[#allocation1] sm:$0xff] %v1338_v15  ;;  %v1376_v62 = vsel %vm3735_vm13, %v3494_v21, 0.0 }
 0x6c4   : > { %v1636_v37 = vperm.slane %v1634_v29, 2  ;;  %v1637_v60 = vperm.slane %v1635_v52, 2  ;;  %2187 = vst [vmem:[#allocation1 + $0x9] sm:$0xff] %v1339_v23  ;;  %v4984_v28 = vsel %vm3649_vm10, %v3621_v17, %v3624_v33  ;;  %v1377_v41 = vsel %vm3744_vm4, %v3494_v21, 0.0  ;;  %v1659_v52 = vpop.permute.xlu2 %1658 }
 0x6c5   : > { %v3879_v5 = vrot.slane %v4984_v28, 4  ;;  %v1417_v53 = vsel %vm3739_vm14, %v3503_v9, %v1376_v62  ;;  %v1378_v15 = vsel %vm3735_vm13, %v3527_v44, 0.0  ;;  %v4985_v23 = vmov 0  ;;  %v1561_v28 = vpop.permute.xlu0 %1560 }
 0x6c6   : > { %vm3890_vm5 = vcmp.eq.s32.totalorder %v1636_v37, 1  ;;  %vm3894_vm12 = vcmp.eq.s32.totalorder %v1637_v60, 1  ;;  %v4987_v29 = vmov 0  ;;  %v1418_v21 = vsel %vm3751_vm2, %v3503_v9, %v1377_v41 }
 0x6c7   : > { %v4986_v23 = vsel %vm3890_vm5, 4294967295, %v4985_v23  ;;  %v4988_v29 = vsel %vm3894_vm12, 4294967295, %v4987_v29  ;;  %v1458_v62 = vsel %vm3761_vm3, %v3533_v63, %v1417_v53  ;;  %v1671_v37 = vsel %vm3890_vm5, %v1659_v52, %v1630_v31 }
 0x6c8   : > { %v1672_v11 = vsel %vm3894_vm12, %v1659_v52, %v1631_v2  ;;  %v1459_v60 = vsel %vm3769_vm9, %v3533_v63, %v1418_v21  ;;  %v3916_v9 = vrot.slane %v4989_v14, 4  ;;  %v1675_v41 = vrot.slane %v1671_v37, 6 }
 0x6c9   : > { %v1676_v32 = vrot.slane %v1672_v11, 6  ;;  %v1499_v31 = vsel %vm3790_vm6, %v3540_v10, %v1458_v62  ;;  %vm4990_vm15 = vnez %v4964_v3  ;;  %vm4991_vm12 = vnez %v4968_v16 }
 0x6ca   : > { %v1500_v2 = vsel %vm4990_vm15, %v3540_v10, %v1459_v60  ;;  %v1540_v63 = vsel %vm3805_vm8, %v3582_v0, %v1499_v31  ;;  %v1379_v11 = vsel %vm3744_vm4, %v3527_v44, 0.0  ;;  %v1419_v14 = vsel %vm3739_vm14, %v3505_v54, %v1378_v15 }
 0x6cb   : > { %v1541_v53 = vsel %vm4991_vm12, %v3582_v0, %v1500_v2  ;;  %v1679_v52 = vsel %vm3843_vm0, 0.0, %v1675_v41  ;;  %v1680_v10 = vsel %vm3847_vm11, 0.0, %v1676_v32  ;;  %vm4992_vm5 = vnez %v4970_v49 }
 0x6cc   : > { %v3942_v21 = vsel %vm4992_vm5, %v1561_v28, %v1540_v63  ;;  %vm4993_vm10 = vnez %v4972_v59  ;;  %v2435_v62 = vceil.f32 %v1679_v52  ;;  %v2436_v44 = vfloor.f32 %v1679_v52 }
 0x6cd   : > { %v3946_v0 = vsel %vm4993_vm10, %v1561_v28, %v1541_v53  ;;  %vm4994_vm1 = vcmask 1043456   ;;  %vm2434_vm0 = vcmp.lt.s32.totalorder %v1679_v52, 0  ;;  %v1420_v32 = vsel %vm3751_vm2, %v3505_v54, %v1379_v11 }
 0x6ce   : > { %v3951_v15 = vsel %vm4994_vm1, %v3706_v34, %v3879_v5  ;;  %v1460_v37 = vsel %vm3761_vm3, %v3523_v6, %v1419_v14  ;;  %v1461_v28 = vsel %vm3769_vm9, %v3523_v6, %v1420_v32  ;;  %v1380_v41 = vsel %vm3735_vm13, %v3492_v61, 0.0  ;;  %v3978_v6 = vpop.permute.xlu1 %1605  ;;  %v4006_v32 = vpop.permute.xlu0 %1601 }
 0x6cf   : > { %v1501_v60 = vsel %vm3790_vm6, %v3535_v50, %v1460_v37  ;;  %v2440_v54 = vceil.f32 %v1680_v10  ;;  %v2441_v31 = vfloor.f32 %v1680_v10  ;;  %v1502_v2 = vsel %vm4990_vm15, %v3535_v50, %v1461_v28 }
 0x6d0   : > { %v1542_v63 = vsel %vm3805_vm8, %v3567_v30, %v1501_v60  ;;  %v3976_v53 = vsel %vm2434_vm0, %v2435_v62, %v2436_v44  ;;  %v1543_v11 = vsel %vm4991_vm12, %v3567_v30, %v1502_v2  ;;  %v1381_v50 = vsel %vm3744_vm4, %v3492_v61, 0.0  ;;  %v4008_v61 = vpop.eup %2579 }
 0x6d1   : > { %v3986_v14 = vsel %vm4992_vm5, %v3696_v39, %v1542_v63  ;;  %v3994_v52 = vsel %vm4993_vm10, %v3696_v39, %v1543_v11  ;;  %v1421_v30 = vsel %vm3739_vm14, %v3507_v57, %v1380_v41  ;;  %v1422_v44 = vsel %vm3751_vm2, %v3507_v57, %v1381_v50  ;;  %v4024_v60 = vpop.eup %2581  ;;  %v4039_v63 = vld [vmem:[%s4805_s1] sm:$0xff] }
 0x6d2   : > { %vm4995_vm1 = vnez %v4983_v58  ;;  %v1462_v37 = vsel %vm3761_vm3, %v3525_v36, %v1421_v30  ;;  %v1463_v28 = vsel %vm3769_vm9, %v3525_v36, %v1422_v44  ;;  %4996 = vst [vmem:[#allocation25_spill] sm:$0xff] %v4039_v63  ;;  %v4042_v11 = vperm.slane %v4039_v63, 0  ;;  %v4053_v30 = vld [vmem:[%s4805_s1 + $0x8] sm:$0xff] }
 0x6d3   : > { %v1503_v41 = vsel %vm3790_vm6, %v3537_v26, %v1462_v37  ;;  %v1504_v2 = vsel %vm4990_vm15, %v3537_v26, %v1463_v28  ;;  %4997 = vst [vmem:[#allocation26_spill] sm:$0xff] %v4053_v30  ;;  %v4056_v44 = vperm.slane %v4053_v30, 0  ;;  %v4059_v37 = vperm.slane %v4039_v63, 1 }
 0x6d4   : > { %v1544_v50 = vsel %vm3805_vm8, %v3588_v45, %v1503_v41  ;;  %v1545_v26 = vsel %vm4991_vm12, %v3588_v45, %v1504_v2  ;;  %v4071_v41 = vpop.permute.xlu2 %1609  ;;  %v4074_v2 = vperm.slane %v4053_v30, 1  ;;  %v1981_v39 = vmul.f32 %v4008_v61, %v3706_v34 }
 0x6d5   : > { %v4064_v28 = vsel %vm4992_vm5, %v3729_v22, %v1544_v50  ;;  %v4069_v45 = vsel %vm4993_vm10, %v3729_v22, %v1545_v26  ;;  %5000 = vst [vmem:[#allocation29_spill] sm:$0xff] %v4071_v41  ;;  %vm5001_vm0 = vnez %v4939_v48  ;;  %vm5002_vm11 = vnez %v4941_v7 }
 0x6d6   : > { %4998 = vst [vmem:[#allocation27_spill] sm:$0xff] %v4064_v28  ;;  %v1869_v22 = vsel %vm5001_vm0, %v4042_v11, %v4059_v37  ;;  %v1871_v26 = vsel %vm5002_vm11, %v4042_v11, %v4059_v37  ;;  %v1870_v62 = vsel %vm5001_vm0, %v4056_v44, %v4074_v2  ;;  %v1872_v50 = vsel %vm5002_vm11, %v4056_v44, %v4074_v2  ;;  %v1643_v47 = vpop.permute.xlu1 %1642 }
 0x6d7   : > { %4999 = vst [vmem:[#allocation28_spill] sm:$0xff] %v4069_v45  ;;  %vm5003_vm10 = vcmask 1043456   ;;  %vm5004_vm5 = vcmp.lt.s32.totalorder %v1680_v10, 0  ;;  %v4111_v25 = vrot.slane %v1869_v22, 4  ;;  %v1982_v36 = vsub.f32 1.0, %v1981_v39 }
 0x6d8   : > { %v4106_v57 = vsel %vm5003_vm10, %v3718_v1, %v3916_v9  ;;  %v4109_v46 = vsel %vm5004_vm5, %v2440_v54, %v2441_v31  ;;  %vm1985_vm12 = vweird.f32 %v3706_v34  ;;  %v4114_v48 = vrot.slane %v1871_v26, 4 }
 0x6d9   : > { %vm1986_vm0 = vweird.f32 %v4008_v61  ;;  %v1989_v7 = vand.u32 2147483647, %v3706_v34  ;;  %v1991_v30 = vand.u32 2147483648, %v3706_v34  ;;  %v4119_v63 = vrot.slane %v1870_v62, 4 }
 0x6da   : > { %v4121_v45 = vrot.slane %v1872_v50, 4  ;;  %v1983_v10 = vmul.f32 %v4008_v61, %v1982_v36  ;;  %v1996_v54 = vmul.f32 %v4024_v60, %v3718_v1  ;;  %vm4126_vm10 = vmor %vm1985_vm12, %vm1986_vm0  ;;  %vm2001_vm5 = vweird.f32 %v4024_v60 }
 0x6db   : > { %v1992_v39 = vor.u32 1.1754944e-38, %v1991_v30  ;;  %v2004_v34 = vand.u32 2147483647, %v3718_v1  ;;  %v2006_v22 = vand.u32 2147483648, %v3718_v1  ;;  %2583 = vrcp.f32 %v3951_v15 }
 0x6dc   : > { %v1984_v62 = vadd.f32 %v4008_v61, %v1983_v10  ;;  %v1997_v50 = vsub.f32 1.0, %v1996_v54  ;;  %vm1990_vm12 = vcmp.eq.f32.partialorder %v1989_v7, 8.507059e+37  ;;  %v2019_v26 = vand.u32 2147483647, %v3951_v15 }
 0x6dd   : > { %v2021_v30 = vand.u32 2147483648, %v3951_v15  ;;  %vm5007_vm0 = vcmask 1043456   ;;  %2585 = vrcp.f32 %v4106_v57  ;;  %vm5009_vm8 = vweird.f32 %v3718_v1 }
 0x6de   : > { %v4142_v28 = vsel %vm5007_vm0, %v4111_v25, %v4114_v48  ;;  %v1988_v10 = vsel %vm4126_vm10, %v4008_v61, %v1984_v62  ;;  %v1998_v54 = vmul.f32 %v4024_v60, %v1997_v50  ;;  %vm5008_vm11 = vmmov %vm5007_vm0  ;;  %vm4162_vm0 = vcmp.eq.f32.partialorder %v2004_v34, 8.507059e+37 }
 0x6df   : > { %v4152_v7 = vsel %vm5008_vm11, %v4119_v63, %v4121_v45  ;;  %vm4158_vm15 = vmor %vm5009_vm8, %vm2001_vm5  ;;  %v2007_v61 = vor.u32 1.1754944e-38, %v2006_v22  ;;  %v1993_v62 = vsel %vm1990_vm12, %v1992_v39, %v1988_v10  ;;  %v2022_v41 = vor.u32 1.1754944e-38, %v2021_v30 }
 0x6e0   : > { %v1999_v50 = vadd.f32 %v4024_v60, %v1998_v54  ;;  %v1374_v1 = vsel %vm3735_vm13, %v2883_v12, 0.0  ;;  %vm4171_vm8 = vcmp.eq.f32.partialorder %v2019_v26, 8.507059e+37  ;;  %v1375_v34 = vsel %vm3744_vm4, %v2883_v12, 0.0 }
 0x6e1   : > { %v1415_v39 = vsel %vm3739_vm14, %v2914_v40, %v1374_v1  ;;  %v5016_v22 = vsel %vm3853_vm7, %v4006_v32, %v3942_v21  ;;  %vm5017_vm11 = vnez %v4986_v23  ;;  %v5018_v26 = vsel %vm4995_vm1, %v4006_v32, %v3946_v0  ;;  %v2584_v10 = vpop.eup %2583 }
 0x6e2   : > { %v1663_v30 = vsel %vm5017_vm11, %v1643_v47, %v5016_v22  ;;  %vm5019_vm5 = vnez %v4988_v29  ;;  %v2003_v54 = vsel %vm4158_vm15, %v4024_v60, %v1999_v50  ;;  %v2034_v21 = vand.u32 2147483647, %v4106_v57  ;;  %v5020_v22 = vld [vmem:[#allocation10_spill] sm:$0xff]  ;;  %v1647_v60 = vpop.permute.xlu2 %1646 }
 0x6e3   : > { %v4195_v12 = vsel %vm5019_vm5, %v1643_v47, %v5018_v26  ;;  %v1416_v1 = vsel %vm3751_vm2, %v2914_v40, %v1375_v34  ;;  %v2008_v0 = vsel %vm4162_vm0, %v2007_v61, %v2003_v54  ;;  %v2011_v32 = vmul.f32 %v2584_v10, %v3951_v15  ;;  %v2586_v50 = vpop.eup %2585  ;;  %v5023_v54 = vld [vmem:[#allocation11_spill] sm:$0xff] }
 0x6e4   : > { %v2036_v47 = vand.u32 2147483648, %v4106_v57  ;;  %v1456_v36 = vsel %vm3761_vm3, %v5020_v22, %v1415_v39  ;;  %v1457_v26 = vsel %vm3769_vm9, %v5020_v22, %v1416_v1  ;;  %v1934_v31 = vsub.f32 %v1663_v30, %v4142_v28 }
 0x6e5   : > { %v1497_v40 = vsel %vm3790_vm6, %v5021_v51, %v1456_v36  ;;  %v2012_v61 = vsub.f32 1.0, %v2011_v32  ;;  %v2026_v34 = vmul.f32 %v2586_v50, %v4106_v57  ;;  %vm5022_vm12 = vnez %v4964_v3  ;;  %v5027_v36 = vld [vmem:[#allocation12_spill] sm:$0xff] }
 0x6e6   : > { %v1498_v39 = vsel %vm5022_vm12, %v5021_v51, %v1457_v26  ;;  %vm5024_vm10 = vnez %v4966_v20  ;;  %vm5025_vm15 = vnez %v4968_v16  ;;  %v1797_v22 = vadd.s32 16, %v3585_v55 }
 0x6e7   : > { %v1538_v35 = vsel %vm5024_vm10, %v5023_v54, %v1497_v40  ;;  %v1539_v1 = vsel %vm5025_vm15, %v5023_v54, %v1498_v39  ;;  %v5026_v28 = vsel %vm3853_vm7, %v3978_v6, %v3986_v14  ;;  %v2013_v51 = vmul.f32 %v2584_v10, %v2012_v61  ;;  %v5034_v39 = vld [vmem:[#allocation13_spill] sm:$0xff] }
 0x6e8   : > { %v4237_v30 = vsel %vm5017_vm11, %v1647_v60, %v5026_v28  ;;  %v2027_v32 = vsub.f32 1.0, %v2026_v34  ;;  %vm5028_vm0 = vnez %v4970_v49  ;;  %vm5029_vm15 = vnez %v4972_v59 }
 0x6e9   : > { %v1579_v26 = vsel %vm5028_vm0, %v5027_v36, %v1538_v35  ;;  %v1580_v40 = vsel %vm5029_vm15, %v5027_v36, %v1539_v1  ;;  %vm5030_vm10 = vweird.f32 %v2584_v10  ;;  %vm5031_vm12 = vweird.f32 %v3951_v15 }
 0x6ea   : > { %vm4248_vm6 = vmor %vm5031_vm12, %vm5030_vm10  ;;  %v1620_v61 = vsel %vm3853_vm7, %v5034_v39, %v1579_v26  ;;  %v1621_v35 = vsel %vm4995_vm1, %v5034_v39, %v1580_v40  ;;  %v1818_v34 = vand.u32 1, %v1797_v22  ;;  %v5035_v54 = vsel %vm4995_vm1, %v3978_v6, %v3994_v52  ;;  %v4297_v26 = vld [vmem:[#allocation1 + $0x2] ss:$9 sm:$0xff] }
 0x6eb   : > { %v4265_v15 = vsel %vm5019_vm5, %v1647_v60, %v5035_v54  ;;  %v2014_v1 = vadd.f32 %v2584_v10, %v2013_v51  ;;  %v2028_v28 = vmul.f32 %v2586_v50, %v2027_v32  ;;  %v4270_v36 = vsel %vm5017_vm11, %v3354_v4, %v1620_v61 }
 0x6ec   : > { %v4275_v22 = vsel %vm5019_vm5, %v3354_v4, %v1621_v35  ;;  %vm5036_vm10 = vweird.f32 %v2586_v50  ;;  %vm5037_vm12 = vweird.f32 %v4106_v57  ;;  %v2037_v52 = vor.u32 1.1754944e-38, %v2036_v47 }
 0x6ed   : > { %vm4280_vm1 = vmor %vm5037_vm12, %vm5036_vm10  ;;  %v1932_v60 = vsub.f32 %v4270_v36, %v4111_v25  ;;  %v1933_v51 = vsub.f32 %v4275_v22, %v4119_v63  ;;  %vm4288_vm11 = vcmp.eq.s32.totalorder %v1818_v34, 0  ;;  %v2018_v4 = vsel %vm4248_vm6, %v2584_v10, %v2014_v1 }
 0x6ee   : > { %v2029_v57 = vadd.f32 %v2586_v50, %v2028_v28  ;;  %vm2035_vm10 = vcmp.eq.f32.partialorder %v2034_v21, 8.507059e+37  ;;  %v1935_v47 = vsub.f32 %v4195_v12, %v4152_v7  ;;  %v2023_v25 = vsel %vm4171_vm8, %v2022_v41, %v2018_v4  ;;  %v5050_v4 = vld [vmem:[#allocation14_spill] sm:$0xff] }
 0x6ef   : > { %v1994_v63 = vmul.f32 %v1993_v62, %v1932_v60  ;;  %v2009_v40 = vmul.f32 %v2008_v0, %v1933_v51  ;;  %v1887_v39 = vsel %vm4288_vm11, %v3621_v17, %v3624_v33  ;;  %v5042_v10 = vcvt.f32.s32 %v3976_v53 }
 0x6f0   : > { %v2033_v21 = vsel %vm4280_vm1, %v2586_v50, %v2029_v57  ;;  %v4309_v7 = vmul.f32 %v2023_v25, %v1934_v31  ;;  %v1873_v13 = vsel %vm4288_vm11, %v4042_v11, %v4059_v37  ;;  %v1888_v41 = vsel %vm4288_vm11, %v3635_v27, %v3638_v42 }
 0x6f1   : > { %2198 = vst [vmem:[#allocation1] sm:$0xff] %v5042_v10  ;;  %v5043_v53 = vcvt.f32.s32 %v4109_v46  ;;  %v2038_v62 = vsel %vm2035_vm10, %v2037_v52, %v2033_v21  ;;  %v2146_v12 = vrot.slane %v1994_v63, 4  ;;  %v1874_v0 = vsel %vm4288_vm11, %v4056_v44, %v4074_v2 }
 0x6f2   : > { %v4334_v50 = vmul.f32 %v2038_v62, %v1935_v47  ;;  %v2147_v46 = vrot.slane %v4309_v7, 4  ;;  %v2149_v31 = vrot.slane %v2009_v40, 4  ;;  %v4337_v14 = vrot.slane %v1887_v39, 4 }
 0x6f3   : > { %2199 = vst [vmem:[#allocation1 + $0x9] sm:$0xff] %v5043_v53  ;;  %v4339_v61 = vrot.slane %v1873_v13, 4  ;;  %v4341_v35 = vrot.slane %v1888_v41, 4  ;;  %vm5044_vm6 = vcmask 1043456   ;;  %v4348_v1 = vrot.slane %v1874_v0, 4  ;;  %v5057_v13 = vld [vmem:[#allocation15_spill] sm:$0xff] }
 0x6f4   : > { %v2148_v34 = vsel %vm5044_vm6, %v2146_v12, %v2147_v46  ;;  %v2150_v54 = vrot.slane %v4334_v50, 4  ;;  %vm5045_vm1 = vmmov %vm5044_vm6  ;;  %v1825_v25 = vand.u32 1, %v1798_v43 }
 0x6f5   : > { %v4353_v28 = vsel %vm5045_vm1, %v3879_v5, %v4337_v14  ;;  %2174 = vst [vmem:[%s4332_s16] sm:$0xff] %v2148_v34  ;;  %vm5046_vm8 = vmmov %vm5045_vm1  ;;  %v1382_v5 = vsel %vm3735_vm13, %v3497_v56, 0.0 }
 0x6f6   : > { %v4364_v6 = vsel %vm5046_vm8, %v3916_v9, %v4341_v35  ;;  %2587 = vrcp.f32 %v4353_v28  ;;  %vm5047_vm11 = vmmov %vm5045_vm1  ;;  %v2049_v51 = vand.u32 2147483647, %v4353_v28  ;;  %v2051_v32 = vand.u32 2147483648, %v4353_v28 }
 0x6f7   : > { %v2151_v52 = vsel %vm5047_vm11, %v2149_v31, %v2150_v54  ;;  %2589 = vrcp.f32 %v4364_v6  ;;  %vm5048_vm12 = vmmov %vm5045_vm1  ;;  %v1423_v57 = vsel %vm3739_vm14, %v5050_v4, %v1382_v5  ;;  %vm2045_vm13 = vweird.f32 %v4353_v28 }
 0x6f8   : > { %2175 = vst [vmem:[%s4332_s16 + $0x8] sm:$0xff] %v2151_v52  ;;  %v4379_v60 = vsel %vm5048_vm12, %v4114_v48, %v4339_v61  ;;  %vm5049_vm10 = vmmov %vm5045_vm1  ;;  %v1383_v48 = vsel %vm3744_vm4, %v3497_v56, 0.0  ;;  %vm2060_vm4 = vweird.f32 %v4364_v6  ;;  %vm4409_vm14 = vcmp.lt.s32.totalorder %v5051_v24, 256 }
 0x6f9   : > { %v4386_v9 = vsel %vm5049_vm10, %v4121_v45, %v4348_v1  ;;  %v1936_v47 = vsub.f32 %v4237_v30, %v4379_v60  ;;  %v1799_v45 = vadd.s32 32, %v3585_v55  ;;  %vm4414_vm6 = vcmp.eq.f32.partialorder %v2049_v51, 8.507059e+37  ;;  %2195 = vst.msk [vmem:[%s235_s8] sm:$0x3] %vm4409_vm14, %v4297_v26 }
 0x6fa   : > { %v1937_v56 = vsub.f32 %v4265_v15, %v4386_v9  ;;  %v1424_v21 = vsel %vm3751_vm2, %v5050_v4, %v1383_v48  ;;  %v1464_v53 = vsel %vm3761_vm3, %v5057_v13, %v1423_v57  ;;  %v2052_v62 = vor.u32 1.1754944e-38, %v2051_v32 }
 0x6fb   : > { %v2064_v0 = vand.u32 2147483647, %v4364_v6  ;;  %v2066_v31 = vand.u32 2147483648, %v4364_v6 }
 0x6fc   : > { %v2588_v63 = vpop.eup %2587 }
 0x6fd   : > { %v2590_v55 = vpop.eup %2589  ;;  %v2041_v40 = vmul.f32 %v2588_v63, %v4353_v28 }
 0x6fe   : > { %v2056_v12 = vmul.f32 %v2590_v55, %v4364_v6 }
 0x6ff   : > { %2645 = shalt.err (!%p2642_p3)
}
 0x700   : > { %2445 = dma.vmem_to_hbm [thread:$0]  (%p2822_p5), %s4400_s9, 32, %s4402_s10, %s4432_s11   ;;  %v2042_v26 = vsub.f32 1.0, %v2041_v40  ;;  %vm2046_vm2 = vweird.f32 %v2588_v63  ;;  %v1832_v34 = vand.u32 1, %v1799_v45  ;;  %vm4448_vm3 = vcmp.eq.s32.totalorder %v1825_v25, 0  ;;  %v4452_v51 = vpop.permute.xlu0 %1613  ;;  %v5061_v32 = vld [vmem:[#allocation16_spill] sm:$0xff]  ;;  %v5072_v41 = vld [vmem:[#allocation19_spill] sm:$0xff]  ;;  %v1655_v9 = vpop.permute.xlu1 %1654 }
 0x701   : > { %v2057_v5 = vsub.f32 1.0, %v2056_v12  ;;  %vm2061_vm1 = vweird.f32 %v2590_v55  ;;  %v1465_v43 = vsel %vm3769_vm9, %v5057_v13, %v1424_v21  ;;  %vm5062_vm8 = vnez %v4962_v18  ;;  %vm4474_vm9 = vmor %vm2045_vm13, %vm2046_vm2  ;;  %v5084_v50 = vld [vmem:[#allocation29_spill] sm:$0xff]  ;;  %s2261_s10 = scalar_lea.hbm %s4809_s5, %s2427_s13  ;;  %s242_s12 = scalar_lea.vmem [#allocation6], %s2418_s17 }
 0x702   : > { %v1505_v48 = vsel %vm5062_vm8, %v5061_v32, %v1464_v53  ;;  %v2043_v4 = vmul.f32 %v2588_v63, %v2042_v26  ;;  %vm4460_vm11 = vcmp.eq.s32.totalorder %v1832_v34, 0  ;;  %v1889_v45 = vsel %vm4448_vm3, %v3621_v17, %v3624_v33  ;;  %vm4488_vm10 = vmor %vm2060_vm4, %vm2061_vm1  ;;  %v5106_v28 = vld [vmem:[#allocation25_spill] sm:$0xff]  ;;  %s2263_s14 = sshll.u32 %s242_s12, 4  ;;  %s2265_s15 = sshll.u32 %s2261_s10, 4  ;;  %s2264_s14 = int_to_ptr.vmem [resolvable:$true] %s2263_s14  ;;  %s2266_s15 = int_to_ptr.hbm [resolvable:$true] %s2265_s15 }
 0x703   : > { %v1890_v38 = vsel %vm4448_vm3, %v3635_v27, %v3638_v42  ;;  %v2058_v25 = vmul.f32 %v2590_v55, %v2057_v5  ;;  %vm4478_vm12 = vcmp.eq.f32.partialorder %v2064_v0, 8.507059e+37  ;;  %v2067_v40 = vor.u32 1.1754944e-38, %v2066_v31  ;;  %s2660_s13 = sshra.s32 %s2266_s15, 4  ;;  %s2666_s26 = scalar_lea.hbm %s4809_s5, 4  ;;  %s2661_s13 = int_to_ptr.hbm [resolvable:$true] %s2660_s13 }
 0x704   : > { %v1891_v10 = vsel %vm4460_vm11, %v3621_v17, %v3624_v33  ;;  %v2044_v21 = vadd.f32 %v2588_v63, %v2043_v4  ;;  %vm5071_vm13 = vnez %v4964_v3  ;;  %vm5073_vm2 = vnez %v4966_v20  ;;  %p2667_p9 = scmp.lt.s32.totalorder %s2661_s13, %s4809_s5 }
 0x705   : > { %v1506_v13 = vsel %vm5071_vm13, %v5061_v32, %v1465_v43  ;;  %v1546_v53 = vsel %vm5073_vm2, %v5072_v41, %v1505_v48  ;;  %v1892_v17 = vsel %vm4460_vm11, %v3635_v27, %v3638_v42  ;;  %v2059_v33 = vadd.f32 %v2590_v55, %v2058_v25 }
 0x706   : > { %v1875_v6 = vsel %vm4448_vm3, %v4042_v11, %v4059_v37  ;;  %v1962_v12 = vrot.slane %v1889_v45, 4  ;;  %v1964_v0 = vrot.slane %v1890_v38, 4  ;;  %v2048_v3 = vsel %vm4474_vm9, %v2588_v63, %v2044_v21 }
 0x707   : > { %v1876_v20 = vsel %vm4448_vm3, %v4056_v44, %v4074_v2  ;;  %v1966_v31 = vrot.slane %v1891_v10, 4  ;;  %v1968_v26 = vrot.slane %v1892_v17, 4  ;;  %v2053_v27 = vsel %vm4414_vm6, %v2052_v62, %v2048_v3 }
 0x708   : > { %v2063_v42 = vsel %vm4488_vm10, %v2590_v55, %v2059_v33  ;;  %v1877_v34 = vsel %vm4460_vm11, %v4042_v11, %v4059_v37  ;;  %v1878_v63 = vsel %vm4460_vm11, %v4056_v44, %v4074_v2  ;;  %v4529_v39 = vmul.f32 %v2053_v27, %v1936_v47  ;;  %v5077_v37 = vld [vmem:[#allocation22_spill] sm:$0xff]  ;;  %v1651_v43 = vpop.permute.xlu0 %1650 }
 0x709   : > { %v2068_v52 = vsel %vm4478_vm12, %v2067_v40, %v2063_v42  ;;  %vm5074_vm4 = vcmask 1043456   ;;  %vm5076_vm3 = vnez %v4968_v16  ;;  %v1587_v2 = vsel %vm5028_vm0, %v5077_v37, %v1546_v53 }
 0x70a   : > { %v1967_v55 = vsel %vm5074_vm4, %v1962_v12, %v1966_v31  ;;  %vm5075_vm6 = vmmov %vm5074_vm4  ;;  %v4536_v11 = vmul.f32 %v2068_v52, %v1937_v56  ;;  %v1547_v44 = vsel %vm5076_vm3, %v5072_v41, %v1506_v13  ;;  %v2152_v30 = vrot.slane %v4529_v39, 4  ;;  %v5091_v13 = vld [vmem:[#allocation28_spill] sm:$0xff]  ;;  %v5111_v39 = vld [vmem:[#allocation26_spill] sm:$0xff] }
 0x70b   : > { %v1969_v62 = vsel %vm5075_vm6, %v1964_v0, %v1968_v26  ;;  %2591 = vrcp.f32 %v1967_v55  ;;  %v1628_v60 = vsel %vm3853_vm7, %v4452_v51, %v1587_v2  ;;  %v1914_v15 = vrot.slane %v1875_v6, 4  ;;  %vm5078_vm0 = vmmov %vm5074_vm4 }
 0x70c   : > { %2593 = vrcp.f32 %v1969_v62  ;;  %v2154_v47 = vrot.slane %v4536_v11, 4  ;;  %v1916_v16 = vrot.slane %v1876_v20, 4  ;;  %v1918_v56 = vrot.slane %v1877_v34, 4  ;;  %vm5079_vm1 = vmmov %vm5078_vm0 }
 0x70d   : > { %v1920_v5 = vrot.slane %v1878_v63, 4  ;;  %v2153_v49 = vsel %vm5078_vm0, %v2147_v46, %v2152_v30  ;;  %v1588_v32 = vsel %vm5029_vm15, %v5077_v37, %v1547_v44  ;;  %vm5080_vm8 = vnez %v4983_v58  ;;  %vm5082_vm9 = vmmov %vm5078_vm0 }
 0x70e   : > { %v2155_v48 = vsel %vm5079_vm1, %v2150_v54, %v2154_v47  ;;  %2176 = vst [vmem:[%s4332_s16 + $0x10] sm:$0xff] %v2153_v49  ;;  %v1629_v4 = vsel %vm5080_vm8, %v4452_v51, %v1588_v32  ;;  %vm5081_vm11 = vnez %v4986_v23  ;;  %v2109_v46 = vand.u32 2147483647, %v1967_v55  ;;  %vm5083_vm15 = vmmov %vm5078_vm0  ;;  %v5085_v54 = vld [vmem:[#allocation27_spill] sm:$0xff] }
 0x70f   : > { %v1669_v7 = vsel %vm5081_vm11, %v1655_v9, %v1628_v60  ;;  %2177 = vst [vmem:[%s4332_s16 + $0x18] sm:$0xff] %v2155_v48  ;;  %v1963_v59 = vsel %vm5082_vm9, %v4337_v14, %v1962_v12  ;;  %v4573_v57 = vsel %vm5083_vm15, %v4341_v35, %v1964_v0  ;;  %v5086_v45 = vsel %vm3853_vm7, %v5084_v50, %v5085_v54  ;;  %vm5087_vm12 = vmmov %vm5078_vm0 }
 0x710   : > { %v4582_v51 = vsel %vm5081_vm11, %v1651_v43, %v5086_v45  ;;  %v1919_v18 = vsel %vm5087_vm12, %v1914_v15, %v1918_v56  ;;  %vm5088_vm10 = vmmov %vm5078_vm0  ;;  %v2111_v24 = vand.u32 2147483648, %v1967_v55  ;;  %2595 = vrcp.f32 %v1963_v59 }
 0x711   : > { %v2592_v38 = vpop.eup %2591  ;;  %v1921_v25 = vsel %vm5088_vm10, %v1916_v16, %v1920_v5  ;;  %v2124_v35 = vand.u32 2147483647, %v1969_v62  ;;  %v2126_v10 = vand.u32 2147483648, %v1969_v62  ;;  %2597 = vrcp.f32 %v4573_v57 }
 0x712   : > { %v2594_v14 = vpop.eup %2593  ;;  %v2101_v40 = vmul.f32 %v2592_v38, %v1967_v55  ;;  %vm2105_vm13 = vweird.f32 %v1967_v55  ;;  %vm2120_vm7 = vweird.f32 %v1969_v62  ;;  %v1670_v23 = vsel %vm5019_vm5, %v1655_v9, %v1629_v4 }
 0x713   : > { %v2116_v19 = vmul.f32 %v2594_v14, %v1969_v62  ;;  %vm2106_vm2 = vweird.f32 %v2592_v38  ;;  %vm4589_vm4 = vcmp.eq.f32.partialorder %v2109_v46, 8.507059e+37  ;;  %v5092_v41 = vsel %vm5080_vm8, %v5084_v50, %v5091_v13  ;;  %v5104_v46 = vld [vmem:[#allocation17_spill] sm:$0xff] }
 0x714   : > { %v2102_v21 = vsub.f32 1.0, %v2101_v40  ;;  %v1668_v53 = vsel %vm5019_vm5, %v1651_v43, %v5092_v41  ;;  %v2112_v17 = vor.u32 1.1754944e-38, %v2111_v24  ;;  %vm2121_vm6 = vweird.f32 %v2594_v14  ;;  %vm4605_vm0 = vmor %vm2105_vm13, %vm2106_vm2 }
 0x715   : > { %v2117_v33 = vsub.f32 1.0, %v2116_v19  ;;  %v1940_v6 = vsub.f32 %v1669_v7, %v1919_v18  ;;  %vm4600_vm3 = vcmp.eq.f32.partialorder %v2124_v35, 8.507059e+37  ;;  %v2127_v3 = vor.u32 1.1754944e-38, %v2126_v10  ;;  %vm5097_vm5 = vmmov %vm5079_vm1 }
 0x716   : > { %v2103_v12 = vmul.f32 %v2592_v38, %v2102_v21  ;;  %v1941_v20 = vsub.f32 %v1670_v23, %v1921_v25  ;;  %v2596_v31 = vpop.eup %2595  ;;  %v1915_v29 = vsel %vm5097_vm5, %v4339_v61, %v1914_v15  ;;  %v1917_v27 = vsel %vm5079_vm1, %v4348_v1, %v1916_v16  ;;  %vm4614_vm11 = vmor %vm2120_vm7, %vm2121_vm6 }
 0x717   : > { %v2118_v26 = vmul.f32 %v2594_v14, %v2117_v33  ;;  %vm2075_vm8 = vweird.f32 %v1963_v59  ;;  %v2598_v42 = vpop.eup %2597  ;;  %v2071_v52 = vmul.f32 %v2596_v31, %v1963_v59  ;;  %v2079_v55 = vand.u32 2147483647, %v1963_v59  ;;  %vm5108_vm6 = vmmov %vm5079_vm1 }
 0x718   : > { %v2104_v34 = vadd.f32 %v2592_v38, %v2103_v12  ;;  %v2081_v44 = vand.u32 2147483648, %v1963_v59  ;;  %v2086_v2 = vmul.f32 %v2598_v42, %v4573_v57  ;;  %vm2090_vm9 = vweird.f32 %v4573_v57 }
 0x719   : > { %v2119_v37 = vadd.f32 %v2594_v14, %v2118_v26  ;;  %v2094_v61 = vand.u32 2147483647, %v4573_v57  ;;  %v2072_v60 = vsub.f32 1.0, %v2071_v52  ;;  %vm2076_vm15 = vweird.f32 %v2596_v31 }
 0x71a   : > { %v2108_v1 = vsel %vm4605_vm0, %v2592_v38, %v2104_v34  ;;  %v2096_v62 = vand.u32 2147483648, %v4573_v57  ;;  %v2087_v16 = vsub.f32 1.0, %v2086_v2  ;;  %vm2091_vm12 = vweird.f32 %v2598_v42  ;;  %vm4635_vm13 = vmor %vm2075_vm8, %vm2076_vm15  ;;  %v5105_v57 = vld [vmem:[#allocation18_spill] sm:$0xff] }
 0x71b   : > { %v2113_v15 = vsel %vm4589_vm4, %v2112_v17, %v2108_v1  ;;  %v2123_v9 = vsel %vm4614_vm11, %v2594_v14, %v2119_v37  ;;  %v2073_v43 = vmul.f32 %v2596_v31, %v2072_v60  ;;  %vm4630_vm10 = vcmp.eq.f32.partialorder %v2079_v55, 8.507059e+37  ;;  %vm2092_vm7 = vmor %vm2090_vm9, %vm2091_vm12 }
 0x71c   : > { %v2128_v56 = vsel %vm4600_vm3, %v2127_v3, %v2123_v9  ;;  %v2114_v5 = vmul.f32 %v2113_v15, %v1940_v6  ;;  %v2082_v4 = vor.u32 1.1754944e-38, %v2081_v44  ;;  %v2088_v7 = vmul.f32 %v2598_v42, %v2087_v16  ;;  %vm5107_vm4 = vmmov %vm5079_vm1 }
 0x71d   : > { %v2129_v32 = vmul.f32 %v2128_v56, %v1941_v20  ;;  %v4640_v50 = vrot.slane %v5104_v46, 2  ;;  %v2074_v45 = vadd.f32 %v2596_v31, %v2073_v43  ;;  %v2097_v38 = vor.u32 1.1754944e-38, %v2096_v62  ;;  %vm5109_vm3 = vmmov %vm5079_vm1 }
 0x71e   : > { %v2160_v54 = vrot.slane %v2114_v5, 4  ;;  %v1938_v18 = vsub.f32 %v4582_v51, %v1915_v29  ;;  %v2089_v25 = vadd.f32 %v2598_v42, %v2088_v7  ;;  %vm2095_vm2 = vcmp.eq.f32.partialorder %v2094_v61, 8.507059e+37  ;;  %vm5110_vm0 = vmmov %vm5079_vm1 }
 0x71f   : > { %v2162_v59 = vrot.slane %v2129_v32, 4  ;;  %v1939_v24 = vsub.f32 %v1668_v53, %v1917_v27  ;;  %v2078_v14 = vsel %vm4635_vm13, %v2596_v31, %v2074_v45  ;;  %v4652_v10 = vrot.slane %v5105_v57, 2 }
 0x720   : > { %2182 = vst [vmem:[%s4332_s16 + $0x40] sm:$0xf] %v2160_v54  ;;  %v2083_v40 = vsel %vm4630_vm10, %v2082_v4, %v2078_v14  ;;  %v2093_v35 = vsel %vm2092_vm7, %v2598_v42, %v2089_v25  ;;  %2599 = vrcp.f32 %v4640_v50  ;;  %v2751_v3 = vmov 0.2  }
 0x721   : > { %2183 = vst [vmem:[%s4332_s16 + $0x48] sm:$0xf] %v2162_v59  ;;  %v2098_v51 = vsel %vm2095_vm2, %v2097_v38, %v2093_v35  ;;  %v2084_v19 = vmul.f32 %v2083_v40, %v1938_v18  ;;  %2601 = vrcp.f32 %v5106_v28  ;;  %v1746_v31 = vand.u32 2147483647, %v5106_v28 }
 0x722   : > { %v2099_v23 = vmul.f32 %v2098_v51, %v1939_v24  ;;  %2603 = vrcp.f32 %v4652_v10  ;;  %v1748_v58 = vand.u32 2147483648, %v5106_v28 }
 0x723   : > { %v2156_v21 = vrot.slane %v2084_v19, 4  ;;  %2605 = vrcp.f32 %v5111_v39 }
 0x724   : > { %v2158_v13 = vrot.slane %v2099_v23, 4  ;;  %2607 = vrcp.f32 %v2751_v3 }
 0x725   : > { %v2157_v41 = vsel %vm5107_vm4, %v2152_v30, %v2156_v21  ;;  %v2161_v53 = vsel %vm5108_vm6, %v2156_v21, %v2160_v54  ;;  %v2201_v30 = vld [vmem:[#allocation1 + $0x2] ss:$9 sm:$0xff] }
 0x726   : > { %v4668_v17 = vpop.eup %2599  ;;  %v2159_v33 = vsel %vm5109_vm3, %v2154_v47, %v2158_v13  ;;  %v2163_v6 = vsel %vm5110_vm0, %v2158_v13, %v2162_v59  ;;  %2178 = vst [vmem:[%s4332_s16 + $0x20] sm:$0xff] %v2157_v41  ;;  %v1731_v47 = vrot.slane %v4270_v36, 6 }
 0x727   : > { %2179 = vst [vmem:[%s4332_s16 + $0x28] sm:$0xff] %v2159_v33  ;;  %v2602_v12 = vpop.eup %2601  ;;  %v1702_v0 = vmul.f32 %v4668_v17, %v4640_v50 }
 0x728   : > { %2180 = vst [vmem:[%s4332_s16 + $0x30] sm:$0xff] %v2161_v53  ;;  %v4681_v11 = vpop.eup %2603  ;;  %v1738_v20 = vmul.f32 %v5106_v28, %v2602_v12 }
 0x729   : > { %2181 = vst [vmem:[%s4332_s16 + $0x38] sm:$0xff] %v2163_v6  ;;  %s2662_s16 = scalar_lea.hbm %s2661_s13, 2 }
 0x72a   : > { %2202 = vst.msk [vmem:[%s242_s12] sm:$0x3] %vm4409_vm14, %v2201_v30  ;;  %p2663_p4 = scmp.ne.s32.totalorder %s2661_s13, %s2662_s16  ;;  %p2668_p10 = scmp.lt.s32.totalorder %s2666_s26, %s2662_s16 }
 0x72c   : > { %p2664_p7 = pnand %p2663_p4, %p2822_p5  ;;  %p2669_p11 = por %p2668_p10, %p2667_p9 }
 0x72e   : > { %p2665_p8 = pneg %p2664_p7 }
 0x730   : > { %p2670_p12 = pnand %p2669_p11, %p2665_p8 }
 0x732   : > { %2673 = shalt.err (!%p2670_p12)
}
 0x733   : > { %2446 = dma.vmem_to_hbm [thread:$0]  (%p2822_p5), %s2264_s14, 32, %s2266_s15, %s4432_s11   ;;  %v1739_v8 = vsub.f32 1.0, %v1738_v20  ;;  %vm1742_vm14 = vweird.f32 %v5106_v28  ;;  %vm1743_vm5 = vweird.f32 %v2602_v12  ;;  %v2606_v26 = vpop.eup %2605  ;;  %v1683_v29 = vrot.slane %v4270_v36, 2 }
 0x734   : > { %v1703_v27 = vsub.f32 1.0, %v1702_v0  ;;  %v1717_v42 = vmul.f32 %v4681_v11, %v4652_v10  ;;  %v1732_v34 = vrot.slane %v4275_v22, 6  ;;  %v1735_v63 = vsub.f32 %v4270_v36, %v1731_v47  ;;  %v2608_v37 = vpop.eup %2607  ;;  %vm4711_vm8 = vmor %vm1742_vm14, %vm1743_vm5  ;;  %s2417_s11 = sshll.u32 %s4320_s30, 3  ;;  %s2431_s7 = sshll.u32 %s2803_s22, 3 }
 0x735   : > { %v1740_v52 = vmul.f32 %v2602_v12, %v1739_v8  ;;  %vm4706_vm1 = vcmp.eq.f32.partialorder %v1746_v31, 8.507059e+37  ;;  %v1753_v44 = vmul.f32 %v5111_v39, %v2606_v26  ;;  %v1749_v61 = vor.u32 1.1754944e-38, %v1748_v58  ;;  %v5123_v31 = vld [vmem:[#allocation24_spill] sm:$0xff]  ;;  %s2230_s12 = scalar_lea.hbm %s4806_s2, %s2431_s7  ;;  %s221_s22 = scalar_lea.vmem [#allocation2], %s2417_s11 }
 0x736   : > { %vm1757_vm11 = vweird.f32 %v5111_v39  ;;  %v1761_v1 = vand.u32 2147483647, %v5111_v39  ;;  %v1763_v60 = vand.u32 2147483648, %v5111_v39  ;;  %vm1758_vm9 = vweird.f32 %v2606_v26  ;;  %s2232_s14 = sshll.u32 %s221_s22, 4  ;;  %s2234_s15 = sshll.u32 %s2230_s12, 4  ;;  %s2233_s14 = int_to_ptr.vmem [resolvable:$true] %s2232_s14  ;;  %s2235_s15 = int_to_ptr.hbm [resolvable:$true] %s2234_s15 }
 0x737   : > { %v1741_v62 = vadd.f32 %v2602_v12, %v1740_v52  ;;  %v1754_v15 = vsub.f32 1.0, %v1753_v44  ;;  %v1772_v9 = vmul.f32 0.2, %v2608_v37  ;;  %v1684_v16 = vrot.slane %v4275_v22, 2  ;;  %vm4728_vm15 = vmor %vm1757_vm11, %vm1758_vm9  ;;  %s2204_s13 = scalar_lea.sflag [#allocation3], %s4320_s30  ;;  %s2688_s16 = sshra.s32 %s2235_s15, 4  ;;  %s2689_s16 = int_to_ptr.hbm [resolvable:$true] %s2688_s16 }
 0x738   : > { %v1718_v56 = vsub.f32 1.0, %v1717_v42  ;;  %v1687_v5 = vadd.f32 %v1683_v29, %v4270_v36  ;;  %v1704_v48 = vmul.f32 %v4668_v17, %v1703_v27  ;;  %v1736_v4 = vsub.f32 %v4275_v22, %v1732_v34  ;;  %v5125_v42 = vld [vmem:[#allocation23_spill] sm:$0xff]  ;;  %s2690_s17 = scalar_lea.hbm %s2689_s16, 8  ;;  %s2694_s6 = scalar_lea.hbm %s4806_s2, 16 }
 0x739   : > { %v1745_v43 = vsel %vm4711_vm8, %v2602_v12, %v1741_v62  ;;  %v1755_v49 = vmul.f32 %v2606_v26, %v1754_v15  ;;  %v1773_v32 = vsub.f32 1.0, %v1772_v9  ;;  %v1764_v54 = vor.u32 1.1754944e-38, %v1763_v60  ;;  %p2691_p13 = scmp.ne.s32.totalorder %s2689_s16, %s2690_s17  ;;  %p2695_p2 = scmp.lt.s32.totalorder %s2689_s16, %s4806_s2 }
 0x73a   : > { %v1750_v7 = vsel %vm4706_vm1, %v1749_v61, %v1745_v43  ;;  %vm1762_vm12 = vcmp.eq.f32.partialorder %v1761_v1, 8.507059e+37  ;;  %v1688_v18 = vadd.f32 %v1684_v16, %v4275_v22  ;;  %vm1706_vm10 = vweird.f32 %v4640_v50  ;;  %p2696_p3 = scmp.lt.s32.totalorder %s2694_s6, %s2690_s17 }
 0x73b   : > { %v1751_v36 = vmul.f32 %v1750_v7, %v1735_v63  ;;  %v1756_v45 = vadd.f32 %v2606_v26, %v1755_v49  ;;  %v1774_v38 = vmul.f32 %v2608_v37, %v1773_v32  ;;  %vm1707_vm13 = vweird.f32 %v4668_v17  ;;  %p2692_p0 = pnand %p2691_p13, %p2822_p5 }
 0x73c   : > { %v1719_v59 = vmul.f32 %v4681_v11, %v1718_v56  ;;  %v1710_v25 = vand.u32 2147483647, %v4640_v50  ;;  %v1712_v24 = vand.u32 2147483648, %v4640_v50  ;;  %v1705_v40 = vadd.f32 %v4668_v17, %v1704_v48  ;;  %vm4743_vm4 = vmor %vm1706_vm10, %vm1707_vm13  ;;  %p2697_p4 = por %p2696_p3, %p2695_p2 }
 0x73d   : > { %v1760_v14 = vsel %vm4728_vm15, %v2606_v26, %v1756_v45  ;;  %2609 = vlog2.f32 %v1751_v36  ;;  %vm1721_vm7 = vweird.f32 %v4652_v10  ;;  %vm1722_vm2 = vweird.f32 %v4681_v11  ;;  %p2693_p1 = pneg %p2692_p0 }
 0x73e   : > { %v1765_v22 = vsel %vm1762_vm12, %v1764_v54, %v1760_v14  ;;  %v1727_v57 = vand.u32 2147483648, %v4652_v10  ;;  %v1775_v19 = vadd.f32 %v2608_v37, %v1774_v38  ;;  %v1689_v50 = vmul.f32 0.5, %v1687_v5  ;;  %vm4750_vm3 = vmor %vm1721_vm7, %vm1722_vm2 }
 0x73f   : > { %v1766_v51 = vmul.f32 %v1765_v22, %v1736_v4  ;;  %v1720_v23 = vadd.f32 %v4681_v11, %v1719_v59  ;;  %v1725_v21 = vand.u32 2147483647, %v4652_v10  ;;  %vm1776_vm6 = vweird.f32 %v2608_v37  ;;  %p2698_p7 = pnand %p2697_p4, %p2693_p1 }
 0x740   : > { %v1713_v13 = vor.u32 1.1754944e-38, %v1712_v24  ;;  %v1690_v53 = vmul.f32 0.5, %v1688_v18  ;;  %v1709_v33 = vsel %vm4743_vm4, %v4668_v17, %v1705_v40  ;;  %vm1711_vm0 = vcmp.eq.f32.partialorder %v1710_v25, 8.507059e+37 }
 0x741   : > { %2611 = vlog2.f32 %v1766_v51  ;;  %v1728_v30 = vor.u32 1.1754944e-38, %v1727_v57  ;;  %v1777_v12 = vsel %vm1776_vm6, %v2608_v37, %v1775_v19  ;;  %v1691_v10 = vsub.f32 %v1689_v50, %v5106_v28 }
 0x742   : > { %v1724_v0 = vsel %vm4750_vm3, %v4681_v11, %v1720_v23  ;;  %vm1726_vm14 = vcmp.eq.f32.partialorder %v1725_v21, 8.507059e+37  ;;  %v1714_v47 = vsel %vm1711_vm0, %v1713_v13, %v1709_v33  ;;  %v5122_v20 = vmov 0  }
 0x743   : > { %v2610_v6 = vpop.eup %2609  ;;  %vm5124_vm5 = vnez %v5123_v31  ;;  %v1692_v17 = vsub.f32 %v1690_v53, %v5111_v39  ;;  %v1729_v29 = vsel %vm1726_vm14, %v1728_v30, %v1724_v0  ;;  %vm1780_vm1 = vcmask 1041408  }
 0x744   : > { %v1768_v3 = vmul.f32 0.6931472, %v2610_v6  ;;  %v1787_v58 = vsel %vm5124_vm5, 1, %v5122_v20  ;;  %v1715_v28 = vmul.f32 %v1714_v47, %v1691_v10  ;;  %vm5126_vm8 = vnez %v5125_v42 }
 0x745   : > { %v1786_v11 = vsel %vm5126_vm8, 1, %v5122_v20  ;;  %v1789_v34 = vperm.slane %v1787_v58, 2  ;;  %v1730_v63 = vmul.f32 %v1729_v29, %v1692_v17  ;;  %vm1783_vm11 = vcmask 1042432  }
 0x746   : > { %v1778_v8 = vmul.f32 %v1777_v12, %v1768_v3  ;;  %v1788_v39 = vperm.slane %v1786_v11, 2  ;;  %vm5127_vm12 = vcmask 1043456  }
 0x747   : > { %v2612_v26 = vpop.eup %2611  ;;  %vm1791_vm9 = vcmp.eq.s32.totalorder %v1789_v34, 1 }
 0x748   : > { %v1770_v27 = vmul.f32 0.6931472, %v2612_v26  ;;  %v1781_v55 = vsel %vm1780_vm1, %v1715_v28, %v1778_v8  ;;  %vm1790_vm15 = vcmp.eq.s32.totalorder %v1788_v39, 1 }
 0x749   : > { %v1784_v37 = vsel %vm1783_vm11, %v1781_v55, %v1778_v8 }
 0x74a   : > { %v1779_v52 = vmul.f32 %v1777_v12, %v1770_v27  ;;  %v1792_v60 = vsel %vm1790_vm15, 0.0, %v1784_v37 }
 0x74c   : > { %v1782_v44 = vsel %vm1780_vm1, %v1730_v63, %v1779_v52 }
 0x74d   : > { %v1785_v2 = vsel %vm1783_vm11, %v1782_v44, %v1779_v52 }
 0x74e   : > { %v1793_v61 = vsel %vm1791_vm9, 0.0, %v1785_v2 }
 0x74f   : > { %v2132_v1 = vrot.slane %v1793_v61, 4 }
 0x751   : > { %v2133_v62 = vsel %vm5127_vm12, %v1792_v60, %v2132_v1 }
 0x752   : > { %2135 = vst [vmem:[%s221_s22] sm:$0xff] %v2133_v62 }
 0x753   : > { %2701 = shalt.err (!%p2698_p7)
}
 0x754   : > { %2444 = dma.vmem_to_hbm [thread:$0]  (%p2822_p5), %s2233_s14, 128, %s2235_s15, %s2204_s13  }
 0x755 PF: > { %p2460_p8 = scmp.ge.s32.totalorder %s2740_s21, 2  ;;  %s2277_s30 = sand.u32 1, %s2728_s18  }
 0x756   : > { %s2278_s7 = scalar_lea.sflag [#allocation3], %s2277_s30 }
 0x757   : > { %p2451_p9 = pnand %p2460_p8, %p2826_p6 }
 0x759   : > { %p2452_p10 = pneg %p2451_p9 }
 0x75b   : > { %2719 = dma.done.wait (%p2452_p10), %s2278_s7, 128  }
 0x75c   : > { %2721 = vsyncadd (%p2452_p10), %s2278_s7, 4294967168  ;;  %s2295_s9 = sand.u32 1, %s2413_s23  }
 0x75d   : > { %s2296_s10 = scalar_lea.sflag [#allocation5], %s2295_s9 }
 0x75e   : > { %2723 = dma.done.wait (%p2452_p10), %s2296_s10, 64  }
 0x75f   : > { %2725 = vsyncadd (%p2452_p10), %s2296_s10, 4294967232  ;;  %p19_p5 = scmp.ge.s32.totalorder %s2807_s24, 4   ;;  %s5128_s18 = smov %s2732_s19 }
 0x760   : > { %s5129_s19 = smov %s2736_s20  ;;  %s5130_s20 = smov %s2820_s27 }
 0x761   : > { %s5131_s21 = smov %s2807_s24  ;;  %21 = sbr.rel (!%p19_p5) target bundleno = 5 (0x5), region = 109 }
 0x766   :  { %2312 = vsyncpa [#allocation3], 1 }
 0x767   :  { %2314 = vsyncpa [#allocation3 + $0x1], 1 }
 0x768   :  { %2315 = vsyncpa [#allocation5], 1 }
 0x769   :  { %2317 = vsyncpa [#allocation5 + $0x1], 1 }

</bundles_post_ra>
